<compile_context>
chip_gen: v7x
topology: tpu7x:2x2x1
jax: 0.10.0
libtpu: 0.0.40
codegen_flags: <defaults>
</compile_context>

<pallas_src>
import functools

import jax
import jax.numpy as jnp
from jax.experimental import pallas as pl
from jax.experimental.pallas import tpu as pltpu


# --------------------------- kernel 1: conv stage ----------------------------

def conv_stage_kernel(x_ref, w1_ref, b1_ref, w2_ref, b2_ref,
                      fc1_w_ref, fc1_b_ref, o_ref, s2_ref):
    # x_ref : (BN, H+2, W/4+2, 4*Cp) bf16 -- NHWC, width space-to-depth by 4
    #         (lane block r holds column 4*cell+r), zero-padded 1 row / 1 cell.
    # w1_ref: (9*Cp, 32) bf16 rows ordered (kh,kw,ch)     b1_ref: (1, 32) f32
    # w2_ref: (9*32, 64) bf16 rows ordered (kh,kw,ch)     b2_ref: (1, 64) f32
    # fc1_w : (H/4*64, 64) bf16 rows ordered (h4,ch)      fc1_b : (1, 64) f32
    # o_ref : (BN, W/4, 64) bf16  -- conv_to_lstm output
    # s2_ref: (BN, H/2+2, W/4+2, 2*32) f32 scratch -- pooled conv1, width
    #         space-to-depth by 2 (lane block b holds column 2*cell+b), haloed.
    BN, Hp, Wc, C4 = x_ref.shape
    H, W4 = Hp - 2, Wc - 2
    Cp = C4 // 4
    C1 = b1_ref.shape[1]
    C2 = b2_ref.shape[1]
    H2, H4 = H // 2, H // 4
    F1 = fc1_b_ref.shape[1]

    # Zero only the 1-element halo of the scratch; its interior is overwritten.
    s2_ref[:, 0:1, :, :] = jnp.zeros((BN, 1, W4 + 2, 2 * C1), jnp.float32)
    s2_ref[:, H2 + 1:H2 + 2, :, :] = jnp.zeros((BN, 1, W4 + 2, 2 * C1), jnp.float32)
    s2_ref[:, :, 0:1, :] = jnp.zeros((BN, H2 + 2, 1, 2 * C1), jnp.float32)
    s2_ref[:, :, W4 + 1:W4 + 2, :] = jnp.zeros((BN, H2 + 2, 1, 2 * C1), jnp.float32)

    # ---- conv1 + ReLU + 2x2 maxpool: taps folded into K, candidates along M --
    # candidate c = 2*b + dw (b = pooled-column parity, dw = in-window column);
    # conv1 output column 4*cell + c needs width offsets c-1, c, c+1.
    x = x_ref[...].astype(jnp.float32)
    slabs = []
    for kh in range(3):
        slabs.append(jnp.concatenate([
            x[:, kh:kh + H, 0:W4, 3 * Cp:4 * Cp],          # width offset -1
            x[:, kh:kh + H, 1:1 + W4, :],                  # width offsets 0..3
            x[:, kh:kh + H, 2:2 + W4, 0:Cp],               # width offset +4
        ], axis=-1))                                       # (BN, H, W4, 6*Cp)
    patch = jnp.concatenate([
        jnp.concatenate([s[:, :, :, c * Cp:(c + 3) * Cp] for s in slabs],
                        axis=-1).reshape(BN * H * W4, 9 * Cp)
        for c in range(4)], axis=0)                        # rows (c, n, h, cell)
    y = jnp.dot(patch.astype(jnp.bfloat16), w1_ref[...],
                preferred_element_type=jnp.float32)
    y = jnp.maximum(y + b1_ref[...], 0.0).reshape(4, BN * H * W4, C1)
    for b in range(2):
        cb = jnp.maximum(y[2 * b], y[2 * b + 1])           # max over dw
        cb = cb.reshape(BN * H2, 2, W4, C1)
        pb = jnp.maximum(cb[:, 0], cb[:, 1])               # max over row pair
        s2_ref[:, 1:1 + H2, 1:1 + W4, b * C1:(b + 1) * C1] = (
            pb.reshape(BN, H2, W4, C1))

    # ---- conv2 + ReLU + 2x2 maxpool on the half-resolution feature map ------
    s2 = s2_ref[...]
    slabs = []
    for kh in range(3):
        slabs.append(jnp.concatenate([
            s2[:, kh:kh + H2, 0:W4, C1:2 * C1],            # width offset -1
            s2[:, kh:kh + H2, 1:1 + W4, :],                # width offsets 0, 1
            s2[:, kh:kh + H2, 2:2 + W4, 0:C1],             # width offset +2
        ], axis=-1))                                       # (BN, H2, W4, 4*C1)
    patch = jnp.concatenate([
        jnp.concatenate([s[:, :, :, dw * C1:(dw + 3) * C1] for s in slabs],
                        axis=-1).reshape(BN * H2 * W4, 9 * C1)
        for dw in range(2)], axis=0)                       # rows (dw, n, h2, cell)
    y = jnp.dot(patch.astype(jnp.bfloat16), w2_ref[...],
                preferred_element_type=jnp.float32)
    y = jnp.maximum(y + b2_ref[...], 0.0).reshape(2, BN * H2 * W4, C2)
    c2 = jnp.maximum(y[0], y[1])                           # max over dw
    c2 = c2.reshape(BN * H4, 2, W4, C2)
    feat = jnp.maximum(c2[:, 0], c2[:, 1]).reshape(BN, H4, W4, C2)

    # ---- torch.transpose(x,-1,1)+reshape -> feature h4*64+c, then fc1+ReLU ---
    zfeat = jnp.concatenate([feat[:, h] for h in range(H4)], axis=-1)  # (BN,W4,H4*C2)
    z = jnp.dot(zfeat.reshape(BN * W4, H4 * C2).astype(jnp.bfloat16),
                fc1_w_ref[...], preferred_element_type=jnp.float32)
    z = jnp.maximum(z + fc1_b_ref[...], 0.0)
    o_ref[...] = z.reshape(BN, W4, F1).astype(jnp.bfloat16)


# ---------------------------- kernel 2: RNN head ------------------------------

def rnn_head_kernel(seq_len, batch, z_ref,
                    l1_wx_ref, l1_wh_ref, l1_b_ref,
                    l2_wx_ref, l2_wh_ref, l2_b_ref,
                    cls_w_ref, cls_b_ref,
                    o_ref, y1f_sc, y1b_sc, y2f_sc, y2b_sc):
    # z_ref: (T*B, 64) bf16 with T = image batch N, B = W/4 (batch_first=False).
    # LSTM params: wx (2, F, 4H) bf16, wh (2, H, 4H) bf16, b (2, 1, 4H) f32
    # (= b_ih + b_hh); dim 0 = direction (0 fwd, 1 bwd); gate order [i|f|o|g].
    # cls_w: (128, 128) bf16 (classes zero-padded); cls_b: (1, 128) f32
    # (padded entries = -1e30 so they vanish under log-softmax).
    T, B = seq_len, batch

    def sigmoid(v):
        # exact reciprocal: negligible cost, avoids compounding error through
        # the two stacked bidirectional recurrences.
        return pl.reciprocal(1.0 + jnp.exp(-v))

    def in_proj(parts, wx_ref, b_ref, d):
        # hoisted X @ Wx projection for ALL timesteps of direction d
        acc = b_ref[d]
        for arr, off in parts:
            fi = arr.shape[1]
            acc = acc + jnp.dot(arr, wx_ref[d, off:off + fi, :],
                                preferred_element_type=jnp.float32)
        return acc                                         # (T*B, 4H)

    def birecur(gx_f, gx_b, wh_ref, outf_sc, outb_sc):
        # fwd/bwd recurrences interleaved step-by-step so their (tiny-M) MXU
        # pushes and EUP chains overlap.
        Hd = wh_ref.shape[1]
        wh_f, wh_b = wh_ref[0], wh_ref[1]
        h_f = jnp.zeros((B, Hd), jnp.float32)
        c_f = jnp.zeros((B, Hd), jnp.float32)
        h_b = jnp.zeros((B, Hd), jnp.float32)
        c_b = jnp.zeros((B, Hd), jnp.float32)
        # TODO(synk): for large T switch to lax.fori_loop (small unroll) with
        #             pl.ds/pl.multiple_of indexing to bound program size.
        for s in range(T):
            tf, tb = s, T - 1 - s
            g_f = gx_f[tf * B:(tf + 1) * B, :] + jnp.dot(
                h_f.astype(jnp.bfloat16), wh_f, preferred_element_type=jnp.float32)
            g_b = gx_b[tb * B:(tb + 1) * B, :] + jnp.dot(
                h_b.astype(jnp.bfloat16), wh_b, preferred_element_type=jnp.float32)
            s_f = sigmoid(g_f[:, :3 * Hd])                 # i, f, o in one call
            s_b = sigmoid(g_b[:, :3 * Hd])
            c_f = s_f[:, Hd:2 * Hd] * c_f + s_f[:, :Hd] * jnp.tanh(g_f[:, 3 * Hd:])
            c_b = s_b[:, Hd:2 * Hd] * c_b + s_b[:, :Hd] * jnp.tanh(g_b[:, 3 * Hd:])
            h_f = s_f[:, 2 * Hd:] * jnp.tanh(c_f)
            h_b = s_b[:, 2 * Hd:] * jnp.tanh(c_b)
            outf_sc[tf * B:(tf + 1) * B, :] = h_f
            outb_sc[tb * B:(tb + 1) * B, :] = h_b

    x = z_ref[...]                                         # (T*B, 64) bf16

    # ---- first_lstm: bidirectional 64 -> 128 ---------------------------------
    gx_f = in_proj([(x, 0)], l1_wx_ref, l1_b_ref, 0)
    gx_b = in_proj([(x, 0)], l1_wx_ref, l1_b_ref, 1)
    birecur(gx_f, gx_b, l1_wh_ref, y1f_sc, y1b_sc)
    h1 = l1_wh_ref.shape[1]
    y1f = y1f_sc[...].astype(jnp.bfloat16)
    y1b = y1b_sc[...].astype(jnp.bfloat16)

    # ---- second_lstm: bidirectional 256 -> 64 --------------------------------
    gx_f = in_proj([(y1f, 0), (y1b, h1)], l2_wx_ref, l2_b_ref, 0)
    gx_b = in_proj([(y1f, 0), (y1b, h1)], l2_wx_ref, l2_b_ref, 1)
    birecur(gx_f, gx_b, l2_wh_ref, y2f_sc, y2b_sc)
    h2 = l2_wh_ref.shape[1]
    y2f = y2f_sc[...].astype(jnp.bfloat16)
    y2b = y2b_sc[...].astype(jnp.bfloat16)

    # ---- classification: Linear + LogSoftmax over 128 padded class lanes -----
    logits = (jnp.dot(y2f, cls_w_ref[0:h2, :], preferred_element_type=jnp.float32)
              + jnp.dot(y2b, cls_w_ref[h2:2 * h2, :],
                        preferred_element_type=jnp.float32)
              + cls_b_ref[...])
    m = jnp.max(logits, axis=-1, keepdims=True)
    lse = jnp.log(jnp.sum(jnp.exp(logits - m), axis=-1, keepdims=True)) + m
    o_ref[...] = logits - lse


# ------------------------------- wrappers ------------------------------------

def _full_spec(shape):
    nd = len(shape)
    return pl.BlockSpec(shape, lambda *_, nd=nd: (0,) * nd)


def conv_stage(xp, params, bn):
    N, Hp, Wc, C4 = xp.shape
    H, W4 = Hp - 2, Wc - 2
    H2 = H // 2
    C1 = params["conv1_b"].shape[1]
    F1 = params["fc1_b"].shape[1]
    w_args = [params["conv1_w"], params["conv1_b"],
              params["conv2_w"], params["conv2_b"],
              params["fc1_w"], params["fc1_b"]]
    return pl.pallas_call(
        conv_stage_kernel,
        grid=(N // bn,),
        in_specs=[pl.BlockSpec((bn, Hp, Wc, C4), lambda n: (n, 0, 0, 0))]
                 + [_full_spec(a.shape) for a in w_args],
        out_specs=pl.BlockSpec((bn, W4, F1), lambda n: (n, 0, 0)),
        out_shape=jax.ShapeDtypeStruct((N, W4, F1), jnp.bfloat16),
        scratch_shapes=[pltpu.VMEM((bn, H2 + 2, W4 + 2, 2 * C1), jnp.float32)],
        compiler_params=pltpu.CompilerParams(dimension_semantics=("parallel",)),
    )(xp, *w_args)


def rnn_head(z, params):
    # PyTorch quirk: batch_first=False => seq axis = image batch N, LSTM batch
    # axis = W/4.
    T, B, _ = z.shape
    ncp = params["cls_b"].shape[1]                # 128 padded class lanes
    h1 = params["lstm1"]["wh"].shape[1]
    h2 = params["lstm2"]["wh"].shape[1]
    inputs = [z.reshape(T * B, -1),
              params["lstm1"]["wx"], params["lstm1"]["wh"], params["lstm1"]["b"],
              params["lstm2"]["wx"], params["lstm2"]["wh"], params["lstm2"]["b"],
              params["cls_w"], params["cls_b"]]
    # TODO(synk): on v7x the two LSTM directions could additionally be split
    #             across the two TensorCores with core_map; kept single-core.
    return pl.pallas_call(
        functools.partial(rnn_head_kernel, T, B),
        grid=(1,),
        in_specs=[_full_spec(a.shape) for a in inputs],
        out_specs=_full_spec((T * B, ncp)),
        out_shape=jax.ShapeDtypeStruct((T * B, ncp), jnp.float32),
        scratch_shapes=[pltpu.VMEM((T * B, h1), jnp.float32),
                        pltpu.VMEM((T * B, h1), jnp.float32),
                        pltpu.VMEM((T * B, h2), jnp.float32),
                        pltpu.VMEM((T * B, h2), jnp.float32)],
        compiler_params=pltpu.CompilerParams(dimension_semantics=("arbitrary",)),
    )(*inputs)


def captcha_forward(x_nchw, params, num_classes, batch_block=None):
    N, C, H, W = x_nchw.shape
    assert H % 4 == 0 and W % 4 == 0, "kernel assumes H, W divisible by 4"
    Cp = params["conv1_w"].shape[0] // 9
    W4 = W // 4
    if batch_block is None:
        batch_block = 1
        for cand in (8, 4, 2):                   # keep >=2 grid blocks (megacore)
            if N % cand == 0 and N // cand >= 2:
                batch_block = cand
                break
    assert N % batch_block == 0
    x = jnp.transpose(x_nchw, (0, 2, 3, 1))                   # NCHW -> NHWC
    x = jnp.pad(x, ((0, 0), (0, 0), (0, 0), (0, Cp - C)))     # channel pad -> Cp
    x = x.reshape(N, H, W4, 4 * Cp)                           # width s2d(4), free
    x = jnp.pad(x, ((0, 0), (1, 1), (1, 1), (0, 0)))          # conv zero pad
    x = x.astype(jnp.bfloat16)                                # halve input DMA
    z = conv_stage(x, params, batch_block)                    # (N, W/4, 64) bf16
    out = rnn_head(z, params)                                 # (N*W/4, 128) f32
    return out[:, :num_classes].reshape(N, W4, num_classes)


# ------------------------------ parameters -----------------------------------

def init_params(key, in_channels=3, in_h=16, num_classes=20):
    bf = jnp.bfloat16
    H4 = in_h // 4
    Cp = ((in_channels + 7) // 8) * 8
    NCP = 128                                     # lane-padded classifier width

    def nrm(k, shape, scale=0.05):
        return scale * jax.random.normal(k, shape, dtype=jnp.float32)

    ks = iter(jax.random.split(key, 16))

    # conv1 weight rows ordered (kh, kw, ch); padded channels are zero.
    w1 = nrm(next(ks), (9, in_channels, 32))
    w1 = jnp.pad(w1, ((0, 0), (0, Cp - in_channels), (0, 0)))
    params = {
        "conv1_w": w1.reshape(9 * Cp, 32).astype(bf),
        "conv1_b": nrm(next(ks), (1, 32)),
        "conv2_w": nrm(next(ks), (9 * 32, 64)).astype(bf),   # rows (kh, kw, ch)
        "conv2_b": nrm(next(ks), (1, 64)),
        "fc1_w": nrm(next(ks), (64 * H4, 64)).astype(bf),    # rows (h4, ch)
        "fc1_b": nrm(next(ks), (1, 64)),
    }

    def lstm(F, Hd):
        # packed gate order along the 4H axis: [i | f | o | g]
        return {"wx": nrm(next(ks), (2, F, 4 * Hd)).astype(bf),
                "wh": nrm(next(ks), (2, Hd, 4 * Hd)).astype(bf),
                "b": nrm(next(ks), (2, 1, 4 * Hd))}

    params["lstm1"] = lstm(64, 128)
    params["lstm2"] = lstm(256, 64)

    cw = nrm(next(ks), (128, num_classes))
    params["cls_w"] = jnp.pad(cw, ((0, 0), (0, NCP - num_classes))).astype(bf)
    cb = nrm(next(ks), (1, num_classes))
    params["cls_b"] = jnp.pad(cb, ((0, 0), (0, NCP - num_classes)),
                              constant_values=-1e30)
    return params


# --------------------------------- main ---------------------------------------

if __name__ == "__main__":
    key = jax.random.PRNGKey(0)
    k_x, k_p = jax.random.split(key)

    N, C, H, W = 2, 3, 16, 32            # small shapes consistent with the module
    NUM_CLASSES = 20
    x = jax.random.normal(k_x, (N, C, H, W), dtype=jnp.float32)
    params = init_params(k_p, in_channels=C, in_h=H, num_classes=NUM_CLASSES)

    fwd = jax.jit(lambda xx, pp: captcha_forward(xx, pp, NUM_CLASSES))
    out = jax.block_until_ready(fwd(x, params))

    assert out.shape == (N, W // 4, NUM_CLASSES), out.shape
    # log-softmax sanity: exp(out) sums to 1 along the class axis
    assert jnp.allclose(jnp.exp(out).sum(-1), 1.0, atol=1e-3)
    print("KERNEL_OK")
</pallas_src>

<mosaic_0001>
module attributes {stable_mosaic.version = 11 : i64} {
  func.func @rnn_head_kernel(%arg0: i32, %arg1: memref<16x64xbf16, #tpu.memory_space<vmem>>, %arg2: memref<2x64x512xbf16, #tpu.memory_space<vmem>>, %arg3: memref<2x128x512xbf16, #tpu.memory_space<vmem>>, %arg4: memref<2x1x512xf32, #tpu.memory_space<vmem>>, %arg5: memref<2x256x256xbf16, #tpu.memory_space<vmem>>, %arg6: memref<2x64x256xbf16, #tpu.memory_space<vmem>>, %arg7: memref<2x1x256xf32, #tpu.memory_space<vmem>>, %arg8: memref<128x128xbf16, #tpu.memory_space<vmem>>, %arg9: memref<1x128xf32, #tpu.memory_space<vmem>>, %arg10: memref<16x128xf32, #tpu.memory_space<vmem>>, %arg11: memref<16x128xf32, #tpu.memory_space<vmem>>, %arg12: memref<16x128xf32, #tpu.memory_space<vmem>>, %arg13: memref<16x64xf32, #tpu.memory_space<vmem>>, %arg14: memref<16x64xf32, #tpu.memory_space<vmem>>) attributes {dimension_semantics = [#tpu.dimension_semantics<arbitrary>], iteration_bounds = array<i64: 1>, scalar_prefetch = 0 : i64, scratch_operands = 4 : i64, tpu.core_type = #tpu.core_type<tc>, window_params = [{pipeline_mode = #tpu.pipeline_mode<synchronous>, transform_indices = @transform_0, window_bounds = array<i64: 16, 64>}, {pipeline_mode = #tpu.pipeline_mode<synchronous>, transform_indices = @transform_1, window_bounds = array<i64: 2, 64, 512>}, {pipeline_mode = #tpu.pipeline_mode<synchronous>, transform_indices = @transform_2, window_bounds = array<i64: 2, 128, 512>}, {pipeline_mode = #tpu.pipeline_mode<synchronous>, transform_indices = @transform_3, window_bounds = array<i64: 2, 1, 512>}, {pipeline_mode = #tpu.pipeline_mode<synchronous>, transform_indices = @transform_4, window_bounds = array<i64: 2, 256, 256>}, {pipeline_mode = #tpu.pipeline_mode<synchronous>, transform_indices = @transform_5, window_bounds = array<i64: 2, 64, 256>}, {pipeline_mode = #tpu.pipeline_mode<synchronous>, transform_indices = @transform_6, window_bounds = array<i64: 2, 1, 256>}, {pipeline_mode = #tpu.pipeline_mode<synchronous>, transform_indices = @transform_7, window_bounds = array<i64: 128, 128>}, {pipeline_mode = #tpu.pipeline_mode<synchronous>, transform_indices = @transform_8, window_bounds = array<i64: 1, 128>}, {pipeline_mode = #tpu.pipeline_mode<synchronous>, transform_indices = @transform_9, window_bounds = array<i64: 16, 128>}]} {
    %c0 = arith.constant 0 : index
    %c0_0 = arith.constant 0 : index
    %0 = vector.load %arg1[%c0, %c0_0] : memref<16x64xbf16, #tpu.memory_space<vmem>>, vector<16x64xbf16>
    %c0_1 = arith.constant 0 : index
    %c0_2 = arith.constant 0 : index
    %c0_3 = arith.constant 0 : index
    %1 = vector.load %arg4[%c0_1, %c0_2, %c0_3] : memref<2x1x512xf32, #tpu.memory_space<vmem>>, vector<1x1x512xf32>
    %2 = vector.shape_cast %1 : vector<1x1x512xf32> to vector<1x512xf32>
    %c0_4 = arith.constant 0 : index
    %c0_5 = arith.constant 0 : index
    %c0_6 = arith.constant 0 : index
    %3 = vector.load %arg2[%c0_4, %c0_5, %c0_6] : memref<2x64x512xbf16, #tpu.memory_space<vmem>>, vector<1x64x512xbf16>
    %4 = vector.shape_cast %3 : vector<1x64x512xbf16> to vector<64x512xbf16>
    %cst = arith.constant dense<0.000000e+00> : vector<16x512xf32>
    %5 = tpu.matmul %0, %4, %cst {dimension_numbers = #tpu.dot_dimension_numbers<[1], [0], [0], [1], [0, 0, 1, 1], [], []>} : vector<16x64xbf16>, vector<64x512xbf16>, vector<16x512xf32> -> vector<16x512xf32>
    %6 = vector.broadcast %2 : vector<1x512xf32> to vector<16x512xf32>
    %7 = arith.addf %6, %5 : vector<16x512xf32>
    %c1 = arith.constant 1 : index
    %c0_7 = arith.constant 0 : index
    %c0_8 = arith.constant 0 : index
    %8 = vector.load %arg4[%c1, %c0_7, %c0_8] : memref<2x1x512xf32, #tpu.memory_space<vmem>>, vector<1x1x512xf32>
    %9 = vector.shape_cast %8 : vector<1x1x512xf32> to vector<1x512xf32>
    %c1_9 = arith.constant 1 : index
    %c0_10 = arith.constant 0 : index
    %c0_11 = arith.constant 0 : index
    %10 = vector.load %arg2[%c1_9, %c0_10, %c0_11] : memref<2x64x512xbf16, #tpu.memory_space<vmem>>, vector<1x64x512xbf16>
    %11 = vector.shape_cast %10 : vector<1x64x512xbf16> to vector<64x512xbf16>
    %cst_12 = arith.constant dense<0.000000e+00> : vector<16x512xf32>
    %12 = tpu.matmul %0, %11, %cst_12 {dimension_numbers = #tpu.dot_dimension_numbers<[1], [0], [0], [1], [0, 0, 1, 1], [], []>} : vector<16x64xbf16>, vector<64x512xbf16>, vector<16x512xf32> -> vector<16x512xf32>
    %13 = vector.broadcast %9 : vector<1x512xf32> to vector<16x512xf32>
    %14 = arith.addf %13, %12 : vector<16x512xf32>
    %c0_13 = arith.constant 0 : index
    %c0_14 = arith.constant 0 : index
    %c0_15 = arith.constant 0 : index
    %15 = vector.load %arg3[%c0_13, %c0_14, %c0_15] : memref<2x128x512xbf16, #tpu.memory_space<vmem>>, vector<1x128x512xbf16>
    %16 = vector.shape_cast %15 : vector<1x128x512xbf16> to vector<128x512xbf16>
    %c1_16 = arith.constant 1 : index
    %c0_17 = arith.constant 0 : index
    %c0_18 = arith.constant 0 : index
    %17 = vector.load %arg3[%c1_16, %c0_17, %c0_18] : memref<2x128x512xbf16, #tpu.memory_space<vmem>>, vector<1x128x512xbf16>
    %18 = vector.shape_cast %17 : vector<1x128x512xbf16> to vector<128x512xbf16>
    %cst_19 = arith.constant 0.000000e+00 : f32
    %19 = vector.broadcast %cst_19 : f32 to vector<8x128xf32>
    %cst_20 = arith.constant 0.000000e+00 : f32
    %20 = vector.broadcast %cst_20 : f32 to vector<8x128xf32>
    %cst_21 = arith.constant 0.000000e+00 : f32
    %21 = vector.broadcast %cst_21 : f32 to vector<8x128xf32>
    %cst_22 = arith.constant 0.000000e+00 : f32
    %22 = vector.broadcast %cst_22 : f32 to vector<8x128xf32>
    %23 = vector.extract_strided_slice %7 {offsets = [0, 0], sizes = [8, 512], strides = [1, 1]} : vector<16x512xf32> to vector<8x512xf32>
    %24 = arith.truncf %19 : vector<8x128xf32> to vector<8x128xbf16>
    %cst_23 = arith.constant dense<0.000000e+00> : vector<8x512xf32>
    %25 = tpu.matmul %24, %16, %cst_23 {dimension_numbers = #tpu.dot_dimension_numbers<[1], [0], [0], [1], [0, 0, 1, 1], [], []>} : vector<8x128xbf16>, vector<128x512xbf16>, vector<8x512xf32> -> vector<8x512xf32>
    %26 = arith.addf %23, %25 : vector<8x512xf32>
    %27 = vector.extract_strided_slice %14 {offsets = [8, 0], sizes = [8, 512], strides = [1, 1]} : vector<16x512xf32> to vector<8x512xf32>
    %28 = arith.truncf %21 : vector<8x128xf32> to vector<8x128xbf16>
    %cst_24 = arith.constant dense<0.000000e+00> : vector<8x512xf32>
    %29 = tpu.matmul %28, %18, %cst_24 {dimension_numbers = #tpu.dot_dimension_numbers<[1], [0], [0], [1], [0, 0, 1, 1], [], []>} : vector<8x128xbf16>, vector<128x512xbf16>, vector<8x512xf32> -> vector<8x512xf32>
    %30 = arith.addf %27, %29 : vector<8x512xf32>
    %31 = vector.extract_strided_slice %26 {offsets = [0, 0], sizes = [8, 384], strides = [1, 1]} : vector<8x512xf32> to vector<8x384xf32>
    %cst_25 = arith.constant 0.000000e+00 : f32
    %32 = vector.broadcast %cst_25 : f32 to vector<8x384xf32>
    %33 = arith.subf %32, %31 : vector<8x384xf32>
    %34 = math.exp %33 : vector<8x384xf32>
    %cst_26 = arith.constant 1.000000e+00 : f32
    %35 = vector.broadcast %cst_26 : f32 to vector<8x384xf32>
    %36 = arith.addf %35, %34 : vector<8x384xf32>
    %37 = tpu.reciprocal %36 : vector<8x384xf32> -> vector<8x384xf32>
    %38 = vector.extract_strided_slice %30 {offsets = [0, 0], sizes = [8, 384], strides = [1, 1]} : vector<8x512xf32> to vector<8x384xf32>
    %cst_27 = arith.constant 0.000000e+00 : f32
    %39 = vector.broadcast %cst_27 : f32 to vector<8x384xf32>
    %40 = arith.subf %39, %38 : vector<8x384xf32>
    %41 = math.exp %40 : vector<8x384xf32>
    %cst_28 = arith.constant 1.000000e+00 : f32
    %42 = vector.broadcast %cst_28 : f32 to vector<8x384xf32>
    %43 = arith.addf %42, %41 : vector<8x384xf32>
    %44 = tpu.reciprocal %43 : vector<8x384xf32> -> vector<8x384xf32>
    %45 = vector.extract_strided_slice %37 {offsets = [0, 128], sizes = [8, 128], strides = [1, 1]} : vector<8x384xf32> to vector<8x128xf32>
    %46 = arith.mulf %45, %20 : vector<8x128xf32>
    %47 = vector.extract_strided_slice %37 {offsets = [0, 0], sizes = [8, 128], strides = [1, 1]} : vector<8x384xf32> to vector<8x128xf32>
    %48 = vector.extract_strided_slice %26 {offsets = [0, 384], sizes = [8, 128], strides = [1, 1]} : vector<8x512xf32> to vector<8x128xf32>
    %49 = math.tanh %48 : vector<8x128xf32>
    %50 = arith.mulf %47, %49 : vector<8x128xf32>
    %51 = arith.addf %46, %50 : vector<8x128xf32>
    %52 = vector.extract_strided_slice %44 {offsets = [0, 128], sizes = [8, 128], strides = [1, 1]} : vector<8x384xf32> to vector<8x128xf32>
    %53 = arith.mulf %52, %22 : vector<8x128xf32>
    %54 = vector.extract_strided_slice %44 {offsets = [0, 0], sizes = [8, 128], strides = [1, 1]} : vector<8x384xf32> to vector<8x128xf32>
    %55 = vector.extract_strided_slice %30 {offsets = [0, 384], sizes = [8, 128], strides = [1, 1]} : vector<8x512xf32> to vector<8x128xf32>
    %56 = math.tanh %55 : vector<8x128xf32>
    %57 = arith.mulf %54, %56 : vector<8x128xf32>
    %58 = arith.addf %53, %57 : vector<8x128xf32>
    %59 = vector.extract_strided_slice %37 {offsets = [0, 256], sizes = [8, 128], strides = [1, 1]} : vector<8x384xf32> to vector<8x128xf32>
    %60 = math.tanh %51 : vector<8x128xf32>
    %61 = arith.mulf %59, %60 : vector<8x128xf32>
    %62 = vector.extract_strided_slice %44 {offsets = [0, 256], sizes = [8, 128], strides = [1, 1]} : vector<8x384xf32> to vector<8x128xf32>
    %63 = math.tanh %58 : vector<8x128xf32>
    %64 = arith.mulf %62, %63 : vector<8x128xf32>
    %c0_29 = arith.constant 0 : index
    %c0_30 = arith.constant 0 : index
    %65 = vector.load %arg11[%c0_29, %c0_30] : memref<16x128xf32, #tpu.memory_space<vmem>>, vector<8x128xf32>
    tpu.vector_store %arg11[%c0_29, %c0_30], %61 {strides = array<i32>} : memref<16x128xf32, #tpu.memory_space<vmem>>, vector<8x128xf32>,
    %c8 = arith.constant 8 : index
    %c0_31 = arith.constant 0 : index
    %66 = vector.load %arg12[%c8, %c0_31] : memref<16x128xf32, #tpu.memory_space<vmem>>, vector<8x128xf32>
    tpu.vector_store %arg12[%c8, %c0_31], %64 {strides = array<i32>} : memref<16x128xf32, #tpu.memory_space<vmem>>, vector<8x128xf32>,
    %67 = vector.extract_strided_slice %7 {offsets = [8, 0], sizes = [8, 512], strides = [1, 1]} : vector<16x512xf32> to vector<8x512xf32>
    %68 = arith.truncf %61 : vector<8x128xf32> to vector<8x128xbf16>
    %cst_32 = arith.constant dense<0.000000e+00> : vector<8x512xf32>
    %69 = tpu.matmul %68, %16, %cst_32 {dimension_numbers = #tpu.dot_dimension_numbers<[1], [0], [0], [1], [0, 0, 1, 1], [], []>} : vector<8x128xbf16>, vector<128x512xbf16>, vector<8x512xf32> -> vector<8x512xf32>
    %70 = arith.addf %67, %69 : vector<8x512xf32>
    %71 = vector.extract_strided_slice %14 {offsets = [0, 0], sizes = [8, 512], strides = [1, 1]} : vector<16x512xf32> to vector<8x512xf32>
    %72 = arith.truncf %64 : vector<8x128xf32> to vector<8x128xbf16>
    %cst_33 = arith.constant dense<0.000000e+00> : vector<8x512xf32>
    %73 = tpu.matmul %72, %18, %cst_33 {dimension_numbers = #tpu.dot_dimension_numbers<[1], [0], [0], [1], [0, 0, 1, 1], [], []>} : vector<8x128xbf16>, vector<128x512xbf16>, vector<8x512xf32> -> vector<8x512xf32>
    %74 = arith.addf %71, %73 : vector<8x512xf32>
    %75 = vector.extract_strided_slice %70 {offsets = [0, 0], sizes = [8, 384], strides = [1, 1]} : vector<8x512xf32> to vector<8x384xf32>
    %cst_34 = arith.constant 0.000000e+00 : f32
    %76 = vector.broadcast %cst_34 : f32 to vector<8x384xf32>
    %77 = arith.subf %76, %75 : vector<8x384xf32>
    %78 = math.exp %77 : vector<8x384xf32>
    %cst_35 = arith.constant 1.000000e+00 : f32
    %79 = vector.broadcast %cst_35 : f32 to vector<8x384xf32>
    %80 = arith.addf %79, %78 : vector<8x384xf32>
    %81 = tpu.reciprocal %80 : vector<8x384xf32> -> vector<8x384xf32>
    %82 = vector.extract_strided_slice %74 {offsets = [0, 0], sizes = [8, 384], strides = [1, 1]} : vector<8x512xf32> to vector<8x384xf32>
    %cst_36 = arith.constant 0.000000e+00 : f32
    %83 = vector.broadcast %cst_36 : f32 to vector<8x384xf32>
    %84 = arith.subf %83, %82 : vector<8x384xf32>
    %85 = math.exp %84 : vector<8x384xf32>
    %cst_37 = arith.constant 1.000000e+00 : f32
    %86 = vector.broadcast %cst_37 : f32 to vector<8x384xf32>
    %87 = arith.addf %86, %85 : vector<8x384xf32>
    %88 = tpu.reciprocal %87 : vector<8x384xf32> -> vector<8x384xf32>
    %89 = vector.extract_strided_slice %81 {offsets = [0, 128], sizes = [8, 128], strides = [1, 1]} : vector<8x384xf32> to vector<8x128xf32>
    %90 = arith.mulf %89, %51 : vector<8x128xf32>
    %91 = vector.extract_strided_slice %81 {offsets = [0, 0], sizes = [8, 128], strides = [1, 1]} : vector<8x384xf32> to vector<8x128xf32>
    %92 = vector.extract_strided_slice %70 {offsets = [0, 384], sizes = [8, 128], strides = [1, 1]} : vector<8x512xf32> to vector<8x128xf32>
    %93 = math.tanh %92 : vector<8x128xf32>
    %94 = arith.mulf %91, %93 : vector<8x128xf32>
    %95 = arith.addf %90, %94 : vector<8x128xf32>
    %96 = vector.extract_strided_slice %88 {offsets = [0, 128], sizes = [8, 128], strides = [1, 1]} : vector<8x384xf32> to vector<8x128xf32>
    %97 = arith.mulf %96, %58 : vector<8x128xf32>
    %98 = vector.extract_strided_slice %88 {offsets = [0, 0], sizes = [8, 128], strides = [1, 1]} : vector<8x384xf32> to vector<8x128xf32>
    %99 = vector.extract_strided_slice %74 {offsets = [0, 384], sizes = [8, 128], strides = [1, 1]} : vector<8x512xf32> to vector<8x128xf32>
    %100 = math.tanh %99 : vector<8x128xf32>
    %101 = arith.mulf %98, %100 : vector<8x128xf32>
    %102 = arith.addf %97, %101 : vector<8x128xf32>
    %103 = vector.extract_strided_slice %81 {offsets = [0, 256], sizes = [8, 128], strides = [1, 1]} : vector<8x384xf32> to vector<8x128xf32>
    %104 = math.tanh %95 : vector<8x128xf32>
    %105 = arith.mulf %103, %104 : vector<8x128xf32>
    %106 = vector.extract_strided_slice %88 {offsets = [0, 256], sizes = [8, 128], strides = [1, 1]} : vector<8x384xf32> to vector<8x128xf32>
    %107 = math.tanh %102 : vector<8x128xf32>
    %108 = arith.mulf %106, %107 : vector<8x128xf32>
    %c8_38 = arith.constant 8 : index
    %c0_39 = arith.constant 0 : index
    %109 = vector.load %arg11[%c8_38, %c0_39] : memref<16x128xf32, #tpu.memory_space<vmem>>, vector<8x128xf32>
    tpu.vector_store %arg11[%c8_38, %c0_39], %105 {strides = array<i32>} : memref<16x128xf32, #tpu.memory_space<vmem>>, vector<8x128xf32>,
    %c0_40 = arith.constant 0 : index
    %c0_41 = arith.constant 0 : index
    %110 = vector.load %arg12[%c0_40, %c0_41] : memref<16x128xf32, #tpu.memory_space<vmem>>, vector<8x128xf32>
    tpu.vector_store %arg12[%c0_40, %c0_41], %108 {strides = array<i32>} : memref<16x128xf32, #tpu.memory_space<vmem>>, vector<8x128xf32>,
    %c0_42 = arith.constant 0 : index
    %c0_43 = arith.constant 0 : index
    %111 = vector.load %arg11[%c0_42, %c0_43] : memref<16x128xf32, #tpu.memory_space<vmem>>, vector<16x128xf32>
    %112 = arith.truncf %111 : vector<16x128xf32> to vector<16x128xbf16>
    %c0_44 = arith.constant 0 : index
    %c0_45 = arith.constant 0 : index
    %113 = vector.load %arg12[%c0_44, %c0_45] : memref<16x128xf32, #tpu.memory_space<vmem>>, vector<16x128xf32>
    %114 = arith.truncf %113 : vector<16x128xf32> to vector<16x128xbf16>
    %c0_46 = arith.constant 0 : index
    %c0_47 = arith.constant 0 : index
    %c0_48 = arith.constant 0 : index
    %115 = vector.load %arg7[%c0_46, %c0_47, %c0_48] : memref<2x1x256xf32, #tpu.memory_space<vmem>>, vector<1x1x256xf32>
    %116 = vector.shape_cast %115 : vector<1x1x256xf32> to vector<1x256xf32>
    %c0_49 = arith.constant 0 : index
    %c0_50 = arith.constant 0 : index
    %c0_51 = arith.constant 0 : index
    %117 = vector.load %arg5[%c0_49, %c0_50, %c0_51] : memref<2x256x256xbf16, #tpu.memory_space<vmem>>, vector<1x128x256xbf16>
    %118 = vector.shape_cast %117 : vector<1x128x256xbf16> to vector<128x256xbf16>
    %cst_52 = arith.constant dense<0.000000e+00> : vector<16x256xf32>
    %119 = tpu.matmul %112, %118, %cst_52 {dimension_numbers = #tpu.dot_dimension_numbers<[1], [0], [0], [1], [0, 0, 1, 1], [], []>} : vector<16x128xbf16>, vector<128x256xbf16>, vector<16x256xf32> -> vector<16x256xf32>
    %120 = vector.broadcast %116 : vector<1x256xf32> to vector<16x256xf32>
    %121 = arith.addf %120, %119 : vector<16x256xf32>
    %c0_53 = arith.constant 0 : index
    %c128 = arith.constant 128 : index
    %c0_54 = arith.constant 0 : index
    %122 = vector.load %arg5[%c0_53, %c128, %c0_54] : memref<2x256x256xbf16, #tpu.memory_space<vmem>>, vector<1x128x256xbf16>
    %123 = vector.shape_cast %122 : vector<1x128x256xbf16> to vector<128x256xbf16>
    %cst_55 = arith.constant dense<0.000000e+00> : vector<16x256xf32>
    %124 = tpu.matmul %114, %123, %cst_55 {dimension_numbers = #tpu.dot_dimension_numbers<[1], [0], [0], [1], [0, 0, 1, 1], [], []>} : vector<16x128xbf16>, vector<128x256xbf16>, vector<16x256xf32> -> vector<16x256xf32>
    %125 = arith.addf %121, %124 : vector<16x256xf32>
    %c1_56 = arith.constant 1 : index
    %c0_57 = arith.constant 0 : index
    %c0_58 = arith.constant 0 : index
    %126 = vector.load %arg7[%c1_56, %c0_57, %c0_58] : memref<2x1x256xf32, #tpu.memory_space<vmem>>, vector<1x1x256xf32>
    %127 = vector.shape_cast %126 : vector<1x1x256xf32> to vector<1x256xf32>
    %c1_59 = arith.constant 1 : index
    %c0_60 = arith.constant 0 : index
    %c0_61 = arith.constant 0 : index
    %128 = vector.load %arg5[%c1_59, %c0_60, %c0_61] : memref<2x256x256xbf16, #tpu.memory_space<vmem>>, vector<1x128x256xbf16>
    %129 = vector.shape_cast %128 : vector<1x128x256xbf16> to vector<128x256xbf16>
    %cst_62 = arith.constant dense<0.000000e+00> : vector<16x256xf32>
    %130 = tpu.matmul %112, %129, %cst_62 {dimension_numbers = #tpu.dot_dimension_numbers<[1], [0], [0], [1], [0, 0, 1, 1], [], []>} : vector<16x128xbf16>, vector<128x256xbf16>, vector<16x256xf32> -> vector<16x256xf32>
    %131 = vector.broadcast %127 : vector<1x256xf32> to vector<16x256xf32>
    %132 = arith.addf %131, %130 : vector<16x256xf32>
    %c1_63 = arith.constant 1 : index
    %c128_64 = arith.constant 128 : index
    %c0_65 = arith.constant 0 : index
    %133 = vector.load %arg5[%c1_63, %c128_64, %c0_65] : memref<2x256x256xbf16, #tpu.memory_space<vmem>>, vector<1x128x256xbf16>
    %134 = vector.shape_cast %133 : vector<1x128x256xbf16> to vector<128x256xbf16>
    %cst_66 = arith.constant dense<0.000000e+00> : vector<16x256xf32>
    %135 = tpu.matmul %114, %134, %cst_66 {dimension_numbers = #tpu.dot_dimension_numbers<[1], [0], [0], [1], [0, 0, 1, 1], [], []>} : vector<16x128xbf16>, vector<128x256xbf16>, vector<16x256xf32> -> vector<16x256xf32>
    %136 = arith.addf %132, %135 : vector<16x256xf32>
    %c0_67 = arith.constant 0 : index
    %c0_68 = arith.constant 0 : index
    %c0_69 = arith.constant 0 : index
    %137 = vector.load %arg6[%c0_67, %c0_68, %c0_69] : memref<2x64x256xbf16, #tpu.memory_space<vmem>>, vector<1x64x256xbf16>
    %138 = vector.shape_cast %137 : vector<1x64x256xbf16> to vector<64x256xbf16>
    %c1_70 = arith.constant 1 : index
    %c0_71 = arith.constant 0 : index
    %c0_72 = arith.constant 0 : index
    %139 = vector.load %arg6[%c1_70, %c0_71, %c0_72] : memref<2x64x256xbf16, #tpu.memory_space<vmem>>, vector<1x64x256xbf16>
    %140 = vector.shape_cast %139 : vector<1x64x256xbf16> to vector<64x256xbf16>
    %cst_73 = arith.constant 0.000000e+00 : f32
    %141 = vector.broadcast %cst_73 : f32 to vector<8x64xf32>
    %cst_74 = arith.constant 0.000000e+00 : f32
    %142 = vector.broadcast %cst_74 : f32 to vector<8x64xf32>
    %cst_75 = arith.constant 0.000000e+00 : f32
    %143 = vector.broadcast %cst_75 : f32 to vector<8x64xf32>
    %cst_76 = arith.constant 0.000000e+00 : f32
    %144 = vector.broadcast %cst_76 : f32 to vector<8x64xf32>
    %145 = vector.extract_strided_slice %125 {offsets = [0, 0], sizes = [8, 256], strides = [1, 1]} : vector<16x256xf32> to vector<8x256xf32>
    %146 = arith.truncf %141 : vector<8x64xf32> to vector<8x64xbf16>
    %cst_77 = arith.constant dense<0.000000e+00> : vector<8x256xf32>
    %147 = tpu.matmul %146, %138, %cst_77 {dimension_numbers = #tpu.dot_dimension_numbers<[1], [0], [0], [1], [0, 0, 1, 1], [], []>} : vector<8x64xbf16>, vector<64x256xbf16>, vector<8x256xf32> -> vector<8x256xf32>
    %148 = arith.addf %145, %147 : vector<8x256xf32>
    %149 = vector.extract_strided_slice %136 {offsets = [8, 0], sizes = [8, 256], strides = [1, 1]} : vector<16x256xf32> to vector<8x256xf32>
    %150 = arith.truncf %143 : vector<8x64xf32> to vector<8x64xbf16>
    %cst_78 = arith.constant dense<0.000000e+00> : vector<8x256xf32>
    %151 = tpu.matmul %150, %140, %cst_78 {dimension_numbers = #tpu.dot_dimension_numbers<[1], [0], [0], [1], [0, 0, 1, 1], [], []>} : vector<8x64xbf16>, vector<64x256xbf16>, vector<8x256xf32> -> vector<8x256xf32>
    %152 = arith.addf %149, %151 : vector<8x256xf32>
    %153 = vector.extract_strided_slice %148 {offsets = [0, 0], sizes = [8, 192], strides = [1, 1]} : vector<8x256xf32> to vector<8x192xf32>
    %cst_79 = arith.constant 0.000000e+00 : f32
    %154 = vector.broadcast %cst_79 : f32 to vector<8x192xf32>
    %155 = arith.subf %154, %153 : vector<8x192xf32>
    %156 = math.exp %155 : vector<8x192xf32>
    %cst_80 = arith.constant 1.000000e+00 : f32
    %157 = vector.broadcast %cst_80 : f32 to vector<8x192xf32>
    %158 = arith.addf %157, %156 : vector<8x192xf32>
    %159 = tpu.reciprocal %158 : vector<8x192xf32> -> vector<8x192xf32>
    %160 = vector.extract_strided_slice %152 {offsets = [0, 0], sizes = [8, 192], strides = [1, 1]} : vector<8x256xf32> to vector<8x192xf32>
    %cst_81 = arith.constant 0.000000e+00 : f32
    %161 = vector.broadcast %cst_81 : f32 to vector<8x192xf32>
    %162 = arith.subf %161, %160 : vector<8x192xf32>
    %163 = math.exp %162 : vector<8x192xf32>
    %cst_82 = arith.constant 1.000000e+00 : f32
    %164 = vector.broadcast %cst_82 : f32 to vector<8x192xf32>
    %165 = arith.addf %164, %163 : vector<8x192xf32>
    %166 = tpu.reciprocal %165 : vector<8x192xf32> -> vector<8x192xf32>
    %167 = vector.extract_strided_slice %159 {offsets = [0, 64], sizes = [8, 64], strides = [1, 1]} : vector<8x192xf32> to vector<8x64xf32>
    %168 = arith.mulf %167, %142 : vector<8x64xf32>
    %169 = vector.extract_strided_slice %159 {offsets = [0, 0], sizes = [8, 64], strides = [1, 1]} : vector<8x192xf32> to vector<8x64xf32>
    %170 = vector.extract_strided_slice %148 {offsets = [0, 192], sizes = [8, 64], strides = [1, 1]} : vector<8x256xf32> to vector<8x64xf32>
    %171 = math.tanh %170 : vector<8x64xf32>
    %172 = arith.mulf %169, %171 : vector<8x64xf32>
    %173 = arith.addf %168, %172 : vector<8x64xf32>
    %174 = vector.extract_strided_slice %166 {offsets = [0, 64], sizes = [8, 64], strides = [1, 1]} : vector<8x192xf32> to vector<8x64xf32>
    %175 = arith.mulf %174, %144 : vector<8x64xf32>
    %176 = vector.extract_strided_slice %166 {offsets = [0, 0], sizes = [8, 64], strides = [1, 1]} : vector<8x192xf32> to vector<8x64xf32>
    %177 = vector.extract_strided_slice %152 {offsets = [0, 192], sizes = [8, 64], strides = [1, 1]} : vector<8x256xf32> to vector<8x64xf32>
    %178 = math.tanh %177 : vector<8x64xf32>
    %179 = arith.mulf %176, %178 : vector<8x64xf32>
    %180 = arith.addf %175, %179 : vector<8x64xf32>
    %181 = vector.extract_strided_slice %159 {offsets = [0, 128], sizes = [8, 64], strides = [1, 1]} : vector<8x192xf32> to vector<8x64xf32>
    %182 = math.tanh %173 : vector<8x64xf32>
    %183 = arith.mulf %181, %182 : vector<8x64xf32>
    %184 = vector.extract_strided_slice %166 {offsets = [0, 128], sizes = [8, 64], strides = [1, 1]} : vector<8x192xf32> to vector<8x64xf32>
    %185 = math.tanh %180 : vector<8x64xf32>
    %186 = arith.mulf %184, %185 : vector<8x64xf32>
    %c0_83 = arith.constant 0 : index
    %c0_84 = arith.constant 0 : index
    %187 = vector.load %arg13[%c0_83, %c0_84] : memref<16x64xf32, #tpu.memory_space<vmem>>, vector<8x64xf32>
    tpu.vector_store %arg13[%c0_83, %c0_84], %183 {strides = array<i32>} : memref<16x64xf32, #tpu.memory_space<vmem>>, vector<8x64xf32>,
    %c8_85 = arith.constant 8 : index
    %c0_86 = arith.constant 0 : index
    %188 = vector.load %arg14[%c8_85, %c0_86] : memref<16x64xf32, #tpu.memory_space<vmem>>, vector<8x64xf32>
    tpu.vector_store %arg14[%c8_85, %c0_86], %186 {strides = array<i32>} : memref<16x64xf32, #tpu.memory_space<vmem>>, vector<8x64xf32>,
    %189 = vector.extract_strided_slice %125 {offsets = [8, 0], sizes = [8, 256], strides = [1, 1]} : vector<16x256xf32> to vector<8x256xf32>
    %190 = arith.truncf %183 : vector<8x64xf32> to vector<8x64xbf16>
    %cst_87 = arith.constant dense<0.000000e+00> : vector<8x256xf32>
    %191 = tpu.matmul %190, %138, %cst_87 {dimension_numbers = #tpu.dot_dimension_numbers<[1], [0], [0], [1], [0, 0, 1, 1], [], []>} : vector<8x64xbf16>, vector<64x256xbf16>, vector<8x256xf32> -> vector<8x256xf32>
    %192 = arith.addf %189, %191 : vector<8x256xf32>
    %193 = vector.extract_strided_slice %136 {offsets = [0, 0], sizes = [8, 256], strides = [1, 1]} : vector<16x256xf32> to vector<8x256xf32>
    %194 = arith.truncf %186 : vector<8x64xf32> to vector<8x64xbf16>
    %cst_88 = arith.constant dense<0.000000e+00> : vector<8x256xf32>
    %195 = tpu.matmul %194, %140, %cst_88 {dimension_numbers = #tpu.dot_dimension_numbers<[1], [0], [0], [1], [0, 0, 1, 1], [], []>} : vector<8x64xbf16>, vector<64x256xbf16>, vector<8x256xf32> -> vector<8x256xf32>
    %196 = arith.addf %193, %195 : vector<8x256xf32>
    %197 = vector.extract_strided_slice %192 {offsets = [0, 0], sizes = [8, 192], strides = [1, 1]} : vector<8x256xf32> to vector<8x192xf32>
    %cst_89 = arith.constant 0.000000e+00 : f32
    %198 = vector.broadcast %cst_89 : f32 to vector<8x192xf32>
    %199 = arith.subf %198, %197 : vector<8x192xf32>
    %200 = math.exp %199 : vector<8x192xf32>
    %cst_90 = arith.constant 1.000000e+00 : f32
    %201 = vector.broadcast %cst_90 : f32 to vector<8x192xf32>
    %202 = arith.addf %201, %200 : vector<8x192xf32>
    %203 = tpu.reciprocal %202 : vector<8x192xf32> -> vector<8x192xf32>
    %204 = vector.extract_strided_slice %196 {offsets = [0, 0], sizes = [8, 192], strides = [1, 1]} : vector<8x256xf32> to vector<8x192xf32>
    %cst_91 = arith.constant 0.000000e+00 : f32
    %205 = vector.broadcast %cst_91 : f32 to vector<8x192xf32>
    %206 = arith.subf %205, %204 : vector<8x192xf32>
    %207 = math.exp %206 : vector<8x192xf32>
    %cst_92 = arith.constant 1.000000e+00 : f32
    %208 = vector.broadcast %cst_92 : f32 to vector<8x192xf32>
    %209 = arith.addf %208, %207 : vector<8x192xf32>
    %210 = tpu.reciprocal %209 : vector<8x192xf32> -> vector<8x192xf32>
    %211 = vector.extract_strided_slice %203 {offsets = [0, 64], sizes = [8, 64], strides = [1, 1]} : vector<8x192xf32> to vector<8x64xf32>
    %212 = arith.mulf %211, %173 : vector<8x64xf32>
    %213 = vector.extract_strided_slice %203 {offsets = [0, 0], sizes = [8, 64], strides = [1, 1]} : vector<8x192xf32> to vector<8x64xf32>
    %214 = vector.extract_strided_slice %192 {offsets = [0, 192], sizes = [8, 64], strides = [1, 1]} : vector<8x256xf32> to vector<8x64xf32>
    %215 = math.tanh %214 : vector<8x64xf32>
    %216 = arith.mulf %213, %215 : vector<8x64xf32>
    %217 = arith.addf %212, %216 : vector<8x64xf32>
    %218 = vector.extract_strided_slice %210 {offsets = [0, 64], sizes = [8, 64], strides = [1, 1]} : vector<8x192xf32> to vector<8x64xf32>
    %219 = arith.mulf %218, %180 : vector<8x64xf32>
    %220 = vector.extract_strided_slice %210 {offsets = [0, 0], sizes = [8, 64], strides = [1, 1]} : vector<8x192xf32> to vector<8x64xf32>
    %221 = vector.extract_strided_slice %196 {offsets = [0, 192], sizes = [8, 64], strides = [1, 1]} : vector<8x256xf32> to vector<8x64xf32>
    %222 = math.tanh %221 : vector<8x64xf32>
    %223 = arith.mulf %220, %222 : vector<8x64xf32>
    %224 = arith.addf %219, %223 : vector<8x64xf32>
    %225 = vector.extract_strided_slice %203 {offsets = [0, 128], sizes = [8, 64], strides = [1, 1]} : vector<8x192xf32> to vector<8x64xf32>
    %226 = math.tanh %217 : vector<8x64xf32>
    %227 = arith.mulf %225, %226 : vector<8x64xf32>
    %228 = vector.extract_strided_slice %210 {offsets = [0, 128], sizes = [8, 64], strides = [1, 1]} : vector<8x192xf32> to vector<8x64xf32>
    %229 = math.tanh %224 : vector<8x64xf32>
    %230 = arith.mulf %228, %229 : vector<8x64xf32>
    %c8_93 = arith.constant 8 : index
    %c0_94 = arith.constant 0 : index
    %231 = vector.load %arg13[%c8_93, %c0_94] : memref<16x64xf32, #tpu.memory_space<vmem>>, vector<8x64xf32>
    tpu.vector_store %arg13[%c8_93, %c0_94], %227 {strides = array<i32>} : memref<16x64xf32, #tpu.memory_space<vmem>>, vector<8x64xf32>,
    %c0_95 = arith.constant 0 : index
    %c0_96 = arith.constant 0 : index
    %232 = vector.load %arg14[%c0_95, %c0_96] : memref<16x64xf32, #tpu.memory_space<vmem>>, vector<8x64xf32>
    tpu.vector_store %arg14[%c0_95, %c0_96], %230 {strides = array<i32>} : memref<16x64xf32, #tpu.memory_space<vmem>>, vector<8x64xf32>,
    %c0_97 = arith.constant 0 : index
    %c0_98 = arith.constant 0 : index
    %233 = vector.load %arg13[%c0_97, %c0_98] : memref<16x64xf32, #tpu.memory_space<vmem>>, vector<16x64xf32>
    %234 = arith.truncf %233 : vector<16x64xf32> to vector<16x64xbf16>
    %c0_99 = arith.constant 0 : index
    %c0_100 = arith.constant 0 : index
    %235 = vector.load %arg14[%c0_99, %c0_100] : memref<16x64xf32, #tpu.memory_space<vmem>>, vector<16x64xf32>
    %236 = arith.truncf %235 : vector<16x64xf32> to vector<16x64xbf16>
    %c0_101 = arith.constant 0 : index
    %c0_102 = arith.constant 0 : index
    %237 = vector.load %arg8[%c0_101, %c0_102] : memref<128x128xbf16, #tpu.memory_space<vmem>>, vector<64x128xbf16>
    %cst_103 = arith.constant dense<0.000000e+00> : vector<16x128xf32>
    %238 = tpu.matmul %234, %237, %cst_103 {dimension_numbers = #tpu.dot_dimension_numbers<[1], [0], [0], [1], [0, 0, 1, 1], [], []>} : vector<16x64xbf16>, vector<64x128xbf16>, vector<16x128xf32> -> vector<16x128xf32>
    %c64 = arith.constant 64 : index
    %c0_104 = arith.constant 0 : index
    %239 = vector.load %arg8[%c64, %c0_104] : memref<128x128xbf16, #tpu.memory_space<vmem>>, vector<64x128xbf16>
    %cst_105 = arith.constant dense<0.000000e+00> : vector<16x128xf32>
    %240 = tpu.matmul %236, %239, %cst_105 {dimension_numbers = #tpu.dot_dimension_numbers<[1], [0], [0], [1], [0, 0, 1, 1], [], []>} : vector<16x64xbf16>, vector<64x128xbf16>, vector<16x128xf32> -> vector<16x128xf32>
    %241 = arith.addf %238, %240 : vector<16x128xf32>
    %c0_106 = arith.constant 0 : index
    %c0_107 = arith.constant 0 : index
    %242 = vector.load %arg9[%c0_106, %c0_107] : memref<1x128xf32, #tpu.memory_space<vmem>>, vector<1x128xf32>
    %243 = vector.broadcast %242 : vector<1x128xf32> to vector<16x128xf32>
    %244 = arith.addf %241, %243 : vector<16x128xf32>
    %cst_108 = arith.constant dense<0xFF800000> : vector<16xf32>
    %245 = vector.multi_reduction <maximumf>, %244, %cst_108 [1] : vector<16x128xf32> to vector<16xf32>
    %246 = vector.shape_cast %245 : vector<16xf32> to vector<16x1xf32>
    %247 = vector.broadcast %246 : vector<16x1xf32> to vector<16x128xf32>
    %248 = arith.subf %244, %247 : vector<16x128xf32>
    %249 = math.exp %248 : vector<16x128xf32>
    %cst_109 = arith.constant dense<0.000000e+00> : vector<16xf32>
    %250 = vector.multi_reduction <add>, %249, %cst_109 [1] : vector<16x128xf32> to vector<16xf32>
    %251 = vector.shape_cast %250 : vector<16xf32> to vector<16x1xf32>
    %252 = math.log %251 : vector<16x1xf32>
    %253 = arith.addf %252, %246 : vector<16x1xf32>
    %254 = vector.broadcast %253 : vector<16x1xf32> to vector<16x128xf32>
    %255 = arith.subf %244, %254 : vector<16x128xf32>
    %c0_110 = arith.constant 0 : index
    %c0_111 = arith.constant 0 : index
    %256 = vector.load %arg10[%c0_110, %c0_111] : memref<16x128xf32, #tpu.memory_space<vmem>>, vector<16x128xf32>
    tpu.vector_store %arg10[%c0_110, %c0_111], %255 {strides = array<i32>} : memref<16x128xf32, #tpu.memory_space<vmem>>, vector<16x128xf32>,
    return
  }
  func.func @transform_0(%arg0: i32) -> (i32, i32) {
    %c0_i32 = arith.constant 0 : i32
    %c0_i32_0 = arith.constant 0 : i32
    %c0_i32_1 = arith.constant 0 : i32
    return %c0_i32, %c0_i32_0 : i32, i32
  }
  func.func @transform_1(%arg0: i32) -> (i32, i32, i32) {
    %c0_i32 = arith.constant 0 : i32
    %c0_i32_0 = arith.constant 0 : i32
    %c0_i32_1 = arith.constant 0 : i32
    %c0_i32_2 = arith.constant 0 : i32
    return %c0_i32, %c0_i32_0, %c0_i32_1 : i32, i32, i32
  }
  func.func @transform_2(%arg0: i32) -> (i32, i32, i32) {
    %c0_i32 = arith.constant 0 : i32
    %c0_i32_0 = arith.constant 0 : i32
    %c0_i32_1 = arith.constant 0 : i32
    %c0_i32_2 = arith.constant 0 : i32
    return %c0_i32, %c0_i32_0, %c0_i32_1 : i32, i32, i32
  }
  func.func @transform_3(%arg0: i32) -> (i32, i32, i32) {
    %c0_i32 = arith.constant 0 : i32
    %c0_i32_0 = arith.constant 0 : i32
    %c0_i32_1 = arith.constant 0 : i32
    %c0_i32_2 = arith.constant 0 : i32
    return %c0_i32, %c0_i32_0, %c0_i32_1 : i32, i32, i32
  }
  func.func @transform_4(%arg0: i32) -> (i32, i32, i32) {
    %c0_i32 = arith.constant 0 : i32
    %c0_i32_0 = arith.constant 0 : i32
    %c0_i32_1 = arith.constant 0 : i32
    %c0_i32_2 = arith.constant 0 : i32
    return %c0_i32, %c0_i32_0, %c0_i32_1 : i32, i32, i32
  }
  func.func @transform_5(%arg0: i32) -> (i32, i32, i32) {
    %c0_i32 = arith.constant 0 : i32
    %c0_i32_0 = arith.constant 0 : i32
    %c0_i32_1 = arith.constant 0 : i32
    %c0_i32_2 = arith.constant 0 : i32
    return %c0_i32, %c0_i32_0, %c0_i32_1 : i32, i32, i32
  }
  func.func @transform_6(%arg0: i32) -> (i32, i32, i32) {
    %c0_i32 = arith.constant 0 : i32
    %c0_i32_0 = arith.constant 0 : i32
    %c0_i32_1 = arith.constant 0 : i32
    %c0_i32_2 = arith.constant 0 : i32
    return %c0_i32, %c0_i32_0, %c0_i32_1 : i32, i32, i32
  }
  func.func @transform_7(%arg0: i32) -> (i32, i32) {
    %c0_i32 = arith.constant 0 : i32
    %c0_i32_0 = arith.constant 0 : i32
    %c0_i32_1 = arith.constant 0 : i32
    return %c0_i32, %c0_i32_0 : i32, i32
  }
  func.func @transform_8(%arg0: i32) -> (i32, i32) {
    %c0_i32 = arith.constant 0 : i32
    %c0_i32_0 = arith.constant 0 : i32
    %c0_i32_1 = arith.constant 0 : i32
    return %c0_i32, %c0_i32_0 : i32, i32
  }
  func.func @transform_9(%arg0: i32) -> (i32, i32) {
    %c0_i32 = arith.constant 0 : i32
    %c0_i32_0 = arith.constant 0 : i32
    %c0_i32_1 = arith.constant 0 : i32
    return %c0_i32, %c0_i32_0 : i32, i32
  }
}

module attributes {stable_mosaic.version = 11 : i64} {
  func.func @conv_stage_kernel(%arg0: i32, %arg1: memref<1x18x10x32xbf16, #tpu.memory_space<vmem>>, %arg2: memref<72x32xbf16, #tpu.memory_space<vmem>>, %arg3: memref<1x32xf32, #tpu.memory_space<vmem>>, %arg4: memref<288x64xbf16, #tpu.memory_space<vmem>>, %arg5: memref<1x64xf32, #tpu.memory_space<vmem>>, %arg6: memref<256x64xbf16, #tpu.memory_space<vmem>>, %arg7: memref<1x64xf32, #tpu.memory_space<vmem>>, %arg8: memref<1x8x64xbf16, #tpu.memory_space<vmem>>, %arg9: memref<1x10x10x64xf32, #tpu.memory_space<vmem>>) attributes {dimension_semantics = [#tpu.dimension_semantics<parallel>], iteration_bounds = array<i64: 2>, scalar_prefetch = 0 : i64, scratch_operands = 1 : i64, tpu.core_type = #tpu.core_type<tc>, window_params = [{transform_indices = @transform_0, window_bounds = array<i64: 1, 18, 10, 32>}, {pipeline_mode = #tpu.pipeline_mode<synchronous>, transform_indices = @transform_1, window_bounds = array<i64: 72, 32>}, {pipeline_mode = #tpu.pipeline_mode<synchronous>, transform_indices = @transform_2, window_bounds = array<i64: 1, 32>}, {pipeline_mode = #tpu.pipeline_mode<synchronous>, transform_indices = @transform_3, window_bounds = array<i64: 288, 64>}, {pipeline_mode = #tpu.pipeline_mode<synchronous>, transform_indices = @transform_4, window_bounds = array<i64: 1, 64>}, {pipeline_mode = #tpu.pipeline_mode<synchronous>, transform_indices = @transform_5, window_bounds = array<i64: 256, 64>}, {pipeline_mode = #tpu.pipeline_mode<synchronous>, transform_indices = @transform_6, window_bounds = array<i64: 1, 64>}, {transform_indices = @transform_7, window_bounds = array<i64: 1, 8, 64>}]} {
    %cst = arith.constant 0.000000e+00 : f32
    %0 = vector.broadcast %cst : f32 to vector<1x1x10x64xf32>
    %c0 = arith.constant 0 : index
    %c0_0 = arith.constant 0 : index
    %c0_1 = arith.constant 0 : index
    %c0_2 = arith.constant 0 : index
    %1 = vector.load %arg9[%c0, %c0_0, %c0_1, %c0_2] : memref<1x10x10x64xf32, #tpu.memory_space<vmem>>, vector<1x1x10x64xf32>
    tpu.vector_store %arg9[%c0, %c0_0, %c0_1, %c0_2], %0 {strides = array<i32>} : memref<1x10x10x64xf32, #tpu.memory_space<vmem>>, vector<1x1x10x64xf32>,
    %cst_3 = arith.constant 0.000000e+00 : f32
    %2 = vector.broadcast %cst_3 : f32 to vector<1x1x10x64xf32>
    %c0_4 = arith.constant 0 : index
    %c9 = arith.constant 9 : index
    %c0_5 = arith.constant 0 : index
    %c0_6 = arith.constant 0 : index
    %3 = vector.load %arg9[%c0_4, %c9, %c0_5, %c0_6] : memref<1x10x10x64xf32, #tpu.memory_space<vmem>>, vector<1x1x10x64xf32>
    tpu.vector_store %arg9[%c0_4, %c9, %c0_5, %c0_6], %2 {strides = array<i32>} : memref<1x10x10x64xf32, #tpu.memory_space<vmem>>, vector<1x1x10x64xf32>,
    %cst_7 = arith.constant 0.000000e+00 : f32
    %4 = vector.broadcast %cst_7 : f32 to vector<1x10x1x64xf32>
    %c0_8 = arith.constant 0 : index
    %c0_9 = arith.constant 0 : index
    %c0_10 = arith.constant 0 : index
    %c0_11 = arith.constant 0 : index
    %5 = vector.load %arg9[%c0_8, %c0_9, %c0_10, %c0_11] : memref<1x10x10x64xf32, #tpu.memory_space<vmem>>, vector<1x10x1x64xf32>
    tpu.vector_store %arg9[%c0_8, %c0_9, %c0_10, %c0_11], %4 {strides = array<i32>} : memref<1x10x10x64xf32, #tpu.memory_space<vmem>>, vector<1x10x1x64xf32>,
    %cst_12 = arith.constant 0.000000e+00 : f32
    %6 = vector.broadcast %cst_12 : f32 to vector<1x10x1x64xf32>
    %c0_13 = arith.constant 0 : index
    %c0_14 = arith.constant 0 : index
    %c9_15 = arith.constant 9 : index
    %c0_16 = arith.constant 0 : index
    %7 = vector.load %arg9[%c0_13, %c0_14, %c9_15, %c0_16] : memref<1x10x10x64xf32, #tpu.memory_space<vmem>>, vector<1x10x1x64xf32>
    tpu.vector_store %arg9[%c0_13, %c0_14, %c9_15, %c0_16], %6 {strides = array<i32>} : memref<1x10x10x64xf32, #tpu.memory_space<vmem>>, vector<1x10x1x64xf32>,
    %c0_17 = arith.constant 0 : index
    %c0_18 = arith.constant 0 : index
    %c0_19 = arith.constant 0 : index
    %c0_20 = arith.constant 0 : index
    %8 = vector.load %arg1[%c0_17, %c0_18, %c0_19, %c0_20] : memref<1x18x10x32xbf16, #tpu.memory_space<vmem>>, vector<1x18x10x32xbf16>
    %9 = arith.extf %8 : vector<1x18x10x32xbf16> to vector<1x18x10x32xf32>
    %10 = vector.extract_strided_slice %9 {offsets = [0, 0, 0, 24], sizes = [1, 16, 8, 8], strides = [1, 1, 1, 1]} : vector<1x18x10x32xf32> to vector<1x16x8x8xf32>
    %11 = vector.extract_strided_slice %9 {offsets = [0, 0, 1, 0], sizes = [1, 16, 8, 32], strides = [1, 1, 1, 1]} : vector<1x18x10x32xf32> to vector<1x16x8x32xf32>
    %12 = vector.extract_strided_slice %9 {offsets = [0, 0, 2, 0], sizes = [1, 16, 8, 8], strides = [1, 1, 1, 1]} : vector<1x18x10x32xf32> to vector<1x16x8x8xf32>
    %13 = tpu.concatenate %10, %11, %12 in 3 : vector<1x16x8x8xf32>, vector<1x16x8x32xf32>, vector<1x16x8x8xf32> -> vector<1x16x8x48xf32>
    %14 = vector.extract_strided_slice %9 {offsets = [0, 1, 0, 24], sizes = [1, 16, 8, 8], strides = [1, 1, 1, 1]} : vector<1x18x10x32xf32> to vector<1x16x8x8xf32>
    %15 = vector.extract_strided_slice %9 {offsets = [0, 1, 1, 0], sizes = [1, 16, 8, 32], strides = [1, 1, 1, 1]} : vector<1x18x10x32xf32> to vector<1x16x8x32xf32>
    %16 = vector.extract_strided_slice %9 {offsets = [0, 1, 2, 0], sizes = [1, 16, 8, 8], strides = [1, 1, 1, 1]} : vector<1x18x10x32xf32> to vector<1x16x8x8xf32>
    %17 = tpu.concatenate %14, %15, %16 in 3 : vector<1x16x8x8xf32>, vector<1x16x8x32xf32>, vector<1x16x8x8xf32> -> vector<1x16x8x48xf32>
    %18 = vector.extract_strided_slice %9 {offsets = [0, 2, 0, 24], sizes = [1, 16, 8, 8], strides = [1, 1, 1, 1]} : vector<1x18x10x32xf32> to vector<1x16x8x8xf32>
    %19 = vector.extract_strided_slice %9 {offsets = [0, 2, 1, 0], sizes = [1, 16, 8, 32], strides = [1, 1, 1, 1]} : vector<1x18x10x32xf32> to vector<1x16x8x32xf32>
    %20 = vector.extract_strided_slice %9 {offsets = [0, 2, 2, 0], sizes = [1, 16, 8, 8], strides = [1, 1, 1, 1]} : vector<1x18x10x32xf32> to vector<1x16x8x8xf32>
    %21 = tpu.concatenate %18, %19, %20 in 3 : vector<1x16x8x8xf32>, vector<1x16x8x32xf32>, vector<1x16x8x8xf32> -> vector<1x16x8x48xf32>
    %22 = vector.extract_strided_slice %13 {offsets = [0, 0, 0, 0], sizes = [1, 16, 8, 24], strides = [1, 1, 1, 1]} : vector<1x16x8x48xf32> to vector<1x16x8x24xf32>
    %23 = vector.extract_strided_slice %17 {offsets = [0, 0, 0, 0], sizes = [1, 16, 8, 24], strides = [1, 1, 1, 1]} : vector<1x16x8x48xf32> to vector<1x16x8x24xf32>
    %24 = vector.extract_strided_slice %21 {offsets = [0, 0, 0, 0], sizes = [1, 16, 8, 24], strides = [1, 1, 1, 1]} : vector<1x16x8x48xf32> to vector<1x16x8x24xf32>
    %25 = tpu.concatenate %22, %23, %24 in 3 : vector<1x16x8x24xf32>, vector<1x16x8x24xf32>, vector<1x16x8x24xf32> -> vector<1x16x8x72xf32>
    %26 = vector.shape_cast %25 : vector<1x16x8x72xf32> to vector<128x72xf32>
    %27 = vector.extract_strided_slice %13 {offsets = [0, 0, 0, 8], sizes = [1, 16, 8, 24], strides = [1, 1, 1, 1]} : vector<1x16x8x48xf32> to vector<1x16x8x24xf32>
    %28 = vector.extract_strided_slice %17 {offsets = [0, 0, 0, 8], sizes = [1, 16, 8, 24], strides = [1, 1, 1, 1]} : vector<1x16x8x48xf32> to vector<1x16x8x24xf32>
    %29 = vector.extract_strided_slice %21 {offsets = [0, 0, 0, 8], sizes = [1, 16, 8, 24], strides = [1, 1, 1, 1]} : vector<1x16x8x48xf32> to vector<1x16x8x24xf32>
    %30 = tpu.concatenate %27, %28, %29 in 3 : vector<1x16x8x24xf32>, vector<1x16x8x24xf32>, vector<1x16x8x24xf32> -> vector<1x16x8x72xf32>
    %31 = vector.shape_cast %30 : vector<1x16x8x72xf32> to vector<128x72xf32>
    %32 = vector.extract_strided_slice %13 {offsets = [0, 0, 0, 16], sizes = [1, 16, 8, 24], strides = [1, 1, 1, 1]} : vector<1x16x8x48xf32> to vector<1x16x8x24xf32>
    %33 = vector.extract_strided_slice %17 {offsets = [0, 0, 0, 16], sizes = [1, 16, 8, 24], strides = [1, 1, 1, 1]} : vector<1x16x8x48xf32> to vector<1x16x8x24xf32>
    %34 = vector.extract_strided_slice %21 {offsets = [0, 0, 0, 16], sizes = [1, 16, 8, 24], strides = [1, 1, 1, 1]} : vector<1x16x8x48xf32> to vector<1x16x8x24xf32>
    %35 = tpu.concatenate %32, %33, %34 in 3 : vector<1x16x8x24xf32>, vector<1x16x8x24xf32>, vector<1x16x8x24xf32> -> vector<1x16x8x72xf32>
    %36 = vector.shape_cast %35 : vector<1x16x8x72xf32> to vector<128x72xf32>
    %37 = vector.extract_strided_slice %13 {offsets = [0, 0, 0, 24], sizes = [1, 16, 8, 24], strides = [1, 1, 1, 1]} : vector<1x16x8x48xf32> to vector<1x16x8x24xf32>
    %38 = vector.extract_strided_slice %17 {offsets = [0, 0, 0, 24], sizes = [1, 16, 8, 24], strides = [1, 1, 1, 1]} : vector<1x16x8x48xf32> to vector<1x16x8x24xf32>
    %39 = vector.extract_strided_slice %21 {offsets = [0, 0, 0, 24], sizes = [1, 16, 8, 24], strides = [1, 1, 1, 1]} : vector<1x16x8x48xf32> to vector<1x16x8x24xf32>
    %40 = tpu.concatenate %37, %38, %39 in 3 : vector<1x16x8x24xf32>, vector<1x16x8x24xf32>, vector<1x16x8x24xf32> -> vector<1x16x8x72xf32>
    %41 = vector.shape_cast %40 : vector<1x16x8x72xf32> to vector<128x72xf32>
    %42 = tpu.concatenate %26, %31, %36, %41 in 0 : vector<128x72xf32>, vector<128x72xf32>, vector<128x72xf32>, vector<128x72xf32> -> vector<512x72xf32>
    %43 = arith.truncf %42 : vector<512x72xf32> to vector<512x72xbf16>
    %c0_21 = arith.constant 0 : index
    %c0_22 = arith.constant 0 : index
    %44 = vector.load %arg2[%c0_21, %c0_22] : memref<72x32xbf16, #tpu.memory_space<vmem>>, vector<72x32xbf16>
    %cst_23 = arith.constant dense<0.000000e+00> : vector<512x32xf32>
    %45 = tpu.matmul %43, %44, %cst_23 {dimension_numbers = #tpu.dot_dimension_numbers<[1], [0], [0], [1], [0, 0, 1, 1], [], []>} : vector<512x72xbf16>, vector<72x32xbf16>, vector<512x32xf32> -> vector<512x32xf32>
    %c0_24 = arith.constant 0 : index
    %c0_25 = arith.constant 0 : index
    %46 = vector.load %arg3[%c0_24, %c0_25] : memref<1x32xf32, #tpu.memory_space<vmem>>, vector<1x32xf32>
    %47 = vector.broadcast %46 : vector<1x32xf32> to vector<512x32xf32>
    %48 = arith.addf %45, %47 : vector<512x32xf32>
    %cst_26 = arith.constant 0.000000e+00 : f32
    %49 = vector.broadcast %cst_26 : f32 to vector<512x32xf32>
    %50 = arith.maximumf %48, %49 : vector<512x32xf32>
    %51 = vector.shape_cast %50 : vector<512x32xf32> to vector<4x128x32xf32>
    %52 = vector.extract_strided_slice %51 {offsets = [0, 0, 0], sizes = [1, 128, 32], strides = [1, 1, 1]} : vector<4x128x32xf32> to vector<1x128x32xf32>
    %53 = vector.shape_cast %52 : vector<1x128x32xf32> to vector<128x32xf32>
    %54 = vector.extract_strided_slice %51 {offsets = [1, 0, 0], sizes = [1, 128, 32], strides = [1, 1, 1]} : vector<4x128x32xf32> to vector<1x128x32xf32>
    %55 = vector.shape_cast %54 : vector<1x128x32xf32> to vector<128x32xf32>
    %56 = arith.maximumf %53, %55 : vector<128x32xf32>
    %57 = vector.shape_cast %56 : vector<128x32xf32> to vector<8x2x8x32xf32>
    %58 = vector.extract_strided_slice %57 {offsets = [0, 0, 0, 0], sizes = [8, 1, 8, 32], strides = [1, 1, 1, 1]} : vector<8x2x8x32xf32> to vector<8x1x8x32xf32>
    %59 = vector.shape_cast %58 : vector<8x1x8x32xf32> to vector<8x8x32xf32>
    %60 = vector.extract_strided_slice %57 {offsets = [0, 1, 0, 0], sizes = [8, 1, 8, 32], strides = [1, 1, 1, 1]} : vector<8x2x8x32xf32> to vector<8x1x8x32xf32>
    %61 = vector.shape_cast %60 : vector<8x1x8x32xf32> to vector<8x8x32xf32>
    %62 = arith.maximumf %59, %61 : vector<8x8x32xf32>
    %63 = vector.shape_cast %62 : vector<8x8x32xf32> to vector<1x8x8x32xf32>
    %c0_27 = arith.constant 0 : index
    %c1 = arith.constant 1 : index
    %c1_28 = arith.constant 1 : index
    %c0_29 = arith.constant 0 : index
    %64 = vector.load %arg9[%c0_27, %c1, %c1_28, %c0_29] : memref<1x10x10x64xf32, #tpu.memory_space<vmem>>, vector<1x8x8x32xf32>
    tpu.vector_store %arg9[%c0_27, %c1, %c1_28, %c0_29], %63 {strides = array<i32>} : memref<1x10x10x64xf32, #tpu.memory_space<vmem>>, vector<1x8x8x32xf32>,
    %65 = vector.extract_strided_slice %51 {offsets = [2, 0, 0], sizes = [1, 128, 32], strides = [1, 1, 1]} : vector<4x128x32xf32> to vector<1x128x32xf32>
    %66 = vector.shape_cast %65 : vector<1x128x32xf32> to vector<128x32xf32>
    %67 = vector.extract_strided_slice %51 {offsets = [3, 0, 0], sizes = [1, 128, 32], strides = [1, 1, 1]} : vector<4x128x32xf32> to vector<1x128x32xf32>
    %68 = vector.shape_cast %67 : vector<1x128x32xf32> to vector<128x32xf32>
    %69 = arith.maximumf %66, %68 : vector<128x32xf32>
    %70 = vector.shape_cast %69 : vector<128x32xf32> to vector<8x2x8x32xf32>
    %71 = vector.extract_strided_slice %70 {offsets = [0, 0, 0, 0], sizes = [8, 1, 8, 32], strides = [1, 1, 1, 1]} : vector<8x2x8x32xf32> to vector<8x1x8x32xf32>
    %72 = vector.shape_cast %71 : vector<8x1x8x32xf32> to vector<8x8x32xf32>
    %73 = vector.extract_strided_slice %70 {offsets = [0, 1, 0, 0], sizes = [8, 1, 8, 32], strides = [1, 1, 1, 1]} : vector<8x2x8x32xf32> to vector<8x1x8x32xf32>
    %74 = vector.shape_cast %73 : vector<8x1x8x32xf32> to vector<8x8x32xf32>
    %75 = arith.maximumf %72, %74 : vector<8x8x32xf32>
    %76 = vector.shape_cast %75 : vector<8x8x32xf32> to vector<1x8x8x32xf32>
    %c0_30 = arith.constant 0 : index
    %c1_31 = arith.constant 1 : index
    %c1_32 = arith.constant 1 : index
    %c32 = arith.constant 32 : index
    %77 = vector.load %arg9[%c0_30, %c1_31, %c1_32, %c32] : memref<1x10x10x64xf32, #tpu.memory_space<vmem>>, vector<1x8x8x32xf32>
    tpu.vector_store %arg9[%c0_30, %c1_31, %c1_32, %c32], %76 {strides = array<i32>} : memref<1x10x10x64xf32, #tpu.memory_space<vmem>>, vector<1x8x8x32xf32>,
    %c0_33 = arith.constant 0 : index
    %c0_34 = arith.constant 0 : index
    %c0_35 = arith.constant 0 : index
    %c0_36 = arith.constant 0 : index
    %78 = vector.load %arg9[%c0_33, %c0_34, %c0_35, %c0_36] : memref<1x10x10x64xf32, #tpu.memory_space<vmem>>, vector<1x10x10x64xf32>
    %79 = vector.extract_strided_slice %78 {offsets = [0, 0, 0, 32], sizes = [1, 8, 8, 32], strides = [1, 1, 1, 1]} : vector<1x10x10x64xf32> to vector<1x8x8x32xf32>
    %80 = vector.extract_strided_slice %78 {offsets = [0, 0, 1, 0], sizes = [1, 8, 8, 64], strides = [1, 1, 1, 1]} : vector<1x10x10x64xf32> to vector<1x8x8x64xf32>
    %81 = vector.extract_strided_slice %78 {offsets = [0, 0, 2, 0], sizes = [1, 8, 8, 32], strides = [1, 1, 1, 1]} : vector<1x10x10x64xf32> to vector<1x8x8x32xf32>
    %82 = tpu.concatenate %79, %80, %81 in 3 : vector<1x8x8x32xf32>, vector<1x8x8x64xf32>, vector<1x8x8x32xf32> -> vector<1x8x8x128xf32>
    %83 = vector.extract_strided_slice %78 {offsets = [0, 1, 0, 32], sizes = [1, 8, 8, 32], strides = [1, 1, 1, 1]} : vector<1x10x10x64xf32> to vector<1x8x8x32xf32>
    %84 = vector.extract_strided_slice %78 {offsets = [0, 1, 1, 0], sizes = [1, 8, 8, 64], strides = [1, 1, 1, 1]} : vector<1x10x10x64xf32> to vector<1x8x8x64xf32>
    %85 = vector.extract_strided_slice %78 {offsets = [0, 1, 2, 0], sizes = [1, 8, 8, 32], strides = [1, 1, 1, 1]} : vector<1x10x10x64xf32> to vector<1x8x8x32xf32>
    %86 = tpu.concatenate %83, %84, %85 in 3 : vector<1x8x8x32xf32>, vector<1x8x8x64xf32>, vector<1x8x8x32xf32> -> vector<1x8x8x128xf32>
    %87 = vector.extract_strided_slice %78 {offsets = [0, 2, 0, 32], sizes = [1, 8, 8, 32], strides = [1, 1, 1, 1]} : vector<1x10x10x64xf32> to vector<1x8x8x32xf32>
    %88 = vector.extract_strided_slice %78 {offsets = [0, 2, 1, 0], sizes = [1, 8, 8, 64], strides = [1, 1, 1, 1]} : vector<1x10x10x64xf32> to vector<1x8x8x64xf32>
    %89 = vector.extract_strided_slice %78 {offsets = [0, 2, 2, 0], sizes = [1, 8, 8, 32], strides = [1, 1, 1, 1]} : vector<1x10x10x64xf32> to vector<1x8x8x32xf32>
    %90 = tpu.concatenate %87, %88, %89 in 3 : vector<1x8x8x32xf32>, vector<1x8x8x64xf32>, vector<1x8x8x32xf32> -> vector<1x8x8x128xf32>
    %91 = vector.extract_strided_slice %82 {offsets = [0, 0, 0, 0], sizes = [1, 8, 8, 96], strides = [1, 1, 1, 1]} : vector<1x8x8x128xf32> to vector<1x8x8x96xf32>
    %92 = vector.extract_strided_slice %86 {offsets = [0, 0, 0, 0], sizes = [1, 8, 8, 96], strides = [1, 1, 1, 1]} : vector<1x8x8x128xf32> to vector<1x8x8x96xf32>
    %93 = vector.extract_strided_slice %90 {offsets = [0, 0, 0, 0], sizes = [1, 8, 8, 96], strides = [1, 1, 1, 1]} : vector<1x8x8x128xf32> to vector<1x8x8x96xf32>
    %94 = tpu.concatenate %91, %92, %93 in 3 : vector<1x8x8x96xf32>, vector<1x8x8x96xf32>, vector<1x8x8x96xf32> -> vector<1x8x8x288xf32>
    %95 = vector.shape_cast %94 : vector<1x8x8x288xf32> to vector<64x288xf32>
    %96 = vector.extract_strided_slice %82 {offsets = [0, 0, 0, 32], sizes = [1, 8, 8, 96], strides = [1, 1, 1, 1]} : vector<1x8x8x128xf32> to vector<1x8x8x96xf32>
    %97 = vector.extract_strided_slice %86 {offsets = [0, 0, 0, 32], sizes = [1, 8, 8, 96], strides = [1, 1, 1, 1]} : vector<1x8x8x128xf32> to vector<1x8x8x96xf32>
    %98 = vector.extract_strided_slice %90 {offsets = [0, 0, 0, 32], sizes = [1, 8, 8, 96], strides = [1, 1, 1, 1]} : vector<1x8x8x128xf32> to vector<1x8x8x96xf32>
    %99 = tpu.concatenate %96, %97, %98 in 3 : vector<1x8x8x96xf32>, vector<1x8x8x96xf32>, vector<1x8x8x96xf32> -> vector<1x8x8x288xf32>
    %100 = vector.shape_cast %99 : vector<1x8x8x288xf32> to vector<64x288xf32>
    %101 = tpu.concatenate %95, %100 in 0 : vector<64x288xf32>, vector<64x288xf32> -> vector<128x288xf32>
    %102 = arith.truncf %101 : vector<128x288xf32> to vector<128x288xbf16>
    %c0_37 = arith.constant 0 : index
    %c0_38 = arith.constant 0 : index
    %103 = vector.load %arg4[%c0_37, %c0_38] : memref<288x64xbf16, #tpu.memory_space<vmem>>, vector<288x64xbf16>
    %cst_39 = arith.constant dense<0.000000e+00> : vector<128x64xf32>
    %104 = tpu.matmul %102, %103, %cst_39 {dimension_numbers = #tpu.dot_dimension_numbers<[1], [0], [0], [1], [0, 0, 1, 1], [], []>} : vector<128x288xbf16>, vector<288x64xbf16>, vector<128x64xf32> -> vector<128x64xf32>
    %c0_40 = arith.constant 0 : index
    %c0_41 = arith.constant 0 : index
    %105 = vector.load %arg5[%c0_40, %c0_41] : memref<1x64xf32, #tpu.memory_space<vmem>>, vector<1x64xf32>
    %106 = vector.broadcast %105 : vector<1x64xf32> to vector<128x64xf32>
    %107 = arith.addf %104, %106 : vector<128x64xf32>
    %cst_42 = arith.constant 0.000000e+00 : f32
    %108 = vector.broadcast %cst_42 : f32 to vector<128x64xf32>
    %109 = arith.maximumf %107, %108 : vector<128x64xf32>
    %110 = vector.shape_cast %109 : vector<128x64xf32> to vector<2x64x64xf32>
    %111 = vector.extract_strided_slice %110 {offsets = [0, 0, 0], sizes = [1, 64, 64], strides = [1, 1, 1]} : vector<2x64x64xf32> to vector<1x64x64xf32>
    %112 = vector.shape_cast %111 : vector<1x64x64xf32> to vector<64x64xf32>
    %113 = vector.extract_strided_slice %110 {offsets = [1, 0, 0], sizes = [1, 64, 64], strides = [1, 1, 1]} : vector<2x64x64xf32> to vector<1x64x64xf32>
    %114 = vector.shape_cast %113 : vector<1x64x64xf32> to vector<64x64xf32>
    %115 = arith.maximumf %112, %114 : vector<64x64xf32>
    %116 = vector.shape_cast %115 : vector<64x64xf32> to vector<4x2x8x64xf32>
    %117 = vector.extract_strided_slice %116 {offsets = [0, 0, 0, 0], sizes = [4, 1, 8, 64], strides = [1, 1, 1, 1]} : vector<4x2x8x64xf32> to vector<4x1x8x64xf32>
    %118 = vector.shape_cast %117 : vector<4x1x8x64xf32> to vector<4x8x64xf32>
    %119 = vector.extract_strided_slice %116 {offsets = [0, 1, 0, 0], sizes = [4, 1, 8, 64], strides = [1, 1, 1, 1]} : vector<4x2x8x64xf32> to vector<4x1x8x64xf32>
    %120 = vector.shape_cast %119 : vector<4x1x8x64xf32> to vector<4x8x64xf32>
    %121 = arith.maximumf %118, %120 : vector<4x8x64xf32>
    %122 = vector.shape_cast %121 : vector<4x8x64xf32> to vector<1x4x8x64xf32>
    %123 = vector.extract_strided_slice %122 {offsets = [0, 0, 0, 0], sizes = [1, 1, 8, 64], strides = [1, 1, 1, 1]} : vector<1x4x8x64xf32> to vector<1x1x8x64xf32>
    %124 = vector.shape_cast %123 : vector<1x1x8x64xf32> to vector<1x8x64xf32>
    %125 = vector.extract_strided_slice %122 {offsets = [0, 1, 0, 0], sizes = [1, 1, 8, 64], strides = [1, 1, 1, 1]} : vector<1x4x8x64xf32> to vector<1x1x8x64xf32>
    %126 = vector.shape_cast %125 : vector<1x1x8x64xf32> to vector<1x8x64xf32>
    %127 = vector.extract_strided_slice %122 {offsets = [0, 2, 0, 0], sizes = [1, 1, 8, 64], strides = [1, 1, 1, 1]} : vector<1x4x8x64xf32> to vector<1x1x8x64xf32>
    %128 = vector.shape_cast %127 : vector<1x1x8x64xf32> to vector<1x8x64xf32>
    %129 = vector.extract_strided_slice %122 {offsets = [0, 3, 0, 0], sizes = [1, 1, 8, 64], strides = [1, 1, 1, 1]} : vector<1x4x8x64xf32> to vector<1x1x8x64xf32>
    %130 = vector.shape_cast %129 : vector<1x1x8x64xf32> to vector<1x8x64xf32>
    %131 = tpu.concatenate %124, %126, %128, %130 in 2 : vector<1x8x64xf32>, vector<1x8x64xf32>, vector<1x8x64xf32>, vector<1x8x64xf32> -> vector<1x8x256xf32>
    %132 = vector.shape_cast %131 : vector<1x8x256xf32> to vector<8x256xf32>
    %133 = arith.truncf %132 : vector<8x256xf32> to vector<8x256xbf16>
    %c0_43 = arith.constant 0 : index
    %c0_44 = arith.constant 0 : index
    %134 = vector.load %arg6[%c0_43, %c0_44] : memref<256x64xbf16, #tpu.memory_space<vmem>>, vector<256x64xbf16>
    %cst_45 = arith.constant dense<0.000000e+00> : vector<8x64xf32>
    %135 = tpu.matmul %133, %134, %cst_45 {dimension_numbers = #tpu.dot_dimension_numbers<[1], [0], [0], [1], [0, 0, 1, 1], [], []>} : vector<8x256xbf16>, vector<256x64xbf16>, vector<8x64xf32> -> vector<8x64xf32>
    %c0_46 = arith.constant 0 : index
    %c0_47 = arith.constant 0 : index
    %136 = vector.load %arg7[%c0_46, %c0_47] : memref<1x64xf32, #tpu.memory_space<vmem>>, vector<1x64xf32>
    %137 = vector.broadcast %136 : vector<1x64xf32> to vector<8x64xf32>
    %138 = arith.addf %135, %137 : vector<8x64xf32>
    %cst_48 = arith.constant 0.000000e+00 : f32
    %139 = vector.broadcast %cst_48 : f32 to vector<8x64xf32>
    %140 = arith.maximumf %138, %139 : vector<8x64xf32>
    %141 = vector.shape_cast %140 : vector<8x64xf32> to vector<1x8x64xf32>
    %142 = arith.truncf %141 : vector<1x8x64xf32> to vector<1x8x64xbf16>
    %c0_49 = arith.constant 0 : index
    %c0_50 = arith.constant 0 : index
    %c0_51 = arith.constant 0 : index
    %143 = vector.load %arg8[%c0_49, %c0_50, %c0_51] : memref<1x8x64xbf16, #tpu.memory_space<vmem>>, vector<1x8x64xbf16>
    tpu.vector_store %arg8[%c0_49, %c0_50, %c0_51], %142 {strides = array<i32>} : memref<1x8x64xbf16, #tpu.memory_space<vmem>>, vector<1x8x64xbf16>,
    return
  }
  func.func @transform_0(%arg0: i32) -> (i32, i32, i32, i32) {
    %c0_i32 = arith.constant 0 : i32
    %c0_i32_0 = arith.constant 0 : i32
    %c0_i32_1 = arith.constant 0 : i32
    %c0_i32_2 = arith.constant 0 : i32
    return %arg0, %c0_i32, %c0_i32_0, %c0_i32_1 : i32, i32, i32, i32
  }
  func.func @transform_1(%arg0: i32) -> (i32, i32) {
    %c0_i32 = arith.constant 0 : i32
    %c0_i32_0 = arith.constant 0 : i32
    %c0_i32_1 = arith.constant 0 : i32
    return %c0_i32, %c0_i32_0 : i32, i32
  }
  func.func @transform_2(%arg0: i32) -> (i32, i32) {
    %c0_i32 = arith.constant 0 : i32
    %c0_i32_0 = arith.constant 0 : i32
    %c0_i32_1 = arith.constant 0 : i32
    return %c0_i32, %c0_i32_0 : i32, i32
  }
  func.func @transform_3(%arg0: i32) -> (i32, i32) {
    %c0_i32 = arith.constant 0 : i32
    %c0_i32_0 = arith.constant 0 : i32
    %c0_i32_1 = arith.constant 0 : i32
    return %c0_i32, %c0_i32_0 : i32, i32
  }
  func.func @transform_4(%arg0: i32) -> (i32, i32) {
    %c0_i32 = arith.constant 0 : i32
    %c0_i32_0 = arith.constant 0 : i32
    %c0_i32_1 = arith.constant 0 : i32
    return %c0_i32, %c0_i32_0 : i32, i32
  }
  func.func @transform_5(%arg0: i32) -> (i32, i32) {
    %c0_i32 = arith.constant 0 : i32
    %c0_i32_0 = arith.constant 0 : i32
    %c0_i32_1 = arith.constant 0 : i32
    return %c0_i32, %c0_i32_0 : i32, i32
  }
  func.func @transform_6(%arg0: i32) -> (i32, i32) {
    %c0_i32 = arith.constant 0 : i32
    %c0_i32_0 = arith.constant 0 : i32
    %c0_i32_1 = arith.constant 0 : i32
    return %c0_i32, %c0_i32_0 : i32, i32
  }
  func.func @transform_7(%arg0: i32) -> (i32, i32, i32) {
    %c0_i32 = arith.constant 0 : i32
    %c0_i32_0 = arith.constant 0 : i32
    %c0_i32_1 = arith.constant 0 : i32
    return %arg0, %c0_i32, %c0_i32_0 : i32, i32, i32
  }
}

</mosaic_0001>

<bundles_post_ra>
// kernel: _lambda_.3
= control target key start
LH: loop header
LB: loop body
LE: loop exit
PB: predicated region body
PF: predicated region fallthrough
CT: control target
= control target key end

     0   :  { %v4243_v1 = vmov 0   ;;  %vm137_vm0 = vcmask 523264   ;;  %vm3218_vm1 = vmmov 0   ;;  %s4233_s1 = inlined_call_operand.vmem [shape: bf16[2,64,512], index: 1, kind: input, shape index: {}]   ;;  %s4234_s0 = inlined_call_operand.vmem [shape: bf16[16,64], index: 0, kind: input, shape index: {}]   ;;  %s4235_s2 = inlined_call_operand.vmem [shape: bf16[2,128,512], index: 2, kind: input, shape index: {}]   ;;  %s4236_s3 = inlined_call_operand.vmem [shape: f32[2,1,512], index: 3, kind: input, shape index: {}]   ;;  %s4237_s4 = inlined_call_operand.vmem [shape: bf16[2,256,256], index: 4, kind: input, shape index: {}]   ;;  %s4238_s5 = inlined_call_operand.vmem [shape: bf16[2,64,256], index: 5, kind: input, shape index: {}]   ;;  %s4239_s6 = inlined_call_operand.vmem [shape: f32[2,1,256], index: 6, kind: input, shape index: {}]   ;;  %s4240_s7 = inlined_call_operand.vmem [shape: bf16[128,128], index: 7, kind: input, shape index: {}]   ;;  %s4241_s8 = inlined_call_operand.vmem [shape: f32[1,128], index: 8, kind: input, shape index: {}]   ;;  %s4242_s9 = inlined_call_operand.vmem [shape: f32[16,128], index: 9, kind: output, shape index: {}]  }
   0x1   :  { %v2822_v0 = vld [vmem:[%s4233_s1 + $0x4] ss:$16 sps:$4 sm:$0xff]   ;;  %173 = vmatprep.mubr.bf16.mxu0 %v4243_v1  ;;  %216 = vmatprep.mubr.bf16.mxu1 %v4243_v1  ;;  %v2824_v2 = vld [vmem:[%s4233_s1 + $0xc] ss:$16 sps:$4 sm:$0xff]   ;;  %v2826_v3 = vld [vmem:[%s4233_s1] ss:$16 sps:$4 sm:$0xff]  }
   0x2   :  { %141 = vmatprep.subr.bf16.mxu0 %v2822_v0  ;;  %v2827_v4 = vld [vmem:[%s4233_s1 + $0x8] ss:$16 sps:$4 sm:$0xff]   ;;  %184 = vmatprep.subr.bf16.mxu1 %v2824_v2  ;;  %v2828_v5 = vld [vmem:[%s4233_s1 + $0x24] ss:$16 sps:$4 sm:$0xff]   ;;  %v2830_v6 = vld [vmem:[%s4233_s1 + $0x2c] ss:$16 sps:$4 sm:$0xff]  }
   0x3   :  { %142 = vmatpush1.bf16.msra.mxu0 %v2826_v3  ;;  %185 = vmatpush1.bf16.msra.mxu1 %v2827_v4  ;;  %v2832_v7 = vld [vmem:[%s4233_s1 + $0x20] ss:$16 sps:$4 sm:$0xff]   ;;  %v2833_v8 = vld [vmem:[%s4233_s1 + $0x28] ss:$16 sps:$4 sm:$0xff]   ;;  %v2834_v9 = vld [vmem:[%s4233_s1 + $0x44] ss:$16 sps:$4 sm:$0xff]  }
   0x4   :  { %143 = vmatprep.subr.bf16.mxu0 %v2828_v5  ;;  %186 = vmatprep.subr.bf16.mxu1 %v2830_v6  ;;  %v2836_v10 = vld [vmem:[%s4233_s1 + $0x4c] ss:$16 sps:$4 sm:$0xff]   ;;  %v2838_v11 = vld [vmem:[%s4233_s1 + $0x40] ss:$16 sps:$4 sm:$0xff]   ;;  %v2839_v12 = vld [vmem:[%s4233_s1 + $0x48] ss:$16 sps:$4 sm:$0xff]  }
   0x5   :  { %v2840_v13 = vld [vmem:[%s4233_s1 + $0x64] ss:$16 sps:$4 sm:$0xff]   ;;  %v2842_v14 = vld [vmem:[%s4233_s1 + $0x6c] ss:$16 sps:$4 sm:$0xff]   ;;  %v2844_v15 = vld [vmem:[%s4233_s1 + $0x60] ss:$16 sps:$4 sm:$0xff]  }
   0x6   :  { %v2845_v16 = vld [vmem:[%s4233_s1 + $0x68] ss:$16 sps:$4 sm:$0xff]   ;;  %v2849_v17 = vld [vmem:[%s4233_s1 + $0x84] ss:$16 sps:$4 sm:$0xff]   ;;  %v2852_v18 = vld [vmem:[%s4233_s1 + $0x8c] ss:$16 sps:$4 sm:$0xff]  }
   0x7   :  { %144 = vmatpush1.bf16.msra.mxu0 %v2832_v7  ;;  %187 = vmatpush1.bf16.msra.mxu1 %v2833_v8  ;;  %v2846_v19 = vld [vmem:[%s4234_s0] sm:$0xff]   ;;  %v2850_v21 = vld [vmem:[%s4233_s1 + $0x88] ss:$16 sps:$4 sm:$0xff]   ;;  %v2858_v23 = vld [vmem:[%s4233_s1 + $0xac] ss:$16 sps:$4 sm:$0xff]  }
   0x8   :  { %145 = vmatprep.subr.bf16.mxu0 %v2834_v9  ;;  %188 = vmatprep.subr.bf16.mxu1 %v2836_v10  ;;  %v2847_v20 = vld [vmem:[%s4233_s1 + $0x80] ss:$16 sps:$4 sm:$0xff]   ;;  %v2855_v22 = vld [vmem:[%s4233_s1 + $0xa4] ss:$16 sps:$4 sm:$0xff]   ;;  %v2856_v25 = vld [vmem:[%s4233_s1 + $0xa8] ss:$16 sps:$4 sm:$0xff]  }
   0x9   :  { %v2853_v24 = vld [vmem:[%s4233_s1 + $0xa0] ss:$16 sps:$4 sm:$0xff]   ;;  %v2861_v26 = vld [vmem:[%s4233_s1 + $0xc4] ss:$16 sps:$4 sm:$0xff]   ;;  %v2864_v27 = vld [vmem:[%s4233_s1 + $0xcc] ss:$16 sps:$4 sm:$0xff]  }
   0xa   :  { %v2859_v28 = vld [vmem:[%s4233_s1 + $0xc0] ss:$16 sps:$4 sm:$0xff]   ;;  %v2862_v29 = vld [vmem:[%s4233_s1 + $0xc8] ss:$16 sps:$4 sm:$0xff]   ;;  %v2867_v30 = vld [vmem:[%s4233_s1 + $0xe4] ss:$16 sps:$4 sm:$0xff]  }
   0xb   :  { %146 = vmatpush1.bf16.msra.mxu0 %v2838_v11  ;;  %189 = vmatpush1.bf16.msra.mxu1 %v2839_v12  ;;  %v2870_v31 = vld [vmem:[%s4233_s1 + $0xec] ss:$16 sps:$4 sm:$0xff]   ;;  %v2865_v32 = vld [vmem:[%s4233_s1 + $0xe0] ss:$16 sps:$4 sm:$0xff]   ;;  %v2868_v33 = vld [vmem:[%s4233_s1 + $0xe8] ss:$16 sps:$4 sm:$0xff]  }
   0xc   :  { %147 = vmatprep.subr.bf16.mxu0 %v2840_v13  ;;  %190 = vmatprep.subr.bf16.mxu1 %v2842_v14  ;;  %v3377_v34 = vld [vmem:[%s4235_s2 + $0x4] ss:$16 sps:$4 sm:$0xff]   ;;  %v3382_v35 = vld [vmem:[%s4235_s2 + $0xc] ss:$16 sps:$4 sm:$0xff]   ;;  %v3387_v36 = vld [vmem:[%s4235_s2] ss:$16 sps:$4 sm:$0xff]  }
   0xd   :  { %v3392_v37 = vld [vmem:[%s4235_s2 + $0x8] ss:$16 sps:$4 sm:$0xff]   ;;  %v3397_v38 = vld [vmem:[%s4235_s2 + $0x24] ss:$16 sps:$4 sm:$0xff]   ;;  %v3404_v39 = vld [vmem:[%s4235_s2 + $0x2c] ss:$16 sps:$4 sm:$0xff]  }
   0xe   :  { %v3411_v40 = vld [vmem:[%s4235_s2 + $0x20] ss:$16 sps:$4 sm:$0xff]   ;;  %v3418_v41 = vld [vmem:[%s4235_s2 + $0x28] ss:$16 sps:$4 sm:$0xff]   ;;  %v3423_v42 = vld [vmem:[%s4235_s2 + $0x44] ss:$16 sps:$4 sm:$0xff]  }
   0xf   :  { %148 = vmatpush1.bf16.msra.mxu0 %v2844_v15  ;;  %191 = vmatpush1.bf16.msra.mxu1 %v2845_v16  ;;  %v3430_v43 = vld [vmem:[%s4235_s2 + $0x4c] ss:$16 sps:$4 sm:$0xff]   ;;  %v3437_v44 = vld [vmem:[%s4235_s2 + $0x40] ss:$16 sps:$4 sm:$0xff]   ;;  %v3444_v45 = vld [vmem:[%s4235_s2 + $0x48] ss:$16 sps:$4 sm:$0xff]  }
  0x10   :  { %355 = vmatprep.subr.bf16.mxu0 %v2849_v17  ;;  %398 = vmatprep.subr.bf16.mxu1 %v2852_v18  ;;  %v3449_v46 = vld [vmem:[%s4235_s2 + $0x64] ss:$16 sps:$4 sm:$0xff]   ;;  %v3456_v47 = vld [vmem:[%s4235_s2 + $0x6c] ss:$16 sps:$4 sm:$0xff]   ;;  %v3461_v48 = vld [vmem:[%s4235_s2 + $0x60] ss:$16 sps:$4 sm:$0xff]  }
  0x11   :  { %v3468_v49 = vld [vmem:[%s4235_s2 + $0x68] ss:$16 sps:$4 sm:$0xff]   ;;  %v3473_v50 = vld [vmem:[%s4235_s2 + $0x84] ss:$16 sps:$4 sm:$0xff]   ;;  %v3480_v51 = vld [vmem:[%s4235_s2 + $0x8c] ss:$16 sps:$4 sm:$0xff]  }
  0x12   :  { %2501 = vmatmul.mubr.msk.bf16.vlgmr.msra.gmra.mrb[0].mxu0 %vm137_vm0, %v2846_v19  ;;  %2502 = vmatmul.mubr.msk.bf16.vlgmr.msra.gmra.mrb[0].mxu1 %vm137_vm0, %v2846_v19  ;;  %v3485_v52 = vld [vmem:[%s4235_s2 + $0x80] ss:$16 sps:$4 sm:$0xff]   ;;  %v3492_v53 = vld [vmem:[%s4235_s2 + $0x88] ss:$16 sps:$4 sm:$0xff]   ;;  %v3497_v54 = vld [vmem:[%s4235_s2 + $0xa4] ss:$16 sps:$4 sm:$0xff]  }
  0x13   :  { %356 = vmatpush1.bf16.msra.mxu0 %v2847_v20  ;;  %399 = vmatpush1.bf16.msra.mxu1 %v2850_v21  ;;  %v3504_v55 = vld [vmem:[%s4235_s2 + $0xac] ss:$16 sps:$4 sm:$0xff]   ;;  %v3509_v56 = vld [vmem:[%s4235_s2 + $0xa0] ss:$16 sps:$4 sm:$0xff]   ;;  %v3516_v57 = vld [vmem:[%s4235_s2 + $0xa8] ss:$16 sps:$4 sm:$0xff]  }
  0x14   :  { %357 = vmatprep.subr.bf16.mxu0 %v2855_v22  ;;  %400 = vmatprep.subr.bf16.mxu1 %v2858_v23  ;;  %v3521_v58 = vld [vmem:[%s4235_s2 + $0xc4] ss:$16 sps:$4 sm:$0xff]   ;;  %v3528_v59 = vld [vmem:[%s4235_s2 + $0xcc] ss:$16 sps:$4 sm:$0xff]   ;;  %v3533_v60 = vld [vmem:[%s4235_s2 + $0xc0] ss:$16 sps:$4 sm:$0xff]  }
  0x15   :  { %387 = vmatprep.mubr.bf16.mxu0 %v4243_v1  ;;  %430 = vmatprep.mubr.bf16.mxu1 %v4243_v1  ;;  %v3540_v61 = vld [vmem:[%s4235_s2 + $0xc8] ss:$16 sps:$4 sm:$0xff]   ;;  %v3545_v62 = vld [vmem:[%s4235_s2 + $0xe4] ss:$16 sps:$4 sm:$0xff]   ;;  %v3552_v63 = vld [vmem:[%s4235_s2 + $0xec] ss:$16 sps:$4 sm:$0xff]  }
  0x16   :  { %v3557_v0 = vld [vmem:[%s4235_s2 + $0xe0] ss:$16 sps:$4 sm:$0xff]   ;;  %v3564_v2 = vld [vmem:[%s4235_s2 + $0xe8] ss:$16 sps:$4 sm:$0xff]   ;;  %v3569_v3 = vld [vmem:[%s4235_s2 + $0x104] ss:$16 sps:$4 sm:$0xff]  }
  0x17   :  { %358 = vmatpush1.bf16.msra.mxu0 %v2853_v24  ;;  %401 = vmatpush1.bf16.msra.mxu1 %v2856_v25  ;;  %v3576_v4 = vld [vmem:[%s4235_s2 + $0x10c] ss:$16 sps:$4 sm:$0xff]   ;;  %v3583_v5 = vld [vmem:[%s4235_s2 + $0x100] ss:$16 sps:$4 sm:$0xff]   ;;  %v3588_v6 = vld [vmem:[%s4235_s2 + $0x108] ss:$16 sps:$4 sm:$0xff]  }
  0x18   :  { %359 = vmatprep.subr.bf16.mxu0 %v2861_v26  ;;  %402 = vmatprep.subr.bf16.mxu1 %v2864_v27  ;;  %v3595_v7 = vld [vmem:[%s4235_s2 + $0x124] ss:$16 sps:$4 sm:$0xff]   ;;  %v3600_v8 = vld [vmem:[%s4235_s2 + $0x12c] ss:$16 sps:$4 sm:$0xff]   ;;  %v3609_v9 = vld [vmem:[%s4235_s2 + $0x120] ss:$16 sps:$4 sm:$0xff]  }
  0x19   :  { %v3614_v10 = vld [vmem:[%s4235_s2 + $0x128] ss:$16 sps:$4 sm:$0xff]   ;;  %v3621_v11 = vld [vmem:[%s4235_s2 + $0x144] ss:$16 sps:$4 sm:$0xff]   ;;  %v3626_v12 = vld [vmem:[%s4235_s2 + $0x14c] ss:$16 sps:$4 sm:$0xff]  }
  0x1a   :  { %v3635_v13 = vld [vmem:[%s4235_s2 + $0x140] ss:$16 sps:$4 sm:$0xff]   ;;  %v3640_v14 = vld [vmem:[%s4235_s2 + $0x148] ss:$16 sps:$4 sm:$0xff]   ;;  %v3647_v15 = vld [vmem:[%s4235_s2 + $0x164] ss:$16 sps:$4 sm:$0xff]  }
  0x1b   :  { %360 = vmatpush1.bf16.msra.mxu0 %v2859_v28  ;;  %403 = vmatpush1.bf16.msra.mxu1 %v2862_v29  ;;  %v3652_v16 = vld [vmem:[%s4235_s2 + $0x16c] ss:$16 sps:$4 sm:$0xff]   ;;  %v3659_v17 = vld [vmem:[%s4235_s2 + $0x160] ss:$16 sps:$4 sm:$0xff]   ;;  %v3664_v18 = vld [vmem:[%s4235_s2 + $0x168] ss:$16 sps:$4 sm:$0xff]  }
  0x1c   :  { %361 = vmatprep.subr.bf16.mxu0 %v2867_v30  ;;  %404 = vmatprep.subr.bf16.mxu1 %v2870_v31  ;;  %v3676_v20 = vld [vmem:[%s4235_s2 + $0x18c] ss:$16 sps:$4 sm:$0xff]   ;;  %v3683_v21 = vld [vmem:[%s4235_s2 + $0x180] ss:$16 sps:$4 sm:$0xff]   ;;  %v3688_v22 = vld [vmem:[%s4235_s2 + $0x188] ss:$16 sps:$4 sm:$0xff]  }
  0x1d   :  { %v3695_v23 = vld [vmem:[%s4235_s2 + $0x1a4] ss:$16 sps:$4 sm:$0xff]   ;;  %v3700_v24 = vld [vmem:[%s4235_s2 + $0x1ac] ss:$16 sps:$4 sm:$0xff]   ;;  %v3707_v25 = vld [vmem:[%s4235_s2 + $0x1a0] ss:$16 sps:$4 sm:$0xff]  }
  0x1e   :  { %v3712_v26 = vld [vmem:[%s4235_s2 + $0x1a8] ss:$16 sps:$4 sm:$0xff]   ;;  %v3719_v27 = vld [vmem:[%s4235_s2 + $0x1c4] ss:$16 sps:$4 sm:$0xff]   ;;  %v3724_v28 = vld [vmem:[%s4235_s2 + $0x1cc] ss:$16 sps:$4 sm:$0xff]  }
  0x1f   :  { %362 = vmatpush1.bf16.msra.mxu0 %v2865_v32  ;;  %405 = vmatpush1.bf16.msra.mxu1 %v2868_v33  ;;  %v3731_v29 = vld [vmem:[%s4235_s2 + $0x1c0] ss:$16 sps:$4 sm:$0xff]   ;;  %v3736_v30 = vld [vmem:[%s4235_s2 + $0x1c8] ss:$16 sps:$4 sm:$0xff]   ;;  %v3743_v31 = vld [vmem:[%s4235_s2 + $0x1e4] ss:$16 sps:$4 sm:$0xff]  }
  0x20   :  { %695 = vmatprep.subr.bf16.mxu0 %v3377_v34  ;;  %736 = vmatprep.subr.bf16.mxu1 %v3382_v35  ;;  %4252 = vst [vmem:[#allocation6_spill] sm:$0xff] %v3736_v30  ;;  %v3748_v32 = vld [vmem:[%s4235_s2 + $0x1ec] ss:$16 sps:$4 sm:$0xff]   ;;  %v3755_v33 = vld [vmem:[%s4235_s2 + $0x1e0] ss:$16 sps:$4 sm:$0xff]  }
  0x21   :  { %4253 = vst [vmem:[#allocation7_spill] sm:$0xff] %v3755_v33 }
  0x22   :  { %2536 = vmatmul.mubr.msk.bf16.vlgmr.msra.gmra.mrb[4].mxu0 %vm137_vm0, %v2846_v19  ;;  %2537 = vmatmul.mubr.msk.bf16.vlgmr.msra.gmra.mrb[4].mxu1 %vm137_vm0, %v2846_v19  ;;  %v3671_v19 = vld [vmem:[%s4235_s2 + $0x184] ss:$16 sps:$4 sm:$0xff]  }
  0x23   :  { %696 = vmatpush1.bf16.msra.mxu0 %v3387_v36  ;;  %737 = vmatpush1.bf16.msra.mxu1 %v3392_v37 }
  0x24   :  { %697 = vmatprep.subr.bf16.mxu0 %v3397_v38  ;;  %738 = vmatprep.subr.bf16.mxu1 %v3404_v39 }
  0x25   :  { %727 = vmatprep.mubr.bf16.mxu0 %v4243_v1  ;;  %768 = vmatprep.mubr.bf16.mxu1 %v4243_v1 }
  0x27   :  { %698 = vmatpush1.bf16.msra.mxu0 %v3411_v40  ;;  %739 = vmatpush1.bf16.msra.mxu1 %v3418_v41 }
  0x28   :  { %699 = vmatprep.subr.bf16.mxu0 %v3423_v42  ;;  %740 = vmatprep.subr.bf16.mxu1 %v3430_v43 }
  0x2b   :  { %700 = vmatpush1.bf16.msra.mxu0 %v3437_v44  ;;  %741 = vmatpush1.bf16.msra.mxu1 %v3444_v45 }
  0x2c   :  { %701 = vmatprep.subr.bf16.mxu0 %v3449_v46  ;;  %742 = vmatprep.subr.bf16.mxu1 %v3456_v47 }
  0x2f   :  { %702 = vmatpush1.bf16.msra.mxu0 %v3461_v48  ;;  %743 = vmatpush1.bf16.msra.mxu1 %v3468_v49 }
  0x30   :  { %703 = vmatprep.subr.bf16.mxu0 %v3473_v50  ;;  %744 = vmatprep.subr.bf16.mxu1 %v3480_v51 }
  0x33   :  { %704 = vmatpush1.bf16.msra.mxu0 %v3485_v52  ;;  %745 = vmatpush1.bf16.msra.mxu1 %v3492_v53 }
  0x34   :  { %705 = vmatprep.subr.bf16.mxu0 %v3497_v54  ;;  %746 = vmatprep.subr.bf16.mxu1 %v3504_v55 }
  0x37   :  { %706 = vmatpush1.bf16.msra.mxu0 %v3509_v56  ;;  %747 = vmatpush1.bf16.msra.mxu1 %v3516_v57 }
  0x38   :  { %707 = vmatprep.subr.bf16.mxu0 %v3521_v58  ;;  %748 = vmatprep.subr.bf16.mxu1 %v3528_v59 }
  0x3b   :  { %708 = vmatpush1.bf16.msra.mxu0 %v3533_v60  ;;  %749 = vmatpush1.bf16.msra.mxu1 %v3540_v61 }
  0x3c   :  { %709 = vmatprep.subr.bf16.mxu0 %v3545_v62  ;;  %750 = vmatprep.subr.bf16.mxu1 %v3552_v63 }
  0x3f   :  { %710 = vmatpush1.bf16.msra.mxu0 %v3557_v0  ;;  %751 = vmatpush1.bf16.msra.mxu1 %v3564_v2 }
  0x40   :  { %941 = vmatprep.subr.bf16.mxu0 %v3569_v3  ;;  %982 = vmatprep.subr.bf16.mxu1 %v3576_v4 }
  0x42   :  { %728 = vmatmul.mubr.bf16.vlgmr.msra.gmra.mrb[8].mxu0 %v4243_v1  ;;  %769 = vmatmul.mubr.bf16.vlgmr.msra.gmra.mrb[8].mxu1 %v4243_v1 }
  0x43   :  { %942 = vmatpush1.bf16.msra.mxu0 %v3583_v5  ;;  %983 = vmatpush1.bf16.msra.mxu1 %v3588_v6 }
  0x44   :  { %943 = vmatprep.subr.bf16.mxu0 %v3595_v7  ;;  %984 = vmatprep.subr.bf16.mxu1 %v3600_v8 }
  0x45   :  { %973 = vmatprep.mubr.bf16.mxu0 %v4243_v1  ;;  %1014 = vmatprep.mubr.bf16.mxu1 %v4243_v1  ;;  %v3760_v1 = vld [vmem:[%s4235_s2 + $0x1e8] ss:$16 sps:$4 sm:$0xff]  }
  0x46   :  { %4254 = vst [vmem:[#allocation8_spill] sm:$0xff] %v3760_v1 }
  0x47   :  { %944 = vmatpush1.bf16.msra.mxu0 %v3609_v9  ;;  %985 = vmatpush1.bf16.msra.mxu1 %v3614_v10 }
  0x48   :  { %945 = vmatprep.subr.bf16.mxu0 %v3621_v11  ;;  %986 = vmatprep.subr.bf16.mxu1 %v3626_v12 }
  0x4b   :  { %946 = vmatpush1.bf16.msra.mxu0 %v3635_v13  ;;  %987 = vmatpush1.bf16.msra.mxu1 %v3640_v14 }
  0x4c   :  { %947 = vmatprep.subr.bf16.mxu0 %v3647_v15  ;;  %988 = vmatprep.subr.bf16.mxu1 %v3652_v16 }
  0x4f   :  { %948 = vmatpush1.bf16.msra.mxu0 %v3659_v17  ;;  %989 = vmatpush1.bf16.msra.mxu1 %v3664_v18 }
  0x50   :  { %949 = vmatprep.subr.bf16.mxu0 %v3671_v19  ;;  %990 = vmatprep.subr.bf16.mxu1 %v3676_v20 }
  0x53   :  { %950 = vmatpush1.bf16.msra.mxu0 %v3683_v21  ;;  %991 = vmatpush1.bf16.msra.mxu1 %v3688_v22 }
  0x54   :  { %951 = vmatprep.subr.bf16.mxu0 %v3695_v23  ;;  %992 = vmatprep.subr.bf16.mxu1 %v3700_v24 }
  0x57   :  { %952 = vmatpush1.bf16.msra.mxu0 %v3707_v25  ;;  %993 = vmatpush1.bf16.msra.mxu1 %v3712_v26 }
  0x58   :  { %953 = vmatprep.subr.bf16.mxu0 %v3719_v27  ;;  %994 = vmatprep.subr.bf16.mxu1 %v3724_v28 }
  0x5b   :  { %954 = vmatpush1.bf16.msra.mxu0 %v3731_v29  ;;  %995 = vmatpush1.bf16.msra.mxu1 %v3736_v30  ;;  %v4255_v30 = vmov 0  }
  0x5c   :  { %955 = vmatprep.subr.bf16.mxu0 %v3743_v31  ;;  %996 = vmatprep.subr.bf16.mxu1 %v3748_v32 }
  0x5f   :  { %956 = vmatpush1.bf16.msra.mxu0 %v3755_v33  ;;  %997 = vmatpush1.bf16.msra.mxu1 %v3760_v1 }
  0x60   :  { %1072 = vmatprep.subr.bf16.mxu0 %v3377_v34  ;;  %1113 = vmatprep.subr.bf16.mxu1 %v3382_v35  ;;  %v228_v34 = vlaneseq }
  0x62   :  { %974 = vmatmul.mubr.bf16.vlgmr.msra.gmra.mrb[12].mxu0 %v4255_v30  ;;  %1015 = vmatmul.mubr.bf16.vlgmr.msra.gmra.mrb[12].mxu1 %v4255_v30  ;;  %v229_v35 = vshrl.u32 %v228_v34, 7 }
  0x63   :  { %1073 = vmatpush1.bf16.msra.mxu0 %v3387_v36  ;;  %1114 = vmatpush1.bf16.msra.mxu1 %v3392_v37 }
  0x64   :  { %1074 = vmatprep.subr.bf16.mxu0 %v3397_v38  ;;  %1115 = vmatprep.subr.bf16.mxu1 %v3404_v39  ;;  %v3804_v36 = vsub.s32 0, %v229_v35  ;;  %v238_v37 = vsub.s32 2, %v229_v35  ;;  %v35_v38 = vld [vmem:[%s4236_s3] sm:$0xf]  ;;  %v242_v39 = vsub.s32 3, %v229_v35 }
  0x65   :  { %1104 = vmatprep.mubr.bf16.mxu0 %v4255_v30  ;;  %1145 = vmatprep.mubr.bf16.mxu1 %v4255_v30 }
  0x66   :  { %4256 = vst [vmem:[#allocation9_spill] sm:$0xff] %v3804_v36 }
  0x67   :  { %1075 = vmatpush1.bf16.msra.mxu0 %v3411_v40  ;;  %1116 = vmatpush1.bf16.msra.mxu1 %v3418_v41  ;;  %v3809_v40 = vsub.s32 1, %v229_v35  ;;  %v231_v41 = vrot.slane %v35_v38, %v3804_v36 }
  0x68   :  { %1076 = vmatprep.subr.bf16.mxu0 %v3423_v42  ;;  %1117 = vmatprep.subr.bf16.mxu1 %v3430_v43  ;;  %v239_v42 = vrot.slane %v35_v38, %v238_v37 }
  0x69   :  { %4257 = vst [vmem:[#allocation10_spill] sm:$0xff] %v3809_v40 }
  0x6b   :  { %1077 = vmatpush1.bf16.msra.mxu0 %v3437_v44  ;;  %1118 = vmatpush1.bf16.msra.mxu1 %v3444_v45  ;;  %v243_v45 = vrot.slane %v35_v38, %v242_v39 }
  0x6c   :  { %1078 = vmatprep.subr.bf16.mxu0 %v3449_v46  ;;  %1119 = vmatprep.subr.bf16.mxu1 %v3456_v47 }
  0x6f   :  { %1079 = vmatpush1.bf16.msra.mxu0 %v3461_v48  ;;  %1120 = vmatpush1.bf16.msra.mxu1 %v3468_v49  ;;  %v235_v48 = vrot.slane %v35_v38, %v3809_v40 }
  0x70   :  { %1080 = vmatprep.subr.bf16.mxu0 %v3473_v50  ;;  %1121 = vmatprep.subr.bf16.mxu1 %v3480_v51 }
  0x73   :  { %1081 = vmatpush1.bf16.msra.mxu0 %v3485_v52  ;;  %1122 = vmatpush1.bf16.msra.mxu1 %v3492_v53 }
  0x74   :  { %1082 = vmatprep.subr.bf16.mxu0 %v3497_v54  ;;  %1123 = vmatprep.subr.bf16.mxu1 %v3504_v55 }
  0x77   :  { %1083 = vmatpush1.bf16.msra.mxu0 %v3509_v56  ;;  %1124 = vmatpush1.bf16.msra.mxu1 %v3516_v57  ;;  %v2503_v57 = vld [vmem:[%s4236_s3 + $0x4] sm:$0xf] }
  0x78   :  { %1084 = vmatprep.subr.bf16.mxu0 %v3521_v58  ;;  %1125 = vmatprep.subr.bf16.mxu1 %v3528_v59  ;;  %v445_v58 = vrot.slane %v2503_v57, %v3804_v36  ;;  %v453_v59 = vrot.slane %v2503_v57, %v238_v37 }
  0x7b   :  { %1085 = vmatpush1.bf16.msra.mxu0 %v3533_v60  ;;  %1126 = vmatpush1.bf16.msra.mxu1 %v3540_v61  ;;  %v449_v60 = vrot.slane %v2503_v57, %v3809_v40  ;;  %v457_v61 = vrot.slane %v2503_v57, %v242_v39 }
  0x7c   :  { %1086 = vmatprep.subr.bf16.mxu0 %v3545_v62  ;;  %1127 = vmatprep.subr.bf16.mxu1 %v3552_v63 }
  0x7f   :  { %1087 = vmatpush1.bf16.msra.mxu0 %v3557_v0  ;;  %1128 = vmatpush1.bf16.msra.mxu1 %v3564_v2 }
  0x80   :  { %1159 = vmatprep.subr.bf16.mxu0 %v3569_v3  ;;  %1200 = vmatprep.subr.bf16.mxu1 %v3576_v4 }
  0xe5   :  { %v175_v43 = vpop.f32.mrb[0].mxu0  ;;  %v218_v44 = vpop.f32.mrb[0].mxu1 }
  0xe6   :  { %v177_v46 = vpop.f32.mrb[1].mxu0  ;;  %v220_v47 = vpop.f32.mrb[1].mxu1  ;;  %v248_v37 = vadd.f32 %v231_v41, %v175_v43 }
  0xe7   :  { %v179_v49 = vpop.f32.mrb[2].mxu0  ;;  %v222_v50 = vpop.f32.mrb[2].mxu1  ;;  %v249_v40 = vadd.f32 %v235_v48, %v177_v46  ;;  %v251_v39 = vadd.f32 %v243_v45, %v220_v47 }
  0xe8   :  { %v3813_v51 = vadd.f32 %v231_v41, %v179_v49  ;;  %v181_v52 = vpop.f32.mrb[3].mxu0  ;;  %v3815_v53 = vadd.f32 %v239_v42, %v222_v50  ;;  %v224_v54 = vpop.f32.mrb[3].mxu1 }
  0xe9   :  { %v3817_v55 = vadd.f32 %v235_v48, %v181_v52  ;;  %v3819_v56 = vadd.f32 %v243_v45, %v224_v54  ;;  %v250_v54 = vadd.f32 %v239_v42, %v218_v44 }
  0xea   :  { %4258 = vst [vmem:[#allocation11_spill] sm:$0xff] %v3813_v51  ;;  %4259 = vst [vmem:[#allocation12_spill] sm:$0xff] %v3815_v53 }
  0xeb   :  { %4260 = vst [vmem:[#allocation13_spill] sm:$0xff] %v3817_v55  ;;  %4261 = vst [vmem:[#allocation14_spill] sm:$0xff] %v3819_v56 }
  0xf5   :  { %v389_v62 = vpop.f32.mrb[4].mxu0  ;;  %v432_v63 = vpop.f32.mrb[4].mxu1 }
  0xf6   :  { %v3826_v0 = vadd.f32 %v445_v58, %v389_v62  ;;  %v391_v2 = vpop.f32.mrb[5].mxu0  ;;  %v3828_v3 = vadd.f32 %v453_v59, %v432_v63  ;;  %v434_v4 = vpop.f32.mrb[5].mxu1 }
  0xf7   :  { %v3830_v34 = vadd.f32 %v449_v60, %v391_v2  ;;  %v393_v35 = vpop.f32.mrb[6].mxu0  ;;  %v3832_v38 = vadd.f32 %v457_v61, %v434_v4  ;;  %v436_v49 = vpop.f32.mrb[6].mxu1 }
  0xf8   :  { %4262 = vst [vmem:[#allocation15_spill] sm:$0xff] %v3826_v0  ;;  %4263 = vst [vmem:[#allocation16_spill] sm:$0xff] %v3828_v3  ;;  %v395_v50 = vpop.f32.mrb[7].mxu0  ;;  %v438_v52 = vpop.f32.mrb[7].mxu1  ;;  %v466_v48 = vadd.f32 %v445_v58, %v393_v35 }
  0xf9   :  { %4264 = vst [vmem:[#allocation17_spill] sm:$0xff] %v3830_v34  ;;  %4265 = vst [vmem:[#allocation18_spill] sm:$0xff] %v3832_v38 }
 0x115   :  { %v729_v57 = vpop.f32.mrb[8].mxu0  ;;  %v770_v36 = vpop.f32.mrb[8].mxu1 }
 0x116   :  { %v777_v62 = vadd.f32 %v729_v57, %v248_v37  ;;  %v779_v0 = vadd.f32 %v770_v36, %v250_v54  ;;  %v731_v56 = vpop.f32.mrb[9].mxu0  ;;  %v772_v63 = vpop.f32.mrb[9].mxu1 }
 0x117   :  { %v778_v3 = vadd.f32 %v731_v56, %v249_v40  ;;  %v780_v55 = vadd.f32 %v772_v63, %v251_v39  ;;  %v733_v2 = vpop.f32.mrb[10].mxu0  ;;  %v774_v34 = vpop.f32.mrb[10].mxu1  ;;  %v468_v56 = vadd.f32 %v453_v59, %v436_v49 }
 0x118   :  { %v1027_v53 = vsub.f32 0.0, %v777_v62  ;;  %v734_v4 = vpop.f32.mrb[11].mxu0  ;;  %v775_v38 = vpop.f32.mrb[11].mxu1  ;;  %v1029_v41 = vsub.f32 0.0, %v779_v0 }
 0x119   :  { %v1028_v51 = vsub.f32 0.0, %v778_v3 }
 0x11a   :  { %v1030_v1 = vmul.f32 1.442695, %v1027_v53  ;;  %v1034_v42 = vmul.f32 1.442695, %v1029_v41 }
 0x11b   :  { %v1032_v33 = vmul.f32 1.442695, %v1028_v51  ;;  %v467_v51 = vadd.f32 %v449_v60, %v395_v50 }
 0x11c   :  { %3095 = vpow2.f32 %v1030_v1  ;;  %v469_v1 = vadd.f32 %v457_v61, %v438_v52 }
 0x11d   :  { %3097 = vpow2.f32 %v1032_v33 }
 0x11e   :  { %3099 = vtanh.f32 %v780_v55 }
 0x11f   :  { %3101 = vpow2.f32 %v1034_v42 }
 0x126   :  { %v3096_v43 = vpop.eup %3095 }
 0x127   :  { %v1036_v44 = vadd.f32 1.0, %v3096_v43  ;;  %v3098_v36 = vpop.eup %3097 }
 0x128   :  { %v1037_v40 = vadd.f32 1.0, %v3098_v36  ;;  %v3100_v45 = vpop.eup %3099 }
 0x129   :  { %3103 = vrcp.f32 %v1036_v44  ;;  %v3102_v46 = vpop.eup %3101 }
 0x12a   :  { %3105 = vrcp.f32 %v1037_v40  ;;  %v1038_v33 = vadd.f32 1.0, %v3102_v46 }
 0x12c   :  { %3107 = vrcp.f32 %v1038_v33  ;;  %v2994_v33 = vld [vmem:[%s4237_s4 + $0x140] ss:$8 sps:$4 sm:$0xff]  }
 0x133   :  { %v3104_v47 = vpop.eup %3103 }
 0x134   :  { %v1059_v3 = vmul.f32 %v3104_v47, %v3100_v45  ;;  %v3106_v53 = vpop.eup %3105 }
 0x135   :  { %v975_v0 = vpop.f32.mrb[12].mxu0  ;;  %v1016_v34 = vpop.f32.mrb[12].mxu1  ;;  %v1057_v38 = vmul.f32 0.0, %v3106_v53  ;;  %v2993_v53 = vld [vmem:[%s4237_s4 + $0x44] ss:$8 sps:$4 sm:$0xff]  }
 0x136   :  { %v1023_v37 = vadd.f32 %v975_v0, %v466_v48  ;;  %v1025_v55 = vadd.f32 %v1016_v34, %v468_v56  ;;  %v977_v54 = vpop.f32.mrb[13].mxu0  ;;  %v1018_v39 = vpop.f32.mrb[13].mxu1  ;;  %v2985_v56 = vld [vmem:[%s4237_s4 + $0x30] ss:$8 sps:$4 sm:$0xff]   ;;  %v2999_v0 = vld [vmem:[%s4237_s4 + $0x54] ss:$8 sps:$4 sm:$0xff]  }
 0x137   :  { %v1024_v57 = vadd.f32 %v977_v54, %v467_v51  ;;  %v1026_v62 = vadd.f32 %v1018_v39, %v469_v1  ;;  %v979_v63 = vpop.f32.mrb[14].mxu0  ;;  %v1020_v2 = vpop.f32.mrb[14].mxu1  ;;  %v3834_v4 = vadd.f32 %v1059_v3, %v1057_v38  ;;  %v2988_v3 = vld [vmem:[%s4237_s4 + $0x130] ss:$8 sps:$4 sm:$0xff]   ;;  %v2996_v51 = vld [vmem:[%s4237_s4 + $0x144] ss:$8 sps:$4 sm:$0xff]  }
 0x138   :  { %v1042_v58 = vsub.f32 0.0, %v1023_v37  ;;  %v980_v59 = vpop.f32.mrb[15].mxu0  ;;  %v1021_v35 = vpop.f32.mrb[15].mxu1  ;;  %v1044_v50 = vsub.f32 0.0, %v1025_v55  ;;  %v2991_v1 = vld [vmem:[%s4237_s4 + $0x40] ss:$8 sps:$4 sm:$0xff]  }
 0x139   :  { %v1043_v60 = vsub.f32 0.0, %v1024_v57  ;;  %3109 = vtanh.f32 %v3834_v4  ;;  %v3108_v52 = vpop.eup %3107  ;;  %v3002_v34 = vld [vmem:[%s4237_s4 + $0x154] ss:$8 sps:$4 sm:$0xff]   ;;  %v2997_v38 = vld [vmem:[%s4237_s4 + $0x50] ss:$8 sps:$4 sm:$0xff]  }
 0x13a   :  { %v1045_v61 = vmul.f32 1.442695, %v1042_v58  ;;  %v1049_v42 = vmul.f32 1.442695, %v1044_v50  ;;  %v3000_v37 = vld [vmem:[%s4237_s4 + $0x150] ss:$8 sps:$4 sm:$0xff]  }
 0x13b   :  { %v1047_v49 = vmul.f32 1.442695, %v1043_v60  ;;  %v3005_v55 = vld [vmem:[%s4237_s4 + $0x64] ss:$8 sps:$4 sm:$0xff]   ;;  %v3003_v39 = vld [vmem:[%s4237_s4 + $0x60] ss:$8 sps:$4 sm:$0xff]  }
 0x13c   :  { %3111 = vpow2.f32 %v1045_v61  ;;  %v3008_v54 = vld [vmem:[%s4237_s4 + $0x164] ss:$8 sps:$4 sm:$0xff]   ;;  %v3006_v57 = vld [vmem:[%s4237_s4 + $0x160] ss:$8 sps:$4 sm:$0xff]   ;;  %v3014_v63 = vld [vmem:[%s4237_s4 + $0x174] ss:$8 sps:$4 sm:$0xff]  }
 0x13d   :  { %3113 = vpow2.f32 %v1047_v49  ;;  %v3009_v2 = vld [vmem:[%s4237_s4 + $0x70] ss:$8 sps:$4 sm:$0xff]   ;;  %v3017_v59 = vld [vmem:[%s4237_s4 + $0x84] ss:$8 sps:$4 sm:$0xff]  }
 0x13e   :  { %3115 = vtanh.f32 %v1026_v62  ;;  %v3011_v62 = vld [vmem:[%s4237_s4 + $0x74] ss:$8 sps:$4 sm:$0xff]   ;;  %v3012_v58 = vld [vmem:[%s4237_s4 + $0x170] ss:$8 sps:$4 sm:$0xff]   ;;  %v3020_v35 = vld [vmem:[%s4237_s4 + $0x184] ss:$8 sps:$4 sm:$0xff]  }
 0x13f   :  { %3117 = vpow2.f32 %v1049_v42  ;;  %v4269_v49 = vld [vmem:[#allocation11_spill] sm:$0xff] }
 0x143   :  { %v3110_v41 = vpop.eup %3109 }
 0x144   :  { %v3837_v43 = vmul.f32 %v3110_v41, %v3108_v52  ;;  %v4270_v52 = vld [vmem:[#allocation12_spill] sm:$0xff] }
 0x146   :  { %v3112_v44 = vpop.eup %3111  ;;  %v1071_v40 = vpack.c.bf16 %v3837_v43, %v3837_v43 }
 0x147   :  { %v1051_v36 = vadd.f32 1.0, %v3112_v44  ;;  %v3114_v45 = vpop.eup %3113 }
 0x148   :  { %v1052_v46 = vadd.f32 1.0, %v3114_v45  ;;  %1105 = vmatmul.mubr.bf16.vlgmr.msra.gmra.mrb[16].mxu0 %v1071_v40  ;;  %1146 = vmatmul.mubr.bf16.vlgmr.msra.gmra.mrb[16].mxu1 %v1071_v40  ;;  %v4272_v45 = vld [vmem:[#allocation14_spill] sm:$0xff] }
 0x149   :  { %3119 = vrcp.f32 %v1051_v36  ;;  %1160 = vmatpush1.bf16.msra.mxu0 %v3583_v5  ;;  %1201 = vmatpush1.bf16.msra.mxu1 %v3588_v6  ;;  %v3116_v5 = vpop.eup %3115  ;;  %v4271_v36 = vld [vmem:[#allocation13_spill] sm:$0xff] }
 0x14a   :  { %3121 = vrcp.f32 %v1052_v46  ;;  %1161 = vmatprep.subr.bf16.mxu0 %v3595_v7  ;;  %1202 = vmatprep.subr.bf16.mxu1 %v3600_v8  ;;  %v3118_v47 = vpop.eup %3117 }
 0x14b   :  { %1191 = vmatprep.mubr.bf16.mxu0 %v4255_v30  ;;  %1232 = vmatprep.mubr.bf16.mxu1 %v4255_v30 }
 0x14d   :  { %1162 = vmatpush1.bf16.msra.mxu0 %v3609_v9  ;;  %1203 = vmatpush1.bf16.msra.mxu1 %v3614_v10  ;;  %v1053_v9 = vadd.f32 1.0, %v3118_v47 }
 0x14e   :  { %1163 = vmatprep.subr.bf16.mxu0 %v3621_v11  ;;  %1204 = vmatprep.subr.bf16.mxu1 %v3626_v12  ;;  %v4266_v11 = vld [vmem:[#allocation6_spill] sm:$0xff] }
 0x14f   :  { %3123 = vrcp.f32 %v1053_v9 }
 0x151   :  { %1164 = vmatpush1.bf16.msra.mxu0 %v3635_v13  ;;  %1205 = vmatpush1.bf16.msra.mxu1 %v3640_v14 }
 0x152   :  { %1165 = vmatprep.subr.bf16.mxu0 %v3647_v15  ;;  %1206 = vmatprep.subr.bf16.mxu1 %v3652_v16  ;;  %v4267_v15 = vld [vmem:[#allocation7_spill] sm:$0xff]  ;;  %v4268_v16 = vld [vmem:[#allocation8_spill] sm:$0xff] }
 0x153   :  { %v3120_v6 = vpop.eup %3119 }
 0x154   :  { %v1063_v7 = vmul.f32 %v3120_v6, %v3116_v5  ;;  %v3122_v8 = vpop.eup %3121 }
 0x155   :  { %v1061_v48 = vmul.f32 0.0, %v3122_v8  ;;  %1166 = vmatpush1.bf16.msra.mxu0 %v3659_v17  ;;  %1207 = vmatpush1.bf16.msra.mxu1 %v3664_v18  ;;  %v2969_v18 = vld [vmem:[%s4237_s4 + $0x4] ss:$8 sps:$4 sm:$0xff]  }
 0x156   :  { %1167 = vmatprep.subr.bf16.mxu0 %v3671_v19  ;;  %1208 = vmatprep.subr.bf16.mxu1 %v3676_v20  ;;  %v2967_v19 = vld [vmem:[%s4237_s4] ss:$8 sps:$4 sm:$0xff]  }
 0x157   :  { %v3859_v10 = vadd.f32 %v1063_v7, %v1061_v48  ;;  %v2970_v20 = vld [vmem:[%s4237_s4 + $0x100] ss:$8 sps:$4 sm:$0xff]  }
 0x159   :  { %3125 = vtanh.f32 %v3859_v10  ;;  %1168 = vmatpush1.bf16.msra.mxu0 %v3683_v21  ;;  %1209 = vmatpush1.bf16.msra.mxu1 %v3688_v22  ;;  %v3124_v12 = vpop.eup %3123  ;;  %v2972_v21 = vld [vmem:[%s4237_s4 + $0x104] ss:$8 sps:$4 sm:$0xff]   ;;  %v2975_v22 = vld [vmem:[%s4237_s4 + $0x14] ss:$8 sps:$4 sm:$0xff]  }
 0x15a   :  { %1169 = vmatprep.subr.bf16.mxu0 %v3695_v23  ;;  %1210 = vmatprep.subr.bf16.mxu1 %v3700_v24  ;;  %v2978_v23 = vld [vmem:[%s4237_s4 + $0x114] ss:$8 sps:$4 sm:$0xff]   ;;  %v2973_v24 = vld [vmem:[%s4237_s4 + $0x10] ss:$8 sps:$4 sm:$0xff]  }
 0x15d   :  { %1170 = vmatpush1.bf16.msra.mxu0 %v3707_v25  ;;  %1211 = vmatpush1.bf16.msra.mxu1 %v3712_v26  ;;  %v2976_v25 = vld [vmem:[%s4237_s4 + $0x110] ss:$8 sps:$4 sm:$0xff]   ;;  %v2981_v26 = vld [vmem:[%s4237_s4 + $0x24] ss:$8 sps:$4 sm:$0xff]  }
 0x15e   :  { %1171 = vmatprep.subr.bf16.mxu0 %v3719_v27  ;;  %1212 = vmatprep.subr.bf16.mxu1 %v3724_v28  ;;  %v2984_v27 = vld [vmem:[%s4237_s4 + $0x124] ss:$8 sps:$4 sm:$0xff]   ;;  %v2979_v28 = vld [vmem:[%s4237_s4 + $0x20] ss:$8 sps:$4 sm:$0xff]  }
 0x161   :  { %1172 = vmatpush1.bf16.msra.mxu0 %v3731_v29  ;;  %1213 = vmatpush1.bf16.msra.mxu1 %v4266_v11  ;;  %v2982_v29 = vld [vmem:[%s4237_s4 + $0x120] ss:$8 sps:$4 sm:$0xff]  }
 0x162   :  { %1173 = vmatprep.subr.bf16.mxu0 %v3743_v31  ;;  %1214 = vmatprep.subr.bf16.mxu1 %v3748_v32  ;;  %v2987_v31 = vld [vmem:[%s4237_s4 + $0x34] ss:$8 sps:$4 sm:$0xff]  }
 0x163   :  { %v3126_v13 = vpop.eup %3125  ;;  %v2990_v32 = vld [vmem:[%s4237_s4 + $0x134] ss:$8 sps:$4 sm:$0xff]  }
 0x164   :  { %v3874_v14 = vmul.f32 %v3126_v13, %v3124_v12 }
 0x165   :  { %1174 = vmatpush1.bf16.msra.mxu0 %v4267_v15  ;;  %1215 = vmatpush1.bf16.msra.mxu1 %v4268_v16 }
 0x166   :  { %v1158_v17 = vpack.c.bf16 %v3874_v14, %v3874_v14  ;;  %1392 = vmatprep.subr.bf16.mxu0 %v2969_v18  ;;  %1692 = vmatprep.subr.bf16.mxu1 %v2972_v21 }
 0x168   :  { %1192 = vmatmul.mubr.bf16.vlgmr.msra.gmra.mrb[20].mxu0 %v1158_v17  ;;  %1233 = vmatmul.mubr.bf16.vlgmr.msra.gmra.mrb[20].mxu1 %v1158_v17 }
 0x169   :  { %1424 = vmatprep.mubr.bf16.mxu0 %v4255_v30  ;;  %1724 = vmatprep.mubr.bf16.mxu1 %v4255_v30 }
 0x16a   :  { %1393 = vmatpush1.bf16.msra.mxu0 %v2967_v19  ;;  %1693 = vmatpush1.bf16.msra.mxu1 %v2970_v20 }
 0x16b   :  { %1394 = vmatprep.subr.bf16.mxu0 %v2975_v22  ;;  %1694 = vmatprep.subr.bf16.mxu1 %v2978_v23 }
 0x16e   :  { %1395 = vmatpush1.bf16.msra.mxu0 %v2973_v24  ;;  %1695 = vmatpush1.bf16.msra.mxu1 %v2976_v25 }
 0x16f   :  { %1396 = vmatprep.subr.bf16.mxu0 %v2981_v26  ;;  %1696 = vmatprep.subr.bf16.mxu1 %v2984_v27 }
 0x172   :  { %1397 = vmatpush1.bf16.msra.mxu0 %v2979_v28  ;;  %1697 = vmatpush1.bf16.msra.mxu1 %v2982_v29  ;;  %v4273_v28 = vld [vmem:[#allocation15_spill] sm:$0xff] }
 0x173   :  { %1398 = vmatprep.subr.bf16.mxu0 %v2987_v31  ;;  %1698 = vmatprep.subr.bf16.mxu1 %v2990_v32  ;;  %v4274_v31 = vld [vmem:[#allocation16_spill] sm:$0xff] }
 0x176   :  { %1399 = vmatpush1.bf16.msra.mxu0 %v2985_v56  ;;  %1699 = vmatpush1.bf16.msra.mxu1 %v2988_v3 }
 0x177   :  { %1400 = vmatprep.subr.bf16.mxu0 %v2993_v53  ;;  %1700 = vmatprep.subr.bf16.mxu1 %v2996_v51  ;;  %v4275_v53 = vld [vmem:[#allocation17_spill] sm:$0xff] }
 0x17a   :  { %1401 = vmatpush1.bf16.msra.mxu0 %v2991_v1  ;;  %1701 = vmatpush1.bf16.msra.mxu1 %v2994_v33  ;;  %v4276_v1 = vld [vmem:[#allocation18_spill] sm:$0xff] }
 0x17b   :  { %1402 = vmatprep.subr.bf16.mxu0 %v2999_v0  ;;  %1702 = vmatprep.subr.bf16.mxu1 %v3002_v34 }
 0x17e   :  { %1403 = vmatpush1.bf16.msra.mxu0 %v2997_v38  ;;  %1703 = vmatpush1.bf16.msra.mxu1 %v3000_v37 }
 0x17f   :  { %1404 = vmatprep.subr.bf16.mxu0 %v3005_v55  ;;  %1704 = vmatprep.subr.bf16.mxu1 %v3008_v54 }
 0x182   :  { %1405 = vmatpush1.bf16.msra.mxu0 %v3003_v39  ;;  %1705 = vmatpush1.bf16.msra.mxu1 %v3006_v57 }
 0x183   :  { %1406 = vmatprep.subr.bf16.mxu0 %v3011_v62  ;;  %1706 = vmatprep.subr.bf16.mxu1 %v3014_v63 }
 0x186   :  { %1407 = vmatpush1.bf16.msra.mxu0 %v3009_v2  ;;  %1707 = vmatpush1.bf16.msra.mxu1 %v3012_v58 }
 0x187   :  { %1546 = vmatprep.subr.bf16.mxu0 %v3017_v59  ;;  %1846 = vmatprep.subr.bf16.mxu1 %v3020_v35 }
 0x21b   :  { %v1106_v60 = vpop.f32.mrb[16].mxu0  ;;  %v1147_v61 = vpop.f32.mrb[16].mxu1 }
 0x21c   :  { %v1154_v50 = vadd.f32 %v1106_v60, %v4269_v49  ;;  %v1156_v41 = vadd.f32 %v1147_v61, %v4270_v52  ;;  %v1108_v42 = vpop.f32.mrb[17].mxu0  ;;  %v1149_v44 = vpop.f32.mrb[17].mxu1  ;;  %v3015_v60 = vld [vmem:[%s4237_s4 + $0x80] ss:$8 sps:$4 sm:$0xff]   ;;  %v3023_v52 = vld [vmem:[%s4237_s4 + $0x94] ss:$8 sps:$4 sm:$0xff]  }
 0x21d   :  { %v1155_v40 = vadd.f32 %v1108_v42, %v4271_v36  ;;  %v1157_v46 = vadd.f32 %v1149_v44, %v4272_v45  ;;  %v1110_v5 = vpop.f32.mrb[18].mxu0  ;;  %v1151_v47 = vpop.f32.mrb[18].mxu1  ;;  %v3018_v61 = vld [vmem:[%s4237_s4 + $0x180] ss:$8 sps:$4 sm:$0xff]   ;;  %v3024_v36 = vld [vmem:[%s4237_s4 + $0x190] ss:$8 sps:$4 sm:$0xff]  }
 0x21e   :  { %v1245_v6 = vsub.f32 0.0, %v1154_v50  ;;  %v1111_v7 = vpop.f32.mrb[19].mxu0  ;;  %v1152_v8 = vpop.f32.mrb[19].mxu1  ;;  %v1247_v12 = vsub.f32 0.0, %v1156_v41  ;;  %v3026_v41 = vld [vmem:[%s4237_s4 + $0x194] ss:$8 sps:$4 sm:$0xff]  }
 0x21f   :  { %v1246_v9 = vsub.f32 0.0, %v1155_v40  ;;  %v3029_v40 = vld [vmem:[%s4237_s4 + $0xa4] ss:$8 sps:$4 sm:$0xff]   ;;  %v3030_v5 = vld [vmem:[%s4237_s4 + $0x1a0] ss:$8 sps:$4 sm:$0xff]  }
 0x220   :  { %v1248_v48 = vmul.f32 1.442695, %v1245_v6  ;;  %v1252_v13 = vmul.f32 1.442695, %v1247_v12  ;;  %v3032_v45 = vld [vmem:[%s4237_s4 + $0x1a4] ss:$8 sps:$4 sm:$0xff]  }
 0x221   :  { %v1250_v11 = vmul.f32 1.442695, %v1246_v9  ;;  %v3035_v47 = vld [vmem:[%s4237_s4 + $0xb4] ss:$8 sps:$4 sm:$0xff]   ;;  %v3033_v9 = vld [vmem:[%s4237_s4 + $0xb0] ss:$8 sps:$4 sm:$0xff]  }
 0x222   :  { %3127 = vpow2.f32 %v1248_v48  ;;  %v3038_v6 = vld [vmem:[%s4237_s4 + $0x1b4] ss:$8 sps:$4 sm:$0xff]   ;;  %v3036_v48 = vld [vmem:[%s4237_s4 + $0x1b0] ss:$8 sps:$4 sm:$0xff]   ;;  %v3041_v12 = vld [vmem:[%s4237_s4 + $0xc4] ss:$8 sps:$4 sm:$0xff]  }
 0x223   :  { %3129 = vpow2.f32 %v1250_v11 }
 0x224   :  { %3131 = vtanh.f32 %v1157_v46  ;;  %v3027_v46 = vld [vmem:[%s4237_s4 + $0xa0] ss:$8 sps:$4 sm:$0xff]  }
 0x225   :  { %3133 = vpow2.f32 %v1252_v13  ;;  %v3044_v13 = vld [vmem:[%s4237_s4 + $0x1c4] ss:$8 sps:$4 sm:$0xff]  }
 0x22c   :  { %v3128_v15 = vpop.eup %3127 }
 0x22d   :  { %v1254_v16 = vadd.f32 1.0, %v3128_v15  ;;  %v3130_v17 = vpop.eup %3129 }
 0x22e   :  { %v1255_v18 = vadd.f32 1.0, %v3130_v17  ;;  %v3132_v19 = vpop.eup %3131 }
 0x22f   :  { %3135 = vrcp.f32 %v1254_v16  ;;  %v3134_v20 = vpop.eup %3133 }
 0x230   :  { %3137 = vrcp.f32 %v1255_v18  ;;  %v1256_v24 = vadd.f32 1.0, %v3134_v20  ;;  %v3042_v20 = vld [vmem:[%s4237_s4 + $0x1c0] ss:$8 sps:$4 sm:$0xff]  }
 0x232   :  { %3139 = vrcp.f32 %v1256_v24  ;;  %v3048_v24 = vld [vmem:[%s4237_s4 + $0x1d0] ss:$8 sps:$4 sm:$0xff]  }
 0x239   :  { %v3136_v21 = vpop.eup %3135 }
 0x23a   :  { %v1277_v22 = vmul.f32 %v3136_v21, %v3132_v19  ;;  %v3138_v23 = vpop.eup %3137  ;;  %v3039_v19 = vld [vmem:[%s4237_s4 + $0xc0] ss:$8 sps:$4 sm:$0xff]   ;;  %v3047_v21 = vld [vmem:[%s4237_s4 + $0xd4] ss:$8 sps:$4 sm:$0xff]  }
 0x23b   :  { %v1193_v25 = vpop.f32.mrb[20].mxu0  ;;  %v1234_v26 = vpop.f32.mrb[20].mxu1  ;;  %v1275_v27 = vmul.f32 %v3138_v23, %v3834_v4  ;;  %v3045_v23 = vld [vmem:[%s4237_s4 + $0xd0] ss:$8 sps:$4 sm:$0xff]  }
 0x23c   :  { %v1241_v29 = vadd.f32 %v1193_v25, %v4273_v28  ;;  %v1243_v32 = vadd.f32 %v1234_v26, %v4274_v31  ;;  %v1195_v56 = vpop.f32.mrb[21].mxu0  ;;  %v1236_v3 = vpop.f32.mrb[21].mxu1  ;;  %v3053_v25 = vld [vmem:[%s4237_s4 + $0xe4] ss:$8 sps:$4 sm:$0xff]   ;;  %v3054_v28 = vld [vmem:[%s4237_s4 + $0x1e0] ss:$8 sps:$4 sm:$0xff]  }
 0x23d   :  { %v1242_v51 = vadd.f32 %v1195_v56, %v4275_v53  ;;  %v1244_v33 = vadd.f32 %v1236_v3, %v4276_v1  ;;  %v1197_v0 = vpop.f32.mrb[22].mxu0  ;;  %v1238_v34 = vpop.f32.mrb[22].mxu1  ;;  %v1278_v38 = vadd.f32 %v1277_v22, %v1275_v27  ;;  %v3056_v26 = vld [vmem:[%s4237_s4 + $0x1e4] ss:$8 sps:$4 sm:$0xff]   ;;  %v3051_v27 = vld [vmem:[%s4237_s4 + $0xe0] ss:$8 sps:$4 sm:$0xff]  }
 0x23e   :  { %v1260_v37 = vsub.f32 0.0, %v1241_v29  ;;  %v1198_v55 = vpop.f32.mrb[23].mxu0  ;;  %v1239_v54 = vpop.f32.mrb[23].mxu1  ;;  %v1262_v62 = vsub.f32 0.0, %v1243_v32  ;;  %v3059_v29 = vld [vmem:[%s4237_s4 + $0xf4] ss:$8 sps:$4 sm:$0xff]  }
 0x23f   :  { %v1261_v39 = vsub.f32 0.0, %v1242_v51  ;;  %3141 = vtanh.f32 %v1278_v38  ;;  %v3140_v63 = vpop.eup %3139  ;;  %v3062_v31 = vld [vmem:[%s4237_s4 + $0x1f4] ss:$8 sps:$4 sm:$0xff]   ;;  %v3057_v32 = vld [vmem:[%s4237_s4 + $0xf0] ss:$8 sps:$4 sm:$0xff]  }
 0x240   :  { %v1263_v4 = vmul.f32 1.442695, %v1260_v37  ;;  %v1267_v58 = vmul.f32 1.442695, %v1262_v62  ;;  %v3060_v56 = vld [vmem:[%s4237_s4 + $0x1f0] ss:$8 sps:$4 sm:$0xff]  }
 0x241   :  { %v1265_v57 = vmul.f32 1.442695, %v1261_v39  ;;  %v3065_v53 = vld [vmem:[%s4238_s5 + $0x4] ss:$8 sps:$4 sm:$0xff]   ;;  %v3063_v0 = vld [vmem:[%s4238_s5] ss:$8 sps:$4 sm:$0xff]  }
 0x242   :  { %3143 = vpow2.f32 %v1263_v4  ;;  %v3068_v51 = vld [vmem:[%s4238_s5 + $0x44] ss:$8 sps:$4 sm:$0xff]   ;;  %v3066_v34 = vld [vmem:[%s4238_s5 + $0x40] ss:$8 sps:$4 sm:$0xff]   ;;  %v3071_v37 = vld [vmem:[%s4238_s5 + $0x14] ss:$8 sps:$4 sm:$0xff]  }
 0x243   :  { %3145 = vpow2.f32 %v1265_v57  ;;  %v3074_v55 = vld [vmem:[%s4238_s5 + $0x54] ss:$8 sps:$4 sm:$0xff]   ;;  %v3069_v54 = vld [vmem:[%s4238_s5 + $0x10] ss:$8 sps:$4 sm:$0xff]   ;;  %v3077_v39 = vld [vmem:[%s4238_s5 + $0x24] ss:$8 sps:$4 sm:$0xff]  }
 0x244   :  { %3147 = vtanh.f32 %v1244_v33  ;;  %v3080_v4 = vld [vmem:[%s4238_s5 + $0x64] ss:$8 sps:$4 sm:$0xff]   ;;  %v3075_v57 = vld [vmem:[%s4238_s5 + $0x20] ss:$8 sps:$4 sm:$0xff]  }
 0x245   :  { %3149 = vpow2.f32 %v1267_v58  ;;  %v3078_v62 = vld [vmem:[%s4238_s5 + $0x60] ss:$8 sps:$4 sm:$0xff]   ;;  %v3081_v58 = vld [vmem:[%s4238_s5 + $0x30] ss:$8 sps:$4 sm:$0xff]  }
 0x249   :  { %v3142_v2 = vpop.eup %3141 }
 0x24a   :  { %v1284_v59 = vmul.f32 %v3142_v2, %v3140_v63  ;;  %v3083_v63 = vld [vmem:[%s4238_s5 + $0x34] ss:$8 sps:$4 sm:$0xff]  }
 0x24b   :  { %v3086_v2 = vld [vmem:[%s4238_s5 + $0x74] ss:$8 sps:$4 sm:$0xff]  }
 0x24c   :  { %v3144_v35 = vpop.eup %3143  ;;  %v1291_v50 = vpack.c.bf16 %v1284_v59, %v3837_v43  ;;  %v3021_v43 = vld [vmem:[%s4237_s4 + $0x90] ss:$8 sps:$4 sm:$0xff]  }
 0x24d   :  { %v1269_v49 = vadd.f32 1.0, %v3144_v35  ;;  %v3146_v42 = vpop.eup %3145  ;;  %v3084_v59 = vld [vmem:[%s4238_s5 + $0x70] ss:$8 sps:$4 sm:$0xff]   ;;  %v2666_v35 = vld [vmem:[%s4239_s6 + $0x2] sm:$0x3] }
 0x24e   :  { %v1270_v44 = vadd.f32 1.0, %v3146_v42  ;;  %1425 = vmatmul.mubr.bf16.vlgmr.msra.gmra.mrb[24].mxu0 %v1291_v50  ;;  %1725 = vmatmul.mubr.bf16.vlgmr.msra.gmra.mrb[24].mxu1 %v1291_v50  ;;  %v3148_v7 = vpop.eup %3147 }
 0x24f   :  { %3151 = vrcp.f32 %v1269_v49  ;;  %1547 = vmatpush1.bf16.msra.mxu0 %v3015_v60  ;;  %1847 = vmatpush1.bf16.msra.mxu1 %v3018_v61  ;;  %v3150_v8 = vpop.eup %3149  ;;  %v4277_v60 = vld [vmem:[#allocation9_spill] sm:$0xff]  ;;  %v4278_v49 = vld [vmem:[#allocation10_spill] sm:$0xff] }
 0x250   :  { %3153 = vrcp.f32 %v1270_v44  ;;  %1548 = vmatprep.subr.bf16.mxu0 %v3023_v52  ;;  %1848 = vmatprep.subr.bf16.mxu1 %v3026_v41  ;;  %v1271_v17 = vadd.f32 1.0, %v3150_v8  ;;  %v1739_v61 = vrot.slane %v2666_v35, %v4277_v60  ;;  %v1743_v50 = vrot.slane %v2666_v35, %v4278_v49 }
 0x251   :  { %1578 = vmatprep.mubr.bf16.mxu0 %v4255_v30  ;;  %1878 = vmatprep.mubr.bf16.mxu1 %v4255_v30 }
 0x252   :  { %3155 = vrcp.f32 %v1271_v17 }
 0x253   :  { %1549 = vmatpush1.bf16.msra.mxu0 %v3021_v43  ;;  %1849 = vmatpush1.bf16.msra.mxu1 %v3024_v36 }
 0x254   :  { %1550 = vmatprep.subr.bf16.mxu0 %v3029_v40  ;;  %1850 = vmatprep.subr.bf16.mxu1 %v3032_v45 }
 0x257   :  { %1551 = vmatpush1.bf16.msra.mxu0 %v3027_v46  ;;  %1851 = vmatpush1.bf16.msra.mxu1 %v3030_v5 }
 0x258   :  { %1552 = vmatprep.subr.bf16.mxu0 %v3035_v47  ;;  %1852 = vmatprep.subr.bf16.mxu1 %v3038_v6 }
 0x259   :  { %v3152_v11 = vpop.eup %3151 }
 0x25a   :  { %v1281_v15 = vmul.f32 %v3152_v11, %v3148_v7  ;;  %v3154_v16 = vpop.eup %3153 }
 0x25b   :  { %v1279_v18 = vmul.f32 %v3154_v16, %v3859_v10  ;;  %1553 = vmatpush1.bf16.msra.mxu0 %v3033_v9  ;;  %1853 = vmatpush1.bf16.msra.mxu1 %v3036_v48  ;;  %v3050_v10 = vld [vmem:[%s4237_s4 + $0x1d4] ss:$8 sps:$4 sm:$0xff]  }
 0x25c   :  { %1554 = vmatprep.subr.bf16.mxu0 %v3041_v12  ;;  %1854 = vmatprep.subr.bf16.mxu1 %v3044_v13  ;;  %v3156_v3 = vpop.eup %3155 }
 0x25d   :  { %v1282_v22 = vadd.f32 %v1281_v15, %v1279_v18 }
 0x25f   :  { %3157 = vtanh.f32 %v1282_v22  ;;  %1555 = vmatpush1.bf16.msra.mxu0 %v3039_v19  ;;  %1855 = vmatpush1.bf16.msra.mxu1 %v3042_v20 }
 0x260   :  { %1556 = vmatprep.subr.bf16.mxu0 %v3047_v21  ;;  %1856 = vmatprep.subr.bf16.mxu1 %v3050_v10 }
 0x263   :  { %1557 = vmatpush1.bf16.msra.mxu0 %v3045_v23  ;;  %1857 = vmatpush1.bf16.msra.mxu1 %v3048_v24 }
 0x264   :  { %1558 = vmatprep.subr.bf16.mxu0 %v3053_v25  ;;  %1858 = vmatprep.subr.bf16.mxu1 %v3056_v26 }
 0x267   :  { %1559 = vmatpush1.bf16.msra.mxu0 %v3051_v27  ;;  %1859 = vmatpush1.bf16.msra.mxu1 %v3054_v28 }
 0x268   :  { %1560 = vmatprep.subr.bf16.mxu0 %v3059_v29  ;;  %1860 = vmatprep.subr.bf16.mxu1 %v3062_v31 }
 0x269   :  { %v3158_v1 = vpop.eup %3157 }
 0x26a   :  { %v1286_v33 = vmul.f32 %v3158_v1, %v3156_v3 }
 0x26b   :  { %1561 = vmatpush1.bf16.msra.mxu0 %v3057_v32  ;;  %1861 = vmatpush1.bf16.msra.mxu1 %v3060_v56 }
 0x26c   :  { %1953 = vmatprep.subr.bf16.mxu0 %v3065_v53  ;;  %2036 = vmatprep.subr.bf16.mxu1 %v3068_v51  ;;  %v1294_v38 = vpack.c.bf16 %v3874_v14, %v1286_v33  ;;  %v3072_v14 = vld [vmem:[%s4238_s5 + $0x50] ss:$8 sps:$4 sm:$0xff]  }
 0x26e   :  { %1579 = vmatmul.mubr.bf16.vlgmr.msra.gmra.mrb[24].mxu0 %v1294_v38  ;;  %1879 = vmatmul.mubr.bf16.vlgmr.msra.gmra.mrb[24].mxu1 %v1294_v38 }
 0x26f   :  { %1954 = vmatpush1.bf16.msra.mxu0 %v3063_v0  ;;  %2037 = vmatpush1.bf16.msra.mxu1 %v3066_v34 }
 0x270   :  { %1955 = vmatprep.subr.bf16.mxu0 %v3071_v37  ;;  %2038 = vmatprep.subr.bf16.mxu1 %v3074_v55 }
 0x271   :  { %1985 = vmatprep.mubr.bf16.mxu0 %v4255_v30  ;;  %2068 = vmatprep.mubr.bf16.mxu1 %v4255_v30 }
 0x273   :  { %1956 = vmatpush1.bf16.msra.mxu0 %v3069_v54  ;;  %2039 = vmatpush1.bf16.msra.mxu1 %v3072_v14 }
 0x274   :  { %1957 = vmatprep.subr.bf16.mxu0 %v3077_v39  ;;  %2040 = vmatprep.subr.bf16.mxu1 %v3080_v4 }
 0x277   :  { %1958 = vmatpush1.bf16.msra.mxu0 %v3075_v57  ;;  %2041 = vmatpush1.bf16.msra.mxu1 %v3078_v62 }
 0x278   :  { %1959 = vmatprep.subr.bf16.mxu0 %v3083_v63  ;;  %2042 = vmatprep.subr.bf16.mxu1 %v3086_v2 }
 0x27b   :  { %1960 = vmatpush1.bf16.msra.mxu0 %v3081_v58  ;;  %2043 = vmatpush1.bf16.msra.mxu1 %v3084_v59 }
 0x27c   :  { %2141 = vmatprep.subr.bf16.mxu0 %v3065_v53  ;;  %2188 = vmatprep.subr.bf16.mxu1 %v3068_v51 }
 0x27e   :  { %1986 = vmatmul.mubr.bf16.vlgmr.msra.gmra.mrb[28].mxu0 %v4255_v30  ;;  %2069 = vmatmul.mubr.bf16.vlgmr.msra.gmra.mrb[28].mxu1 %v4255_v30 }
 0x27f   :  { %2142 = vmatpush1.bf16.msra.mxu0 %v3063_v0  ;;  %2189 = vmatpush1.bf16.msra.mxu1 %v3066_v34 }
 0x280   :  { %2143 = vmatprep.subr.bf16.mxu0 %v3071_v37  ;;  %2190 = vmatprep.subr.bf16.mxu1 %v3074_v55 }
 0x281   :  { %2173 = vmatprep.mubr.bf16.mxu0 %v4255_v30  ;;  %2220 = vmatprep.mubr.bf16.mxu1 %v4255_v30  ;;  %v1295_v30 = vld [vmem:[%s4239_s6] sm:$0x3]  ;;  %s3216_s6 = smov 64  }
 0x282   :  { %v1439_v42 = vrot.slane %v1295_v30, %v4277_v60  ;;  %v1443_v40 = vrot.slane %v1295_v30, %v4278_v49 }
 0x283   :  { %2144 = vmatpush1.bf16.msra.mxu0 %v3069_v54  ;;  %2191 = vmatpush1.bf16.msra.mxu1 %v3072_v14 }
 0x284   :  { %2145 = vmatprep.subr.bf16.mxu0 %v3077_v39  ;;  %2192 = vmatprep.subr.bf16.mxu1 %v3080_v4 }
 0x287   :  { %2146 = vmatpush1.bf16.msra.mxu0 %v3075_v57  ;;  %2193 = vmatpush1.bf16.msra.mxu1 %v3078_v62 }
 0x288   :  { %2147 = vmatprep.subr.bf16.mxu0 %v3083_v63  ;;  %2194 = vmatprep.subr.bf16.mxu1 %v3086_v2 }
 0x28b   :  { %2148 = vmatpush1.bf16.msra.mxu0 %v3081_v58  ;;  %2195 = vmatpush1.bf16.msra.mxu1 %v3084_v59 }
 0x341   :  { %v1580_v52 = vpop.f32.mrb[24].mxu0  ;;  %v1880_v41 = vpop.f32.mrb[24].mxu1 }
 0x342   :  { %v4151_v44 = vadd.f32 %v1880_v41, %v1739_v61  ;;  %v1582_v43 = vpop.f32.mrb[25].mxu0  ;;  %v1882_v36 = vpop.f32.mrb[25].mxu1  ;;  %v2802_v48 = vadd.f32 %v1580_v52, %v1439_v42 }
 0x343   :  { %v4154_v45 = vadd.f32 %v1882_v36, %v1743_v50  ;;  %v1584_v46 = vpop.f32.mrb[26].mxu0  ;;  %v1884_v5 = vpop.f32.mrb[26].mxu1  ;;  %v2803_v11 = vadd.f32 %v1582_v43, %v1443_v40 }
 0x344   :  { %v4156_v47 = vadd.f32 %v1584_v46, %v1439_v42  ;;  %v2808_v6 = vadd.f32 %v1884_v5, %v1739_v61  ;;  %v1586_v7 = vpop.f32.mrb[27].mxu0  ;;  %v1886_v8 = vpop.f32.mrb[27].mxu1 }
 0x345   :  { %v4158_v9 = vadd.f32 %v1586_v7, %v1443_v40  ;;  %v2809_v12 = vadd.f32 %v1886_v8, %v1743_v50 }
 0x351   :  { %v1987_v13 = vpop.f32.mrb[28].mxu0  ;;  %v2070_v15 = vpop.f32.mrb[28].mxu1 }
 0x352   :  { %v1994_v16 = vadd.f32 %v2802_v48, %v1987_v13  ;;  %v2077_v17 = vadd.f32 %v2808_v6, %v2070_v15  ;;  %v1989_v18 = vpop.f32.mrb[29].mxu0  ;;  %v2072_v19 = vpop.f32.mrb[29].mxu1 }
 0x353   :  { %v1995_v20 = vadd.f32 %v2803_v11, %v1989_v18  ;;  %v2078_v21 = vadd.f32 %v2809_v12, %v2072_v19  ;;  %v1991_v10 = vpop.f32.mrb[30].mxu0  ;;  %v2074_v22 = vpop.f32.mrb[30].mxu1 }
 0x354   :  { %v1992_v23 = vpop.f32.mrb[31].mxu0  ;;  %v2075_v24 = vpop.f32.mrb[31].mxu1  ;;  %v2079_v27 = vsub.f32 0.0, %v1994_v16  ;;  %v2089_v29 = vsub.f32 0.0, %v2077_v17 }
 0x355   :  { %3159 = vtanh.f32 %v1995_v20  ;;  %v2080_v63 = vsub.f32 0.0, %v1995_v20  ;;  %v2090_v58 = vsub.f32 0.0, %v2078_v21 }
 0x356   :  { %3161 = vtanh.f32 %v2078_v21  ;;  %v2081_v28 = vmul.f32 1.442695, %v2079_v27  ;;  %v2091_v31 = vmul.f32 1.442695, %v2089_v29  ;;  %v3217_v29 = vmov 0.0  }
 0x357   :  { %v2083_v2 = vmul.f32 1.442695, %v2080_v63  ;;  %v2093_v59 = vmul.f32 1.442695, %v2090_v58  ;;  %2790 = vmatprep.subr.bf16.mxu1 %v3217_v29  ;;  %2778 = vmatprep.subr.bf16.mxu0 %v3217_v29 }
 0x358   :  { %3163 = vpow2.f32 %v2081_v28 }
 0x359   :  { %3165 = vpow2.f32 %v2091_v31  ;;  %v3087_v31 = vld [vmem:[%s4240_s7] sm:$0xff]  }
 0x35f   :  { %v3160_v25 = vpop.eup %3159 }
 0x360   :  { %2102 = vrot.lane.b32.xlu0 %v3160_v25, %s3216_s6  ;;  %v3162_v26 = vpop.eup %3161 }
 0x362   :  { %v3164_v32 = vpop.eup %3163 }
 0x363   :  { %v2085_v56 = vadd.f32 1.0, %v3164_v32  ;;  %v3166_v3 = vpop.eup %3165 }
 0x364   :  { %2114 = vrot.lane.b32.xlu0 %v3162_v26, %s3216_s6  ;;  %v2095_v53 = vadd.f32 1.0, %v3166_v3 }
 0x365   :  { %3167 = vrcp.f32 %v2085_v56 }
 0x366   :  { %3169 = vrcp.f32 %v2095_v53  ;;  %v3088_v53 = vld [vmem:[%s4240_s7 + $0x20] sm:$0xff]  }
 0x36f   :  { %v3168_v51 = vpop.eup %3167 }
 0x370   :  { %v3170_v0 = vpop.eup %3169  ;;  %v2099_v37 = vmul.f32 0.0, %v3168_v51 }
 0x371   :  { %v2111_v14 = vmul.f32 0.0, %v3170_v0 }
 0x3d2   :  { %v2103_v1 = vpop.permute.xlu0 %2102 }
 0x3d3   :  { %v2105_v33 = vmul.f32 %v3168_v51, %v2103_v1  ;;  %v3089_v51 = vld [vmem:[%s4240_s7 + $0x8] sm:$0xff]  }
 0x3d5   :  { %2107 = vrot.lane.b32.xlu1 %v2105_v33, %s3216_s6 }
 0x3d6   :  { %v2115_v34 = vpop.permute.xlu0 %2114 }
 0x3d7   :  { %v2117_v38 = vmul.f32 %v3170_v0, %v2115_v34  ;;  %v3090_v34 = vld [vmem:[%s4240_s7 + $0x28] sm:$0xff]  }
 0x3d9   :  { %2119 = vrot.lane.b32.xlu1 %v2117_v38, %s3216_s6  ;;  %v3091_v38 = vld [vmem:[%s4240_s7 + $0x10] sm:$0xff]  }
 0x447   :  { %v2108_v55 = vpop.permute.xlu1 %2107 }
 0x448   :  { %v4164_v54 = vadd.f32 %v2108_v55, %v2099_v37  ;;  %v3092_v37 = vld [vmem:[%s4240_s7 + $0x30] sm:$0xff]   ;;  %v3093_v55 = vld [vmem:[%s4240_s7 + $0x18] sm:$0xff]  }
 0x44a   :  { %3171 = vtanh.f32 %v4164_v54 }
 0x44b   :  { %v2120_v39 = vpop.permute.xlu1 %2119 }
 0x44c   :  { %v4167_v4 = vadd.f32 %v2120_v39, %v2111_v14  ;;  %v3094_v14 = vld [vmem:[%s4240_s7 + $0x38] sm:$0xff]  }
 0x44e   :  { %3173 = vtanh.f32 %v4167_v4 }
 0x44f   :  { %3175 = vpow2.f32 %v2083_v2 }
 0x450   :  { %3177 = vpow2.f32 %v2093_v59 }
 0x454   :  { %v3172_v57 = vpop.eup %3171 }
 0x455   :  { %2125 = vrot.lane.b32.xlu0 %v3172_v57, %s3216_s6 }
 0x458   :  { %v3174_v62 = vpop.eup %3173 }
 0x459   :  { %2131 = vrot.lane.b32.xlu1 %v3174_v62, %s3216_s6  ;;  %v3176_v35 = vpop.eup %3175 }
 0x45a   :  { %v2086_v60 = vadd.f32 1.0, %v3176_v35  ;;  %v3178_v61 = vpop.eup %3177 }
 0x45b   :  { %v2096_v30 = vadd.f32 1.0, %v3178_v61 }
 0x45c   :  { %3179 = vrcp.f32 %v2086_v60 }
 0x45d   :  { %3181 = vrcp.f32 %v2096_v30 }
 0x466   :  { %v3180_v49 = vpop.eup %3179 }
 0x467   :  { %v3182_v42 = vpop.eup %3181 }
 0x4c7   :  { %v2126_v50 = vpop.permute.xlu0 %2125 }
 0x4c8   :  { %v2128_v52 = vmul.f32 %v3180_v49, %v2126_v50 }
 0x4ca   :  { %2135 = vst.msk [vmem:[#allocation4] sm:$0xff] %vm137_vm0, %v2128_v52  ;;  %v2137_v41 = vpack.c.bf16 %v2128_v52, %v2128_v52 }
 0x4cb   :  { %v2132_v43 = vpop.permute.xlu1 %2131 }
 0x4cc   :  { %v2134_v36 = vmul.f32 %v3182_v42, %v2132_v43  ;;  %2755 = vmatmul.mubr.msk.bf16.vlgmr.msra.gmra.mrb[32].mxu0 %vm137_vm0, %v2137_v41 }
 0x4cd   :  { %2779 = vmatpush3.bf16.msra.mxu0 %v3088_v53  ;;  %2786 = vmatprep.mubr.msk.bf16.mxu0 %vm3218_vm1, %v3217_v29 }
 0x4ce   :  { %2136 = vst.msk [vmem:[#allocation5 + $0x8] sm:$0xff] %vm137_vm0, %v2134_v36  ;;  %v2184_v40 = vpack.c.bf16 %v2134_v36, %v2134_v36  ;;  %2780 = vmatprep.subr.bf16.mxu0 %v3217_v29 }
 0x4d0   :  { %2756 = vmatmul.mubr.msk.bf16.vlgmr.msra.gmra.mrb[32].mxu1 %vm137_vm0, %v2184_v40 }
 0x4d1   :  { %2791 = vmatpush3.bf16.msra.mxu1 %v3087_v31  ;;  %2781 = vmatpush3.bf16.msra.mxu0 %v3090_v34  ;;  %v2289_v41 = vld [vmem:[#allocation4] sm:$0xff] }
 0x4d2   :  { %2792 = vmatprep.subr.bf16.mxu1 %v3217_v29  ;;  %2782 = vmatprep.subr.bf16.mxu0 %v3217_v29 }
 0x4d3   :  { %2798 = vmatprep.mubr.msk.bf16.mxu1 %vm3218_vm1, %v3217_v29 }
 0x4d5   :  { %2793 = vmatpush3.bf16.msra.mxu1 %v3089_v51  ;;  %2783 = vmatpush3.bf16.msra.mxu0 %v3092_v37  ;;  %v2293_v40 = vld [vmem:[#allocation5 + $0x8] sm:$0xff] }
 0x4d6   :  { %2794 = vmatprep.subr.bf16.mxu1 %v3217_v29  ;;  %2784 = vmatprep.subr.bf16.mxu0 %v3217_v29 }
 0x4d9   :  { %2795 = vmatpush3.bf16.msra.mxu1 %v3091_v38  ;;  %2785 = vmatpush3.bf16.msra.mxu0 %v3094_v14 }
 0x4da   :  { %2796 = vmatprep.subr.bf16.mxu1 %v3217_v29 }
 0x4dd   :  { %2797 = vmatpush3.bf16.msra.mxu1 %v3093_v55 }
 0x59f   :  { %v2175_v46 = vpop.f32.mrb[32].mxu0 }
 0x5a0   :  { %v2182_v5 = vadd.f32 %v4156_v47, %v2175_v46  ;;  %v2177_v6 = vpop.f32.mrb[33].mxu0 }
 0x5a1   :  { %v4178_v7 = vadd.f32 %v4158_v9, %v2177_v6  ;;  %v2179_v8 = vpop.f32.mrb[34].mxu0 }
 0x5a2   :  { %v2180_v48 = vpop.f32.mrb[35].mxu0  ;;  %v2231_v18 = vsub.f32 0.0, %v2182_v5 }
 0x5a3   :  { %3183 = vtanh.f32 %v4178_v7  ;;  %v2222_v11 = vpop.f32.mrb[32].mxu1 }
 0x5a4   :  { %v2229_v12 = vadd.f32 %v4151_v44, %v2222_v11  ;;  %v2224_v13 = vpop.f32.mrb[33].mxu1  ;;  %v2233_v19 = vmul.f32 1.442695, %v2231_v18  ;;  %v2767_v11 = vld [vmem:[%s4241_s8] ss:$0 sm:$0xff] }
 0x5a5   :  { %v4183_v15 = vadd.f32 %v4154_v45, %v2224_v13  ;;  %v2226_v16 = vpop.f32.mrb[34].mxu1 }
 0x5a6   :  { %v2227_v17 = vpop.f32.mrb[35].mxu1  ;;  %v2241_v20 = vsub.f32 0.0, %v2229_v12 }
 0x5a7   :  { %3185 = vtanh.f32 %v4183_v15  ;;  %v2242_v62 = vsub.f32 0.0, %v4183_v15 }
 0x5a8   :  { %3187 = vpow2.f32 %v2233_v19  ;;  %v2243_v21 = vmul.f32 1.442695, %v2241_v20 }
 0x5a9   :  { %v2245_v63 = vmul.f32 1.442695, %v2242_v62 }
 0x5aa   :  { %3189 = vpow2.f32 %v2243_v21 }
 0x5ad   :  { %v3184_v47 = vpop.eup %3183 }
 0x5ae   :  { %2254 = vrot.lane.b32.xlu0 %v3184_v47, %s3216_s6 }
 0x5b1   :  { %v3186_v9 = vpop.eup %3185 }
 0x5b2   :  { %2266 = vrot.lane.b32.xlu1 %v3186_v9, %s3216_s6  ;;  %v3188_v44 = vpop.eup %3187 }
 0x5b3   :  { %v2237_v10 = vadd.f32 1.0, %v3188_v44 }
 0x5b4   :  { %v3190_v45 = vpop.eup %3189 }
 0x5b5   :  { %3191 = vrcp.f32 %v2237_v10  ;;  %v2247_v22 = vadd.f32 1.0, %v3190_v45 }
 0x5b7   :  { %3193 = vrcp.f32 %v2247_v22 }
 0x5bf   :  { %v3192_v23 = vpop.eup %3191 }
 0x5c0   :  { %v2251_v32 = vmul.f32 %v3192_v23, %v4164_v54 }
 0x5c1   :  { %v3194_v26 = vpop.eup %3193 }
 0x5c2   :  { %v2263_v1 = vmul.f32 %v3194_v26, %v4167_v4  ;;  %v2232_v4 = vsub.f32 0.0, %v4178_v7 }
 0x5c4   :  { %v2235_v57 = vmul.f32 1.442695, %v2232_v4 }
 0x620   :  { %v2255_v24 = vpop.permute.xlu0 %2254 }
 0x621   :  { %v2257_v25 = vmul.f32 %v3192_v23, %v2255_v24 }
 0x623   :  { %2259 = vrot.lane.b32.xlu0 %v2257_v25, %s3216_s6 }
 0x624   :  { %v2267_v27 = vpop.permute.xlu1 %2266 }
 0x625   :  { %v2269_v28 = vmul.f32 %v3194_v26, %v2267_v27 }
 0x627   :  { %2271 = vrot.lane.b32.xlu1 %v2269_v28, %s3216_s6 }
 0x695   :  { %v2260_v56 = vpop.permute.xlu0 %2259 }
 0x696   :  { %v2262_v3 = vadd.f32 %v2260_v56, %v2251_v32 }
 0x698   :  { %3195 = vtanh.f32 %v2262_v3 }
 0x699   :  { %v2272_v33 = vpop.permute.xlu1 %2271 }
 0x69a   :  { %v2274_v0 = vadd.f32 %v2272_v33, %v2263_v1 }
 0x69c   :  { %3197 = vtanh.f32 %v2274_v0 }
 0x69d   :  { %3199 = vpow2.f32 %v2235_v57 }
 0x69e   :  { %3201 = vpow2.f32 %v2245_v63 }
 0x6a2   :  { %v3196_v54 = vpop.eup %3195 }
 0x6a3   :  { %2277 = vrot.lane.b32.xlu0 %v3196_v54, %s3216_s6 }
 0x6a6   :  { %v3198_v39 = vpop.eup %3197 }
 0x6a7   :  { %2283 = vrot.lane.b32.xlu1 %v3198_v39, %s3216_s6  ;;  %v3200_v2 = vpop.eup %3199 }
 0x6a8   :  { %v2238_v58 = vadd.f32 1.0, %v3200_v2  ;;  %v3202_v59 = vpop.eup %3201 }
 0x6a9   :  { %v2248_v35 = vadd.f32 1.0, %v3202_v59 }
 0x6aa   :  { %3203 = vrcp.f32 %v2238_v58 }
 0x6ab   :  { %3205 = vrcp.f32 %v2248_v35 }
 0x6b4   :  { %v3204_v60 = vpop.eup %3203 }
 0x6b5   :  { %v3206_v49 = vpop.eup %3205 }
 0x715   :  { %v2278_v61 = vpop.permute.xlu0 %2277 }
 0x716   :  { %v2280_v30 = vmul.f32 %v3204_v60, %v2278_v61 }
 0x718   :  { %2287 = vst.msk [vmem:[#allocation4 + $0x8] sm:$0xff] %vm137_vm0, %v2280_v30 }
 0x719   :  { %v2284_v50 = vpop.permute.xlu1 %2283 }
 0x71a   :  { %v2286_v52 = vmul.f32 %v3206_v49, %v2284_v50 }
 0x71c   :  { %2288 = vst.msk [vmem:[#allocation5] sm:$0xff] %vm137_vm0, %v2286_v52 }
 0x71f   :  { %v2290_v42 = vld [vmem:[#allocation4 + $0x8] sm:$0xff] }
 0x720   :  { %v2291_v43 = vpack.c.bf16 %v2290_v42, %v2289_v41 }
 0x722   :  { %2799 = vmatmul.mubr.msk.bf16.vlgmr.msra.gmra.mrb[36].mxu1 %vm137_vm0, %v2291_v43 }
 0x723   :  { %v2292_v36 = vld [vmem:[#allocation5] sm:$0xff] }
 0x724   :  { %v2294_v46 = vpack.c.bf16 %v2293_v40, %v2292_v36 }
 0x726   :  { %2787 = vmatmul.mubr.msk.bf16.vlgmr.msra.gmra.mrb[36].mxu0 %vm137_vm0, %v2294_v46 }
 0x7f5   :  { %v2440_v5 = vpop.f32.mrb[36].mxu1 }
 0x7f6   :  { %v2800_v6 = vpop.f32.mrb[37].mxu1 }
 0x7f7   :  { %v2443_v7 = vpop.f32.mrb[38].mxu1 }
 0x7f8   :  { %v2801_v8 = vpop.f32.mrb[39].mxu1 }
 0x7f9   :  { %v2372_v48 = vpop.f32.mrb[36].mxu0 }
 0x7fa   :  { %v2441_v12 = vadd.f32 %v2440_v5, %v2372_v48  ;;  %v2788_v13 = vpop.f32.mrb[37].mxu0 }
 0x7fb   :  { %v2375_v15 = vpop.f32.mrb[38].mxu0 }
 0x7fc   :  { %v2454_v16 = vadd.f32 %v2767_v11, %v2441_v12  ;;  %v2444_v17 = vadd.f32 %v2443_v7, %v2375_v15  ;;  %v2789_v47 = vpop.f32.mrb[39].mxu0 }
 0x7fe   :  { %v2455_v9 = vadd.f32 %v2767_v11, %v2444_v17  ;;  %2456 = vmax.xlane.f32.xlu0 %v2454_v16 }
 0x800   :  { %2458 = vmax.xlane.f32.xlu1 %v2455_v9 }
 0x88b   :  { %v2457_v18 = vpop.xlane.xlu0 %2456 }
 0x88c   :  { %v2460_v19 = vsub.f32 %v2454_v16, %v2457_v18 }
 0x88d   :  { %v2459_v20 = vpop.xlane.xlu1 %2458 }
 0x88e   :  { %v2462_v21 = vmul.f32 1.442695, %v2460_v19  ;;  %v2461_v44 = vsub.f32 %v2455_v9, %v2459_v20 }
 0x890   :  { %3207 = vpow2.f32 %v2462_v21  ;;  %v2464_v10 = vmul.f32 1.442695, %v2461_v44 }
 0x892   :  { %3209 = vpow2.f32 %v2464_v10 }
 0x89a   :  { %v3208_v45 = vpop.eup %3207 }
 0x89b   :  { %2466 = vadd.xlane.f32.xlu0 %v3208_v45 }
 0x89c   :  { %v3210_v22 = vpop.eup %3209 }
 0x89f   :  { %2468 = vadd.xlane.f32.xlu0 %v3210_v22 }
 0x928   :  { %v2467_v23 = vpop.xlane.xlu0 %2466 }
 0x929   :  { %3211 = vlog2.f32 %v2467_v23 }
 0x92c   :  { %v2469_v24 = vpop.xlane.xlu0 %2468 }
 0x92d   :  { %3213 = vlog2.f32 %v2469_v24 }
 0x933   :  { %v3212_v25 = vpop.eup %3211 }
 0x934   :  { %v2471_v26 = vmul.f32 0.6931472, %v3212_v25 }
 0x936   :  { %v2474_v27 = vadd.f32 %v2471_v26, %v2457_v18 }
 0x937   :  { %v3214_v28 = vpop.eup %3213 }
 0x938   :  { %v2476_v29 = vsub.f32 %v2454_v16, %v2474_v27  ;;  %v2473_v31 = vmul.f32 0.6931472, %v3214_v28 }
 0x93a   :  { %2478 = vst [vmem:[%s4242_s9] sm:$0xff] %v2476_v29  ;;  %v2475_v32 = vadd.f32 %v2473_v31, %v2459_v20 }
 0x93c   :  { %v2477_v56 = vsub.f32 %v2455_v9, %v2475_v32 }
 0x93e   :  { %2479 = vst [vmem:[%s4242_s9 + $0x8] sm:$0xff] %v2477_v56 }

// kernel: _lambda_.2
= control target key start
LH: loop header
LB: loop body
LE: loop exit
PB: predicated region body
PF: predicated region fallthrough
CT: control target
= control target key end

     0   :  { %s4000_s24 = smov 0   ;;  %s5225_s0 = inlined_call_operand.vmem [shape: bf16[2,18,10,32], index: 0, kind: input, shape index: {}]   ;;  %s5226_s1 = inlined_call_operand.vmem [shape: bf16[72,32], index: 1, kind: input, shape index: {}]   ;;  %s5227_s2 = inlined_call_operand.vmem [shape: f32[1,32], index: 2, kind: input, shape index: {}]   ;;  %s5228_s3 = inlined_call_operand.vmem [shape: bf16[288,64], index: 3, kind: input, shape index: {}]   ;;  %s5229_s4 = inlined_call_operand.vmem [shape: f32[1,64], index: 4, kind: input, shape index: {}]   ;;  %s5230_s5 = inlined_call_operand.vmem [shape: bf16[256,64], index: 5, kind: input, shape index: {}]   ;;  %s5231_s6 = inlined_call_operand.vmem [shape: f32[1,64], index: 6, kind: input, shape index: {}]   ;;  %s5232_s7 = inlined_call_operand.vmem [shape: bf16[2,8,64], index: 7, kind: output, shape index: {}]  }
   0x1 LB: > { %s2931_s25 = sadd.s32 4294967295, %s3946_s24   ;;  %p2935_p0 = scmp.ge.s32.totalorder %s3946_s24, 1  ;;  %s3946_s24 = sphi %s4000_s24, %s17_s24  }
   0x2   : > { %p237_p1 = scmp.lt.s32.totalorder %s3946_s24, 3 }
   0x4   : > { %p238_p2 = pnand %p2935_p0, %p237_p1 }
   0x5   : > { %p268_p3 = scmp.lt.s32.totalorder (!%p238_p2), %s2931_s25, 1  ;;  %vm458_vm0 = vcmask (!%p238_p2), 1046528   ;;  %vm555_vm1 = vcmask (!%p238_p2), 1045504   ;;  %s3948_s30 = smov (!%p238_p2), 104   ;;  %vm652_vm2 = vcmask (!%p238_p2), 64512   ;;  %vm669_vm3 = vcmask (!%p238_p2), 326656  }
   0x6   : > { %241 = sbr.rel (%p238_p2) target bundleno = 1677 (0x68d), region = 48  ;;  %s3949_s8 = smov (!%p238_p2), 8   ;;  %vm1479_vm4 = vcmask (!%p238_p2), 1043456   ;;  %vm837_vm5 = vcmask (!%p238_p2), 195584   ;;  %vm854_vm6 = vcmask (!%p238_p2), 392192   ;;  %vm1382_vm7 = vcmask (!%p238_p2), 588800  }
   0x7   : > { %s3950_s9 = smov (!%p238_p2), 40   ;;  %s3951_s20 = smov (!%p238_p2), 24   ;;  %vm1861_vm8 = vcmask (!%p238_p2), 261120   ;;  %vm285_vm9 = vcmask (!%p238_p2), 516096   ;;  %vm278_vm10 = vcmask (!%p238_p2), 523264   ;;  %vm280_vm11 = vcmask (!%p238_p2), 517120  }
   0x8   : > { %s3952_s21 = smov (!%p238_p2), 48   ;;  %s3953_s22 = smov (!%p238_p2), 120   ;;  %vm1926_vm12 = vcmask (!%p238_p2), 523520   ;;  %vm2099_vm13 = vcmask (!%p238_p2), 785408   ;;  %vm2876_vm14 = vcmask (!%p238_p2), 519168  }
   0x9   : > { %s3954_s23 = smov (!%p238_p2), 16   ;;  %s3956_s27 = smov (!%p238_p2), 32  }
   0xd   : > { %s5234_s25 = smov (!%p268_p3, %s2931_s25), 1 }
   0xe   : > { %s3250_s26 = smul.u32 144, %s5234_s25 }
  0x10   : > { %s4014_s29 = scalar_lea.vmem %s5225_s0, %s3250_s26  ;;  %s3955_s26 = smov 112  }
  0x11   : > { %v312_v0 = vld [vmem:[%s4014_s29 + $0x18] ss:$8 sps:$4 sm:$0xff]   ;;  %v308_v1 = vld [vmem:[%s4014_s29 + $0x8] ss:$8 sps:$4 sm:$0xff]   ;;  %v309_v7 = vld [vmem:[%s4014_s29 + $0xc] sm:$0x1] }
  0x12   : > { %v316_v2 = vld [vmem:[%s4014_s29 + $0x28] ss:$8 sps:$4 sm:$0xff]   ;;  %v348_v3 = vunpack.c.l.bf16 %v312_v0  ;;  %v350_v4 = vunpack.c.h.bf16 %v312_v0  ;;  %v344_v5 = vunpack.c.l.bf16 %v308_v1  ;;  %v346_v6 = vunpack.c.h.bf16 %v308_v1  ;;  %v311_v8 = vld [vmem:[%s4014_s29 + $0x14] sm:$0x1]  ;;  %v313_v9 = vld [vmem:[%s4014_s29 + $0x1c] sm:$0x1] }
  0x13   : > { %v4022_v10 = vunpack.c.l.bf16 %v316_v2  ;;  %v4024_v11 = vunpack.c.h.bf16 %v316_v2  ;;  %v345_v12 = vunpack.c.l.bf16 %v309_v7  ;;  %v347_v13 = vunpack.c.l.bf16 %v311_v8  ;;  %v315_v14 = vld [vmem:[%s4014_s29 + $0x24] sm:$0x1]  ;;  %v317_v35 = vld [vmem:[%s4014_s29 + $0x2c] sm:$0x1]  ;;  %v319_v40 = vld [vmem:[%s4014_s29 + $0x34] sm:$0x1] }
  0x14   : > { %v3276_v15 = vpack.i.bf16 %v350_v4, %v348_v3  ;;  %v3271_v16 = vpack.i.bf16 %v346_v6, %v344_v5  ;;  %v462_v17 = vrot.slane %v344_v5, 1  ;;  %v465_v18 = vrot.slane %v346_v6, 1  ;;  %v320_v45 = vld [vmem:[%s4014_s29 + $0x38] ss:$8 sps:$4 sm:$0xff]   ;;  %v324_v54 = vld [vmem:[%s4014_s29 + $0x48] ss:$8 sps:$4 sm:$0xff]  }
  0x15   : > { %v3281_v19 = vpack.i.bf16 %v4024_v11, %v4022_v10  ;;  %v463_v20 = vrot.slane %v345_v12, 1  ;;  %v466_v21 = vrot.slane %v347_v13, 1  ;;  %v349_v22 = vunpack.c.l.bf16 %v313_v9  ;;  %v321_v55 = vld [vmem:[%s4014_s29 + $0x3c] sm:$0x1]  ;;  %v323_v60 = vld [vmem:[%s4014_s29 + $0x44] sm:$0x1] }
  0x16   : > { %3277 = vrot.lane.b32.xlu1 %v3276_v15, %s3948_s30  ;;  %3272 = vrot.lane.b32.xlu0 %v3271_v16, %s3948_s30  ;;  %v351_v23 = vunpack.c.l.bf16 %v315_v14  ;;  %v468_v24 = vrot.slane %v348_v3, 1  ;;  %v471_v25 = vrot.slane %v350_v4, 1  ;;  %v559_v26 = vrot.slane %v344_v5, 2  ;;  %v327_v5 = vld [vmem:[%s4014_s29 + $0x54] sm:$0x1] }
  0x17   : > { %v464_v27 = vsel %vm458_vm0, %v462_v17, %v463_v20  ;;  %v467_v28 = vsel %vm458_vm0, %v465_v18, %v466_v21  ;;  %v469_v29 = vrot.slane %v349_v22, 1  ;;  %v560_v30 = vrot.slane %v345_v12, 2  ;;  %v328_v18 = vld [vmem:[%s4014_s29 + $0x58] ss:$8 sps:$4 sm:$0xff]  }
  0x18   : > { %v3286_v31 = vpack.i.bf16 %v467_v28, %v464_v27  ;;  %v472_v32 = vrot.slane %v351_v23, 1  ;;  %v562_v33 = vrot.slane %v346_v6, 2  ;;  %v563_v34 = vrot.slane %v347_v13, 2 }
  0x19   : > { %v470_v36 = vsel %vm458_vm0, %v468_v24, %v469_v29  ;;  %v561_v37 = vsel %vm555_vm1, %v559_v26, %v560_v30  ;;  %v565_v38 = vrot.slane %v348_v3, 2  ;;  %v566_v39 = vrot.slane %v349_v22, 2 }
  0x1a   : > { %3282 = vrot.lane.b32.xlu1 %v3281_v19, %s3948_s30  ;;  %3287 = vrot.lane.b32.xlu0 %v3286_v31, %s3949_s8  ;;  %v473_v41 = vsel %vm458_vm0, %v471_v25, %v472_v32  ;;  %v564_v42 = vsel %vm555_vm1, %v562_v33, %v563_v34  ;;  %v568_v43 = vrot.slane %v350_v4, 2  ;;  %v569_v44 = vrot.slane %v351_v23, 2  ;;  %v325_v4 = vld [vmem:[%s4014_s29 + $0x4c] sm:$0x1]  ;;  %v332_v31 = vld [vmem:[%s4014_s29 + $0x68] ss:$8 sps:$4 sm:$0xff]  }
  0x1b   : > { %v3291_v46 = vpack.i.bf16 %v473_v41, %v470_v36  ;;  %v3296_v47 = vpack.i.bf16 %v564_v42, %v561_v37  ;;  %v567_v48 = vsel %vm555_vm1, %v565_v38, %v566_v39  ;;  %v353_v49 = vunpack.c.l.bf16 %v317_v35  ;;  %v329_v32 = vld [vmem:[%s4014_s29 + $0x5c] sm:$0x1]  ;;  %v331_v33 = vld [vmem:[%s4014_s29 + $0x64] sm:$0x1] }
  0x1c   : > { %v570_v50 = vsel %vm555_vm1, %v568_v43, %v569_v44  ;;  %v355_v51 = vunpack.c.l.bf16 %v319_v40  ;;  %v474_v52 = vrot.slane %v4022_v10, 1  ;;  %v477_v53 = vrot.slane %v4024_v11, 1 }
  0x1d   : > { %v3306_v56 = vpack.i.bf16 %v570_v50, %v567_v48  ;;  %v475_v57 = vrot.slane %v353_v49, 1  ;;  %v356_v58 = vunpack.c.l.bf16 %v320_v45  ;;  %v358_v59 = vunpack.c.h.bf16 %v320_v45  ;;  %v335_v50 = vld [vmem:[%s4014_s29 + $0x74] sm:$0x1] }
  0x1e   : > { %3292 = vrot.lane.b32.xlu1 %v3291_v46, %s3949_s8  ;;  %3297 = vrot.lane.b32.xlu0 %v3296_v47, %s3950_s9  ;;  %v478_v61 = vrot.slane %v355_v51, 1  ;;  %v571_v62 = vrot.slane %v4022_v10, 2  ;;  %v572_v63 = vrot.slane %v353_v49, 2  ;;  %v574_v0 = vrot.slane %v4024_v11, 2  ;;  %v333_v46 = vld [vmem:[%s4014_s29 + $0x6c] sm:$0x1] }
  0x1f   : > { %v476_v1 = vsel %vm458_vm0, %v474_v52, %v475_v57  ;;  %v575_v2 = vrot.slane %v355_v51, 2  ;;  %v360_v3 = vunpack.c.l.bf16 %v324_v54  ;;  %v362_v8 = vunpack.c.h.bf16 %v324_v54 }
  0x20   : > { %v479_v6 = vsel %vm458_vm0, %v477_v53, %v478_v61  ;;  %v573_v7 = vsel %vm555_vm1, %v571_v62, %v572_v63  ;;  %v357_v9 = vunpack.c.l.bf16 %v321_v55  ;;  %v359_v10 = vunpack.c.l.bf16 %v323_v60  ;;  %v336_v62 = vld [vmem:[%s4014_s29 + $0x78] ss:$8 sps:$4 sm:$0xff]  }
  0x21   : > { %v3301_v12 = vpack.i.bf16 %v479_v6, %v476_v1  ;;  %v576_v13 = vsel %vm555_vm1, %v574_v0, %v575_v2  ;;  %v480_v14 = vrot.slane %v356_v58, 1  ;;  %v3316_v11 = vpack.i.bf16 %v358_v59, %v356_v58 }
  0x22   : > { %3307 = vrot.lane.b32.xlu1 %v3306_v56, %s3950_s9  ;;  %v3311_v15 = vpack.i.bf16 %v576_v13, %v573_v7  ;;  %v481_v16 = vrot.slane %v357_v9, 1  ;;  %v483_v17 = vrot.slane %v358_v59, 1  ;;  %v484_v19 = vrot.slane %v359_v10, 1  ;;  %v339_v7 = vld [vmem:[%s4014_s29 + $0x84] sm:$0x1] }
  0x23   : > { %3302 = vrot.lane.b32.xlu0 %v3301_v12, %s3949_s8  ;;  %v577_v20 = vrot.slane %v356_v58, 2  ;;  %v578_v21 = vrot.slane %v357_v9, 2  ;;  %v580_v22 = vrot.slane %v358_v59, 2  ;;  %v581_v24 = vrot.slane %v359_v10, 2 }
  0x24   : > { %v482_v23 = vsel %vm458_vm0, %v480_v14, %v481_v16  ;;  %v361_v25 = vunpack.c.l.bf16 %v325_v4  ;;  %v363_v26 = vunpack.c.l.bf16 %v327_v5  ;;  %v3326_v27 = vpack.i.bf16 %v362_v8, %v360_v3 }
  0x25   : > { %v485_v28 = vsel %vm458_vm0, %v483_v17, %v484_v19  ;;  %v486_v29 = vrot.slane %v360_v3, 1  ;;  %v489_v30 = vrot.slane %v362_v8, 1  ;;  %v579_v34 = vsel %vm555_vm1, %v577_v20, %v578_v21  ;;  %v306_v20 = vld [vmem:[%s4014_s29] ss:$136 sps:$4 sm:$0xff]  }
  0x26   : > { %3317 = vrot.lane.b32.xlu1 %v3316_v11, %s3948_s30  ;;  %v582_v35 = vsel %vm555_vm1, %v580_v22, %v581_v24  ;;  %v487_v36 = vrot.slane %v361_v25, 1  ;;  %v490_v37 = vrot.slane %v363_v26, 1  ;;  %v3321_v38 = vpack.i.bf16 %v485_v28, %v482_v23 }
  0x27   : > { %3312 = vrot.lane.b32.xlu0 %v3311_v15, %s3950_s9  ;;  %v364_v39 = vunpack.c.l.bf16 %v328_v18  ;;  %v366_v40 = vunpack.c.h.bf16 %v328_v18  ;;  %v583_v41 = vrot.slane %v360_v3, 2  ;;  %v584_v44 = vrot.slane %v361_v25, 2  ;;  %v337_v3 = vld [vmem:[%s4014_s29 + $0x7c] sm:$0x1] }
  0x28   : > { %v488_v42 = vsel %vm458_vm0, %v486_v29, %v487_v36  ;;  %v491_v43 = vsel %vm458_vm0, %v489_v30, %v490_v37  ;;  %v586_v45 = vrot.slane %v362_v8, 2  ;;  %v3336_v47 = vpack.i.bf16 %v582_v35, %v579_v34  ;;  %v307_v30 = vld [vmem:[%s4014_s29 + $0x4] sm:$0x1] }
  0x29   : > { %v3331_v48 = vpack.i.bf16 %v491_v43, %v488_v42  ;;  %v587_v49 = vrot.slane %v363_v26, 2  ;;  %v585_v51 = vsel %vm555_vm1, %v583_v41, %v584_v44  ;;  %v368_v52 = vunpack.c.l.bf16 %v332_v31 }
  0x2a   : > { %3327 = vrot.lane.b32.xlu1 %v3326_v27, %s3948_s30  ;;  %v365_v53 = vunpack.c.l.bf16 %v329_v32  ;;  %v367_v54 = vunpack.c.l.bf16 %v331_v33  ;;  %v492_v56 = vrot.slane %v364_v39, 1  ;;  %v495_v57 = vrot.slane %v366_v40, 1 }
  0x2b   : > { %3322 = vrot.lane.b32.xlu0 %v3321_v38, %s3949_s8  ;;  %v588_v55 = vsel %vm555_vm1, %v586_v45, %v587_v49  ;;  %v589_v58 = vrot.slane %v364_v39, 2  ;;  %v370_v59 = vunpack.c.h.bf16 %v332_v31  ;;  %v592_v0 = vrot.slane %v366_v40, 2  ;;  %v341_v31 = vld [vmem:[%s4014_s29 + $0x8c] sm:$0x1] }
  0x2c   : > { %v493_v60 = vrot.slane %v365_v53, 1  ;;  %v496_v61 = vrot.slane %v367_v54, 1  ;;  %v590_v63 = vrot.slane %v365_v53, 2  ;;  %v593_v1 = vrot.slane %v367_v54, 2 }
  0x2d   : > { %v369_v2 = vunpack.c.l.bf16 %v333_v46  ;;  %v3346_v4 = vpack.i.bf16 %v366_v40, %v364_v39  ;;  %v3341_v5 = vpack.i.bf16 %v588_v55, %v585_v51  ;;  %v371_v6 = vunpack.c.l.bf16 %v335_v50 }
  0x2e   : > { %3337 = vrot.lane.b32.xlu1 %v3336_v47, %s3950_s9  ;;  %v494_v8 = vsel %vm458_vm0, %v492_v56, %v493_v60  ;;  %v497_v9 = vsel %vm458_vm0, %v495_v57, %v496_v61  ;;  %v498_v12 = vrot.slane %v368_v52, 1  ;;  %v591_v10 = vsel %vm555_vm1, %v589_v58, %v590_v63 }
  0x2f   : > { %3332 = vrot.lane.b32.xlu0 %v3331_v48, %s3949_s8  ;;  %v499_v13 = vrot.slane %v369_v2, 1  ;;  %v594_v14 = vsel %vm555_vm1, %v592_v0, %v593_v1  ;;  %v501_v11 = vrot.slane %v370_v59, 1  ;;  %v502_v15 = vrot.slane %v371_v6, 1 }
  0x30   : > { %v372_v16 = vunpack.c.l.bf16 %v336_v62  ;;  %v374_v17 = vunpack.c.h.bf16 %v336_v62  ;;  %v595_v18 = vrot.slane %v368_v52, 2  ;;  %v596_v19 = vrot.slane %v369_v2, 2 }
  0x31   : > { %v3356_v21 = vpack.i.bf16 %v370_v59, %v368_v52  ;;  %v598_v22 = vrot.slane %v370_v59, 2  ;;  %v599_v23 = vrot.slane %v371_v6, 2  ;;  %v373_v24 = vunpack.c.l.bf16 %v337_v3  ;;  %v3901_v6 = vld [vmem:[%s5226_s1] sm:$0xff]  }
  0x32   : > { %3347 = vrot.lane.b32.xlu1 %v3346_v4, %s3948_s30  ;;  %v3351_v25 = vpack.i.bf16 %v497_v9, %v494_v8  ;;  %v500_v26 = vsel %vm458_vm0, %v498_v12, %v499_v13  ;;  %v503_v27 = vsel %vm458_vm0, %v501_v11, %v502_v15  ;;  %v375_v28 = vunpack.c.l.bf16 %v339_v7  ;;  %3155 = vmatprep.subr.bf16.mxu0 %v3901_v6  ;;  %v3902_v7 = vld [vmem:[%s5226_s1 + $0x8] sm:$0xff]   ;;  %v3903_v12 = vld [vmem:[%s5226_s1 + $0x10] sm:$0xff]   ;;  %v3904_v15 = vld [vmem:[%s5226_s1 + $0x18] sm:$0xff]  }
  0x33   : > { %3342 = vrot.lane.b32.xlu0 %v3341_v5, %s3950_s9  ;;  %v3366_v29 = vpack.i.bf16 %v594_v14, %v591_v10  ;;  %v601_v32 = vrot.slane %v372_v16, 2  ;;  %v602_v33 = vrot.slane %v373_v24, 2  ;;  %v697_v34 = vrot.slane %v374_v17, 2  ;;  %3156 = vmatpush3.bf16.msra.mxu0 %v3901_v6 }
  0x34   : > { %v698_v35 = vrot.slane %v375_v28, 2  ;;  %v3361_v36 = vpack.i.bf16 %v503_v27, %v500_v26  ;;  %v504_v37 = vrot.slane %v372_v16, 1  ;;  %v505_v38 = vrot.slane %v373_v24, 1  ;;  %3157 = vmatprep.subr.bf16.mxu0 %v3902_v7 }
  0x35   : > { %v342_v39 = vunpack.c.l.bf16 %v306_v20  ;;  %v597_v40 = vsel %vm555_vm1, %v595_v18, %v596_v19  ;;  %v600_v41 = vsel %vm555_vm1, %v598_v22, %v599_v23  ;;  %v376_v42 = vunpack.c.h.bf16 %v306_v20 }
  0x36   : > { %3357 = vrot.lane.b32.xlu1 %v3356_v21, %s3948_s30  ;;  %v343_v43 = vunpack.c.l.bf16 %v307_v30  ;;  %v691_v44 = vrot.slane %v374_v17, 1  ;;  %v692_v45 = vrot.slane %v375_v28, 1  ;;  %v377_v46 = vunpack.c.l.bf16 %v341_v31 }
  0x37   : > { %3352 = vrot.lane.b32.xlu0 %v3351_v25, %s3949_s8  ;;  %v3376_v47 = vpack.i.bf16 %v374_v17, %v372_v16  ;;  %v3371_v48 = vpack.i.bf16 %v600_v41, %v597_v40  ;;  %v459_v49 = vrot.slane %v342_v39, 1  ;;  %v603_v51 = vsel %vm555_vm1, %v601_v32, %v602_v33  ;;  %3158 = vmatpush3.bf16.msra.mxu0 %v3902_v7  ;;  %v3905_v32 = vld [vmem:[%s5226_s1 + $0x20] ss:$0 sps:$4 sm:$0xff]  }
  0x38   : > { %v460_v50 = vrot.slane %v343_v43, 1  ;;  %v699_v52 = vsel %vm555_vm1, %v697_v34, %v698_v35  ;;  %v710_v53 = vrot.slane %v376_v42, 1  ;;  %v711_v54 = vrot.slane %v377_v46, 1  ;;  %3159 = vmatprep.subr.bf16.mxu0 %v3903_v12 }
  0x39   : > { %v506_v55 = vsel %vm458_vm0, %v504_v37, %v505_v38  ;;  %v693_v56 = vsel %vm458_vm0, %v691_v44, %v692_v45  ;;  %v3386_v57 = vpack.i.bf16 %v699_v52, %v603_v51  ;;  %v556_v61 = vrot.slane %v342_v39, 2 }
  0x3a   : > { %3367 = vrot.lane.b32.xlu1 %v3366_v29, %s3950_s9  ;;  %v3381_v58 = vpack.i.bf16 %v693_v56, %v506_v55  ;;  %v461_v59 = vsel %vm458_vm0, %v459_v49, %v460_v50  ;;  %v712_v60 = vsel %vm458_vm0, %v710_v53, %v711_v54  ;;  %v557_v62 = vrot.slane %v343_v43, 2 }
  0x3b   : > { %3362 = vrot.lane.b32.xlu0 %v3361_v36, %s3949_s8  ;;  %v716_v63 = vrot.slane %v376_v42, 2  ;;  %v717_v0 = vrot.slane %v377_v46, 2  ;;  %v3396_v1 = vpack.i.bf16 %v461_v59, %v712_v60  ;;  %v3391_v2 = vpack.i.bf16 %v342_v39, %v376_v42  ;;  %3160 = vmatpush3.bf16.msra.mxu0 %v3903_v12 }
  0x3c   : > { %v558_v3 = vsel %vm555_vm1, %v556_v61, %v557_v62  ;;  %3161 = vmatprep.subr.bf16.mxu0 %v3904_v15  ;;  %v1481_v38 = vsel %vm1479_vm4, %v3905_v32, 0 }
  0x3d   : > { %v718_v4 = vsel %vm555_vm1, %v716_v63, %v717_v0 }
  0x3e   : > { %3377 = vrot.lane.b32.xlu1 %v3376_v47, %s3948_s30  ;;  %v3401_v5 = vpack.i.bf16 %v558_v3, %v718_v4 }
  0x3f   : > { %3372 = vrot.lane.b32.xlu0 %v3371_v48, %s3950_s9  ;;  %3162 = vmatpush3.bf16.msra.mxu0 %v3904_v15 }
  0x40   : > { %3249 = vmatprep.subr.msk.bf16.mxu0 %vm1479_vm4, %v3905_v32 }
  0x42   : > { %3387 = vrot.lane.b32.xlu1 %v3386_v57, %s3950_s9 }
  0x43   : > { %3382 = vrot.lane.b32.xlu0 %v3381_v58, %s3949_s8  ;;  %3164 = vmatpush3.bf16.msra.mxu0 %v1481_v38 }
  0x46   : > { %3397 = vrot.lane.b32.xlu1 %v3396_v1, %s3949_s8 }
  0x47   : > { %3392 = vrot.lane.b32.xlu0 %v3391_v2, %s3948_s30 }
  0x4b   : > { %3402 = vrot.lane.b32.xlu0 %v3401_v5, %s3950_s9 }
  0x88   : > { %v3278_v8 = vpop.permute.xlu1 %3277  ;;  %v3273_v9 = vpop.permute.xlu0 %3272 }
  0x89   : > { %v3275_v16 = vunpack.i.h.bf16 %v3273_v9  ;;  %v3274_v17 = vunpack.i.l.bf16 %v3273_v9  ;;  %v3280_v28 = vunpack.i.h.bf16 %v3278_v8  ;;  %v3279_v29 = vunpack.i.l.bf16 %v3278_v8 }
  0x8c   : > { %v3283_v13 = vpop.permute.xlu1 %3282  ;;  %v3288_v10 = vpop.permute.xlu0 %3287 }
  0x8d   : > { %v3290_v14 = vunpack.i.h.bf16 %v3288_v10  ;;  %v3289_v11 = vunpack.i.l.bf16 %v3288_v10  ;;  %v3285_v46 = vunpack.i.h.bf16 %v3283_v13  ;;  %v3284_v47 = vunpack.i.l.bf16 %v3283_v13 }
  0x8f   : > { %v655_v22 = vsel %vm652_vm2, %v3275_v16, %v3290_v14  ;;  %v654_v23 = vsel %vm652_vm2, %v3274_v17, %v3289_v11 }
  0x90   : > { %v3293_v18 = vpop.permute.xlu1 %3292  ;;  %v3298_v19 = vpop.permute.xlu0 %3297 }
  0x91   : > { %v3300_v20 = vunpack.i.h.bf16 %v3298_v19  ;;  %v3299_v21 = vunpack.i.l.bf16 %v3298_v19  ;;  %v3295_v24 = vunpack.i.h.bf16 %v3293_v18  ;;  %v3294_v25 = vunpack.i.l.bf16 %v3293_v18 }
  0x93   : > { %v4131_v26 = vsel %vm669_vm3, %v654_v23, %v3299_v21  ;;  %v4134_v27 = vsel %vm669_vm3, %v655_v22, %v3300_v20  ;;  %v657_v36 = vsel %vm652_vm2, %v3280_v28, %v3295_v24  ;;  %v656_v37 = vsel %vm652_vm2, %v3279_v29, %v3294_v25 }
  0x94   : > { %v3308_v30 = vpop.permute.xlu1 %3307  ;;  %v4138_v31 = vpack.i.bf16 %v4134_v27, %v4131_v26 }
  0x95   : > { %v3310_v33 = vunpack.i.h.bf16 %v3308_v30  ;;  %v3309_v34 = vunpack.i.l.bf16 %v3308_v30  ;;  %v3303_v35 = vpop.permute.xlu0 %3302 }
  0x96   : > { %3407 = vrot.lane.b32.xlu1 %v4138_v31, %s3951_s20  ;;  %v3305_v41 = vunpack.i.h.bf16 %v3303_v35  ;;  %v3304_v42 = vunpack.i.l.bf16 %v3303_v35 }
  0x97   : > { %v4148_v39 = vsel %vm669_vm3, %v656_v37, %v3309_v34  ;;  %v4151_v40 = vsel %vm669_vm3, %v657_v36, %v3310_v33 }
  0x98   : > { %v3318_v43 = vpop.permute.xlu1 %3317  ;;  %v4155_v44 = vpack.i.bf16 %v4151_v40, %v4148_v39  ;;  %v4159_v45 = vpack.i.bf16 %v4148_v39, %v4134_v27  ;;  %v659_v51 = vsel %vm652_vm2, %v3285_v46, %v3305_v41  ;;  %v658_v52 = vsel %vm652_vm2, %v3284_v47, %v3304_v42 }
  0x99   : > { %v3313_v48 = vpop.permute.xlu0 %3312  ;;  %v3320_v59 = vunpack.i.h.bf16 %v3318_v43  ;;  %v3319_v60 = vunpack.i.l.bf16 %v3318_v43 }
  0x9a   : > { %v3315_v49 = vunpack.i.h.bf16 %v3313_v48  ;;  %v3314_v50 = vunpack.i.l.bf16 %v3313_v48  ;;  %3412 = vrot.lane.b32.xlu0 %v4155_v44, %s3951_s20  ;;  %3417 = vrot.lane.b32.xlu1 %v4159_v45, %s3952_s21 }
  0x9c   : > { %v4168_v53 = vsel %vm669_vm3, %v658_v52, %v3314_v50  ;;  %v4171_v54 = vsel %vm669_vm3, %v659_v51, %v3315_v49  ;;  %v3328_v55 = vpop.permute.xlu1 %3327 }
  0x9d   : > { %v3323_v56 = vpop.permute.xlu0 %3322  ;;  %v4175_v57 = vpack.i.bf16 %v4168_v53, %v4151_v40  ;;  %v4179_v58 = vpack.i.bf16 %v4171_v54, %v4168_v53  ;;  %v3330_v3 = vunpack.i.h.bf16 %v3328_v55  ;;  %v3329_v4 = vunpack.i.l.bf16 %v3328_v55 }
  0x9e   : > { %v3325_v61 = vunpack.i.h.bf16 %v3323_v56  ;;  %v3324_v62 = vunpack.i.l.bf16 %v3323_v56 }
  0x9f   : > { %3422 = vrot.lane.b32.xlu0 %v4175_v57, %s3952_s21  ;;  %3427 = vrot.lane.b32.xlu1 %v4179_v58, %s3951_s20 }
  0xa0   : > { %v3338_v63 = vpop.permute.xlu1 %3337  ;;  %v661_v5 = vsel %vm652_vm2, %v3320_v59, %v3325_v61  ;;  %v660_v6 = vsel %vm652_vm2, %v3319_v60, %v3324_v62 }
  0xa1   : > { %v3340_v0 = vunpack.i.h.bf16 %v3338_v63  ;;  %v3339_v1 = vunpack.i.l.bf16 %v3338_v63  ;;  %v3333_v2 = vpop.permute.xlu0 %3332 }
  0xa2   : > { %v3335_v9 = vunpack.i.h.bf16 %v3333_v2  ;;  %v3334_v12 = vunpack.i.l.bf16 %v3333_v2 }
  0xa3   : > { %v4188_v7 = vsel %vm669_vm3, %v660_v6, %v3339_v1  ;;  %v4191_v8 = vsel %vm669_vm3, %v661_v5, %v3340_v0 }
  0xa4   : > { %v3348_v13 = vpop.permute.xlu1 %3347  ;;  %v4195_v10 = vpack.i.bf16 %v4191_v8, %v4188_v7  ;;  %v4199_v14 = vpack.i.bf16 %v4188_v7, %v4171_v54  ;;  %v663_v17 = vsel %vm652_vm2, %v3330_v3, %v3335_v9  ;;  %v662_v18 = vsel %vm652_vm2, %v3329_v4, %v3334_v12 }
  0xa5   : > { %v3343_v11 = vpop.permute.xlu0 %3342  ;;  %v3350_v25 = vunpack.i.h.bf16 %v3348_v13  ;;  %v3349_v28 = vunpack.i.l.bf16 %v3348_v13 }
  0xa6   : > { %v3345_v15 = vunpack.i.h.bf16 %v3343_v11  ;;  %v3344_v16 = vunpack.i.l.bf16 %v3343_v11  ;;  %3432 = vrot.lane.b32.xlu0 %v4195_v10, %s3951_s20  ;;  %3437 = vrot.lane.b32.xlu1 %v4199_v14, %s3952_s21 }
  0xa8   : > { %v4208_v19 = vsel %vm669_vm3, %v662_v18, %v3344_v16  ;;  %v4211_v20 = vsel %vm669_vm3, %v663_v17, %v3345_v15  ;;  %v3358_v21 = vpop.permute.xlu1 %3357 }
  0xa9   : > { %v3353_v22 = vpop.permute.xlu0 %3352  ;;  %v4215_v23 = vpack.i.bf16 %v4208_v19, %v4191_v8  ;;  %v4219_v24 = vpack.i.bf16 %v4211_v20, %v4208_v19  ;;  %v3360_v36 = vunpack.i.h.bf16 %v3358_v21  ;;  %v3359_v37 = vunpack.i.l.bf16 %v3358_v21 }
  0xaa   : > { %v3355_v29 = vunpack.i.h.bf16 %v3353_v22  ;;  %v3354_v30 = vunpack.i.l.bf16 %v3353_v22 }
  0xab   : > { %3442 = vrot.lane.b32.xlu0 %v4215_v23, %s3952_s21  ;;  %3447 = vrot.lane.b32.xlu1 %v4219_v24, %s3951_s20 }
  0xac   : > { %v3368_v32 = vpop.permute.xlu1 %3367  ;;  %v665_v38 = vsel %vm652_vm2, %v3350_v25, %v3355_v29  ;;  %v664_v41 = vsel %vm652_vm2, %v3349_v28, %v3354_v30 }
  0xad   : > { %v3370_v33 = vunpack.i.h.bf16 %v3368_v32  ;;  %v3369_v34 = vunpack.i.l.bf16 %v3368_v32  ;;  %v3363_v35 = vpop.permute.xlu0 %3362 }
  0xae   : > { %v3365_v46 = vunpack.i.h.bf16 %v3363_v35  ;;  %v3364_v47 = vunpack.i.l.bf16 %v3363_v35 }
  0xaf   : > { %v4228_v42 = vsel %vm669_vm3, %v664_v41, %v3369_v34  ;;  %v4231_v43 = vsel %vm669_vm3, %v665_v38, %v3370_v33 }
  0xb0   : > { %v3378_v48 = vpop.permute.xlu1 %3377  ;;  %v4235_v49 = vpack.i.bf16 %v4231_v43, %v4228_v42  ;;  %v4239_v50 = vpack.i.bf16 %v4228_v42, %v4211_v20  ;;  %v667_v56 = vsel %vm652_vm2, %v3360_v36, %v3365_v46  ;;  %v666_v59 = vsel %vm652_vm2, %v3359_v37, %v3364_v47 }
  0xb1   : > { %v3373_v51 = vpop.permute.xlu0 %3372  ;;  %v3380_v60 = vunpack.i.h.bf16 %v3378_v48  ;;  %v3379_v61 = vunpack.i.l.bf16 %v3378_v48 }
  0xb2   : > { %v3375_v52 = vunpack.i.h.bf16 %v3373_v51  ;;  %v3374_v55 = vunpack.i.l.bf16 %v3373_v51  ;;  %3452 = vrot.lane.b32.xlu0 %v4235_v49, %s3951_s20  ;;  %3457 = vrot.lane.b32.xlu1 %v4239_v50, %s3952_s21 }
  0xb4   : > { %v4248_v62 = vsel %vm669_vm3, %v666_v59, %v3374_v55  ;;  %v4251_v63 = vsel %vm669_vm3, %v667_v56, %v3375_v52  ;;  %v3388_v0 = vpop.permute.xlu1 %3387 }
  0xb5   : > { %v3390_v1 = vunpack.i.h.bf16 %v3388_v0  ;;  %v3389_v2 = vunpack.i.l.bf16 %v3388_v0  ;;  %v3383_v3 = vpop.permute.xlu0 %3382  ;;  %v4255_v4 = vpack.i.bf16 %v4248_v62, %v4231_v43  ;;  %v4259_v5 = vpack.i.bf16 %v4251_v63, %v4248_v62 }
  0xb6   : > { %v3385_v6 = vunpack.i.h.bf16 %v3383_v3  ;;  %v3384_v9 = vunpack.i.l.bf16 %v3383_v3 }
  0xb7   : > { %3462 = vrot.lane.b32.xlu0 %v4255_v4, %s3952_s21  ;;  %3467 = vrot.lane.b32.xlu1 %v4259_v5, %s3951_s20 }
  0xb8   : > { %v703_v12 = vsel %vm652_vm2, %v3380_v60, %v3385_v6  ;;  %v668_v13 = vsel %vm652_vm2, %v3379_v61, %v3384_v9  ;;  %v3398_v11 = vpop.permute.xlu1 %3397 }
  0xb9   : > { %v4268_v15 = vsel %vm669_vm3, %v703_v12, %v3390_v1  ;;  %v4271_v16 = vsel %vm669_vm3, %v668_v13, %v3389_v2  ;;  %v3393_v17 = vpop.permute.xlu0 %3392  ;;  %v3400_v28 = vunpack.i.h.bf16 %v3398_v11  ;;  %v3399_v29 = vunpack.i.l.bf16 %v3398_v11 }
  0xba   : > { %v4275_v18 = vpack.i.bf16 %v4268_v15, %v4271_v16  ;;  %v4279_v21 = vpack.i.bf16 %v4271_v16, %v4251_v63  ;;  %v3395_v22 = vunpack.i.h.bf16 %v3393_v17  ;;  %v3394_v25 = vunpack.i.l.bf16 %v3393_v17 }
  0xbc   : > { %3472 = vrot.lane.b32.xlu0 %v4275_v18, %s3951_s20  ;;  %3477 = vrot.lane.b32.xlu1 %v4279_v21, %s3952_s21  ;;  %v653_v34 = vsel %vm652_vm2, %v3395_v22, %v3400_v28  ;;  %v722_v35 = vsel %vm652_vm2, %v3394_v25, %v3399_v29 }
  0xbd   : > { %v3403_v30 = vpop.permute.xlu0 %3402 }
  0xbe   : > { %v3405_v32 = vunpack.i.h.bf16 %v3403_v30  ;;  %v3404_v33 = vunpack.i.l.bf16 %v3403_v30 }
  0xc0   : > { %v670_v36 = vsel %vm669_vm3, %v653_v34, %v3405_v32  ;;  %v4289_v37 = vsel %vm669_vm3, %v722_v35, %v3404_v33 }
  0xc1   : > { %v4292_v38 = vpack.i.bf16 %v4131_v26, %v670_v36  ;;  %v4296_v41 = vpack.i.bf16 %v4289_v37, %v4268_v15 }
  0xc3   : > { %3487 = vrot.lane.b32.xlu1 %v4292_v38, %s3953_s22  ;;  %3482 = vrot.lane.b32.xlu0 %v4296_v41, %s3952_s21 }
  0xc7   : > { %3497 = vrot.lane.b32.xlu1 %v4159_v45, %s3953_s22  ;;  %3492 = vrot.lane.b32.xlu0 %v4138_v31, %s3954_s23 }
  0xcb   : > { %3507 = vrot.lane.b32.xlu1 %v4159_v45, %s3950_s9  ;;  %3502 = vrot.lane.b32.xlu0 %v4155_v44, %s3954_s23 }
  0xcf   : > { %3517 = vrot.lane.b32.xlu1 %v4175_v57, %s3953_s22  ;;  %3512 = vrot.lane.b32.xlu0 %v4175_v57, %s3950_s9 }
  0xd3   : > { %3527 = vrot.lane.b32.xlu1 %v4199_v14, %s3953_s22  ;;  %3522 = vrot.lane.b32.xlu0 %v4179_v58, %s3954_s23 }
  0xd7   : > { %3537 = vrot.lane.b32.xlu1 %v4199_v14, %s3950_s9  ;;  %3532 = vrot.lane.b32.xlu0 %v4195_v10, %s3954_s23 }
  0xdb   : > { %3547 = vrot.lane.b32.xlu1 %v4215_v23, %s3953_s22  ;;  %3542 = vrot.lane.b32.xlu0 %v4215_v23, %s3950_s9 }
  0xdf   : > { %3557 = vrot.lane.b32.xlu1 %v4239_v50, %s3953_s22  ;;  %3552 = vrot.lane.b32.xlu0 %v4219_v24, %s3954_s23 }
  0xe3   : > { %3567 = vrot.lane.b32.xlu1 %v4239_v50, %s3950_s9  ;;  %3562 = vrot.lane.b32.xlu0 %v4235_v49, %s3954_s23 }
  0xe7   : > { %3577 = vrot.lane.b32.xlu1 %v4255_v4, %s3953_s22  ;;  %3572 = vrot.lane.b32.xlu0 %v4255_v4, %s3950_s9 }
  0xeb   : > { %3587 = vrot.lane.b32.xlu1 %v4279_v21, %s3953_s22  ;;  %3582 = vrot.lane.b32.xlu0 %v4259_v5, %s3954_s23 }
  0xef   : > { %3597 = vrot.lane.b32.xlu1 %v4279_v21, %s3950_s9  ;;  %3592 = vrot.lane.b32.xlu0 %v4275_v18, %s3954_s23  ;;  %s3959_s23 = smov 64  }
  0xf3   : > { %3607 = vrot.lane.b32.xlu1 %v4292_v38, %s3955_s26  ;;  %3602 = vrot.lane.b32.xlu0 %v4296_v41, %s3950_s9 }
  0xf7   : > { %3617 = vrot.lane.b32.xlu1 %v4159_v45, %s3955_s26  ;;  %3612 = vrot.lane.b32.xlu0 %v4138_v31, %s3949_s8 }
  0xfb   : > { %3627 = vrot.lane.b32.xlu1 %v4159_v45, %s3956_s27  ;;  %3622 = vrot.lane.b32.xlu0 %v4155_v44, %s3949_s8 }
  0xff   : > { %3637 = vrot.lane.b32.xlu1 %v4175_v57, %s3955_s26  ;;  %3632 = vrot.lane.b32.xlu0 %v4175_v57, %s3956_s27 }
 0x103   : > { %3647 = vrot.lane.b32.xlu1 %v4199_v14, %s3955_s26  ;;  %3642 = vrot.lane.b32.xlu0 %v4179_v58, %s3949_s8 }
 0x107   : > { %3657 = vrot.lane.b32.xlu1 %v4199_v14, %s3956_s27  ;;  %3652 = vrot.lane.b32.xlu0 %v4195_v10, %s3949_s8 }
 0x108   : > { %v4354_v31 = vpop.permute.xlu1 %3407 }
 0x109   : > { %v3409_v44 = vunpack.i.l.bf16 %v4354_v31  ;;  %v3410_v46 = vunpack.i.h.bf16 %v4354_v31 }
 0x10b   : > { %3667 = vrot.lane.b32.xlu1 %v4215_v23, %s3955_s26  ;;  %3662 = vrot.lane.b32.xlu0 %v4215_v23, %s3956_s27  ;;  %v838_v10 = vsel %vm837_vm5, %v670_v36, %v3409_v44  ;;  %v839_v56 = vsel %vm837_vm5, %v4131_v26, %v3410_v46 }
 0x10c   : > { %v4362_v58 = vpop.permute.xlu0 %3412  ;;  %v3418_v47 = vpop.permute.xlu1 %3417 }
 0x10d   : > { %v3420_v48 = vunpack.i.h.bf16 %v3418_v47  ;;  %v3419_v51 = vunpack.i.l.bf16 %v3418_v47  ;;  %v3415_v52 = vunpack.i.h.bf16 %v4362_v58  ;;  %v3414_v55 = vunpack.i.l.bf16 %v4362_v58 }
 0x10f   : > { %3677 = vrot.lane.b32.xlu1 %v4239_v50, %s3955_s26  ;;  %3672 = vrot.lane.b32.xlu0 %v4219_v24, %s3949_s8  ;;  %v855_v59 = vsel %vm854_vm6, %v838_v10, %v3419_v51  ;;  %v856_v60 = vsel %vm854_vm6, %v839_v56, %v3420_v48  ;;  %v841_v3 = vsel %vm837_vm5, %v4148_v39, %v3415_v52 }
 0x110   : > { %v1307_v0 = vpack.c.bf16 %v856_v60, %v855_v59  ;;  %v840_v24 = vsel %vm837_vm5, %v4134_v27, %v3414_v55 }
 0x111   : > { %v3423_v61 = vpop.permute.xlu0 %3422  ;;  %v4385_v6 = vpop.permute.xlu1 %3427 }
 0x112   : > { %v3425_v1 = vunpack.i.h.bf16 %v3423_v61  ;;  %v3424_v2 = vunpack.i.l.bf16 %v3423_v61  ;;  %3165 = vmatprep.mubr.msk.bf16.mxu0 %vm1382_vm7, %v1307_v0  ;;  %v3430_v11 = vunpack.i.h.bf16 %v4385_v6  ;;  %v3429_v17 = vunpack.i.l.bf16 %v4385_v6 }
 0x113   : > { %3687 = vrot.lane.b32.xlu1 %v4239_v50, %s3956_s27  ;;  %3682 = vrot.lane.b32.xlu0 %v4235_v49, %s3949_s8 }
 0x114   : > { %v857_v9 = vsel %vm854_vm6, %v840_v24, %v3424_v2  ;;  %v858_v12 = vsel %vm854_vm6, %v841_v3, %v3425_v1  ;;  %v843_v49 = vsel %vm837_vm5, %v4168_v53, %v3430_v11  ;;  %v842_v30 = vsel %vm837_vm5, %v4151_v40, %v3429_v17 }
 0x115   : > { %v1308_v13 = vpack.c.bf16 %v858_v12, %v857_v9 }
 0x117   : > { %3697 = vrot.lane.b32.xlu1 %v4255_v4, %s3955_s26  ;;  %3166 = vmatmul.mubr.msk.bf16.vlgmr.msra.gmra.mrb[0].mxu0 %vm1382_vm7, %v1308_v13 }
 0x118   : > { %3692 = vrot.lane.b32.xlu0 %v4255_v4, %s3956_s27  ;;  %v4401_v22 = vpop.permute.xlu0 %3432  ;;  %v3438_v25 = vpop.permute.xlu1 %3437 }
 0x119   : > { %v3440_v28 = vunpack.i.h.bf16 %v3438_v25  ;;  %v3439_v29 = vunpack.i.l.bf16 %v3438_v25  ;;  %v3435_v32 = vunpack.i.h.bf16 %v4401_v22  ;;  %v3434_v33 = vunpack.i.l.bf16 %v4401_v22 }
 0x11b   : > { %v859_v34 = vsel %vm854_vm6, %v842_v30, %v3439_v29  ;;  %v860_v35 = vsel %vm854_vm6, %v843_v49, %v3440_v28  ;;  %3707 = vrot.lane.b32.xlu1 %v4279_v21, %s3955_s26  ;;  %v845_v51 = vsel %vm837_vm5, %v4188_v7, %v3435_v32  ;;  %v844_v10 = vsel %vm837_vm5, %v4171_v54, %v3434_v33 }
 0x11c   : > { %3702 = vrot.lane.b32.xlu0 %v4259_v5, %s3949_s8  ;;  %v1309_v36 = vpack.c.bf16 %v860_v35, %v859_v34 }
 0x11d   : > { %v3443_v44 = vpop.permute.xlu0 %3442  ;;  %v4428_v56 = vpop.permute.xlu1 %3447 }
 0x11e   : > { %v3445_v47 = vunpack.i.h.bf16 %v3443_v44  ;;  %v3444_v48 = vunpack.i.l.bf16 %v3443_v44  ;;  %3169 = vmatprep.mubr.msk.bf16.mxu0 %vm1382_vm7, %v1309_v36  ;;  %v3450_v61 = vunpack.i.h.bf16 %v4428_v56  ;;  %v3449_v0 = vunpack.i.l.bf16 %v4428_v56 }
 0x11f   : > { %3717 = vrot.lane.b32.xlu1 %v4279_v21, %s3956_s27 }
 0x120   : > { %v861_v5 = vsel %vm854_vm6, %v844_v10, %v3444_v48  ;;  %v862_v59 = vsel %vm854_vm6, %v845_v51, %v3445_v47  ;;  %3712 = vrot.lane.b32.xlu0 %v4275_v18, %s3949_s8  ;;  %v847_v18 = vsel %vm837_vm5, %v4208_v19, %v3450_v61 }
 0x121   : > { %v1310_v60 = vpack.c.bf16 %v862_v59, %v861_v5 }
 0x123   : > { %3727 = vrot.lane.b32.xlu1 %v4292_v38, %s3948_s30  ;;  %3170 = vmatmul.mubr.msk.bf16.gmra.mrb[4].mxu0 %vm1382_vm7, %v1310_v60  ;;  %v846_v38 = vsel %vm837_vm5, %v4191_v8, %v3449_v0 }
 0x124   : > { %3722 = vrot.lane.b32.xlu0 %v4296_v41, %s3956_s27  ;;  %v4443_v1 = vpop.permute.xlu0 %3452  ;;  %v3458_v2 = vpop.permute.xlu1 %3457 }
 0x125   : > { %v3460_v3 = vunpack.i.h.bf16 %v3458_v2  ;;  %v3459_v24 = vunpack.i.l.bf16 %v3458_v2  ;;  %v3455_v9 = vunpack.i.h.bf16 %v4443_v1  ;;  %v3454_v12 = vunpack.i.l.bf16 %v4443_v1 }
 0x127   : > { %v863_v41 = vsel %vm854_vm6, %v846_v38, %v3459_v24  ;;  %v864_v13 = vsel %vm854_vm6, %v847_v18, %v3460_v3  ;;  %3737 = vrot.lane.b32.xlu1 %v4175_v57, %s3948_s30  ;;  %v849_v34 = vsel %vm837_vm5, %v4228_v42, %v3455_v9  ;;  %v848_v57 = vsel %vm837_vm5, %v4211_v20, %v3454_v12 }
 0x128   : > { %3732 = vrot.lane.b32.xlu0 %v4159_v45, %s3948_s30  ;;  %v1311_v25 = vpack.c.bf16 %v864_v13, %v863_v41 }
 0x129   : > { %v3463_v28 = vpop.permute.xlu0 %3462  ;;  %v4461_v29 = vpop.permute.xlu1 %3467 }
 0x12a   : > { %v3465_v49 = vunpack.i.h.bf16 %v3463_v28  ;;  %v3464_v30 = vunpack.i.l.bf16 %v3463_v28  ;;  %3173 = vmatprep.mubr.msk.bf16.mxu0 %vm1382_vm7, %v1311_v25  ;;  %v3470_v36 = vunpack.i.h.bf16 %v4461_v29  ;;  %v3469_v44 = vunpack.i.l.bf16 %v4461_v29 }
 0x12b   : > { %3747 = vrot.lane.b32.xlu1 %v4215_v23, %s3948_s30 }
 0x12c   : > { %v865_v45 = vsel %vm854_vm6, %v848_v57, %v3464_v30  ;;  %v866_v35 = vsel %vm854_vm6, %v849_v34, %v3465_v49  ;;  %3742 = vrot.lane.b32.xlu0 %v4199_v14, %s3948_s30  ;;  %v851_v23 = vsel %vm837_vm5, %v4248_v62, %v3470_v36  ;;  %v850_v5 = vsel %vm837_vm5, %v4231_v43, %v3469_v44 }
 0x12d   : > { %v1312_v47 = vpack.c.bf16 %v866_v35, %v865_v45 }
 0x12e   : > { %v3478_v48 = vpop.permute.xlu1 %3477  ;;  %v4491_v14 = vpop.permute.xlu0 %3472 }
 0x12f   : > { %v3480_v51 = vunpack.i.h.bf16 %v3478_v48  ;;  %v3479_v10 = vunpack.i.l.bf16 %v3478_v48  ;;  %3757 = vrot.lane.b32.xlu1 %v4255_v4, %s3948_s30  ;;  %3174 = vmatmul.mubr.msk.bf16.gmra.mrb[8].mxu0 %vm1382_vm7, %v1312_v47  ;;  %v3475_v2 = vunpack.i.h.bf16 %v4491_v14  ;;  %v3474_v3 = vunpack.i.l.bf16 %v4491_v14 }
 0x130   : > { %3752 = vrot.lane.b32.xlu0 %v4239_v50, %s3948_s30 }
 0x131   : > { %v867_v59 = vsel %vm854_vm6, %v850_v5, %v3479_v10  ;;  %v868_v4 = vsel %vm854_vm6, %v851_v23, %v3480_v51  ;;  %v853_v41 = vsel %vm837_vm5, %v4271_v16, %v3475_v2  ;;  %v852_v13 = vsel %vm837_vm5, %v4251_v63, %v3474_v3 }
 0x132   : > { %v1313_v60 = vpack.c.bf16 %v868_v4, %v867_v59 }
 0x133   : > { %1272 = vrot.lane.b32.xlu1 %v4289_v37, %s3951_s20 }
 0x134   : > { %3762 = vrot.lane.b32.xlu0 %v4279_v21, %s3948_s30  ;;  %3177 = vmatprep.mubr.msk.bf16.mxu0 %vm1382_vm7, %v1313_v60  ;;  %s3958_s30 = smov 96  }
 0x135   : > { %v3488_v24 = vpop.permute.xlu1 %3487  ;;  %v3483_v18 = vpop.permute.xlu0 %3482 }
 0x136   : > { %v3485_v50 = vunpack.i.h.bf16 %v3483_v18  ;;  %v3484_v38 = vunpack.i.l.bf16 %v3483_v18  ;;  %v3490_v57 = vunpack.i.h.bf16 %v3488_v24  ;;  %v3489_v45 = vunpack.i.l.bf16 %v3488_v24 }
 0x138   : > { %v870_v37 = vsel %vm854_vm6, %v853_v41, %v3485_v50  ;;  %v869_v21 = vsel %vm854_vm6, %v852_v13, %v3484_v38 }
 0x139   : > { %v1314_v25 = vpack.c.bf16 %v870_v37, %v869_v21  ;;  %v3498_v28 = vpop.permute.xlu1 %3497  ;;  %v3493_v49 = vpop.permute.xlu0 %3492 }
 0x13a   : > { %v3495_v30 = vunpack.i.h.bf16 %v3493_v49  ;;  %v3494_v34 = vunpack.i.l.bf16 %v3493_v49  ;;  %v3500_v18 = vunpack.i.h.bf16 %v3498_v28  ;;  %v3499_v50 = vunpack.i.l.bf16 %v3498_v28 }
 0x13b   : > { %3178 = vmatmul.mubr.msk.bf16.gmra.mrb[12].mxu0 %vm1382_vm7, %v1314_v25 }
 0x13c   : > { %v1017_v10 = vsel %vm837_vm5, %v3490_v57, %v3495_v30  ;;  %v1016_v23 = vsel %vm837_vm5, %v3489_v45, %v3494_v34 }
 0x13d   : > { %v3508_v35 = vpop.permute.xlu1 %3507  ;;  %v3503_v47 = vpop.permute.xlu0 %3502 }
 0x13e   : > { %v3510_v48 = vunpack.i.h.bf16 %v3508_v35  ;;  %v3509_v51 = vunpack.i.l.bf16 %v3508_v35  ;;  %v3505_v5 = vunpack.i.h.bf16 %v3503_v47  ;;  %v3504_v59 = vunpack.i.l.bf16 %v3503_v47 }
 0x140   : > { %v1032_v4 = vsel %vm854_vm6, %v1016_v23, %v3509_v51  ;;  %v1033_v60 = vsel %vm854_vm6, %v1017_v10, %v3510_v48  ;;  %v1019_v21 = vsel %vm837_vm5, %v3500_v18, %v3505_v5  ;;  %v1018_v25 = vsel %vm837_vm5, %v3499_v50, %v3504_v59 }
 0x141   : > { %v1315_v38 = vpack.c.bf16 %v1033_v60, %v1032_v4  ;;  %v3518_v41 = vpop.permute.xlu1 %3517  ;;  %v3513_v13 = vpop.permute.xlu0 %3512 }
 0x142   : > { %v3515_v24 = vunpack.i.h.bf16 %v3513_v13  ;;  %v3514_v37 = vunpack.i.l.bf16 %v3513_v13  ;;  %v3520_v47 = vunpack.i.h.bf16 %v3518_v41  ;;  %v3519_v48 = vunpack.i.l.bf16 %v3518_v41 }
 0x143   : > { %3181 = vmatprep.mubr.msk.bf16.mxu0 %vm1382_vm7, %v1315_v38 }
 0x144   : > { %v1034_v49 = vsel %vm854_vm6, %v1018_v25, %v3514_v37  ;;  %v1035_v30 = vsel %vm854_vm6, %v1019_v21, %v3515_v24 }
 0x145   : > { %v1316_v34 = vpack.c.bf16 %v1035_v30, %v1034_v49  ;;  %v3528_v57 = vpop.permute.xlu1 %3527  ;;  %v3523_v45 = vpop.permute.xlu0 %3522 }
 0x146   : > { %v3525_v35 = vunpack.i.h.bf16 %v3523_v45  ;;  %v3524_v28 = vunpack.i.l.bf16 %v3523_v45  ;;  %v3530_v13 = vunpack.i.h.bf16 %v3528_v57  ;;  %v3529_v24 = vunpack.i.l.bf16 %v3528_v57 }
 0x147   : > { %3182 = vmatmul.mubr.msk.bf16.gmra.mrb[16].mxu0 %vm1382_vm7, %v1316_v34 }
 0x148   : > { %v1021_v59 = vsel %vm837_vm5, %v3520_v47, %v3525_v35  ;;  %v1020_v4 = vsel %vm837_vm5, %v3519_v48, %v3524_v28 }
 0x149   : > { %v3538_v51 = vpop.permute.xlu1 %3537  ;;  %v3533_v10 = vpop.permute.xlu0 %3532 }
 0x14a   : > { %v3540_v23 = vunpack.i.h.bf16 %v3538_v51  ;;  %v3539_v5 = vunpack.i.l.bf16 %v3538_v51  ;;  %v3535_v60 = vunpack.i.h.bf16 %v3533_v10  ;;  %v3534_v18 = vunpack.i.l.bf16 %v3533_v10 }
 0x14c   : > { %v1036_v50 = vsel %vm854_vm6, %v1020_v4, %v3539_v5  ;;  %v1037_v38 = vsel %vm854_vm6, %v1021_v59, %v3540_v23  ;;  %v1023_v30 = vsel %vm837_vm5, %v3530_v13, %v3535_v60  ;;  %v1022_v34 = vsel %vm837_vm5, %v3529_v24, %v3534_v18 }
 0x14d   : > { %v1317_v37 = vpack.c.bf16 %v1037_v38, %v1036_v50  ;;  %v3548_v21 = vpop.permute.xlu1 %3547  ;;  %v3543_v25 = vpop.permute.xlu0 %3542 }
 0x14e   : > { %v3545_v41 = vunpack.i.h.bf16 %v3543_v25  ;;  %v3544_v49 = vunpack.i.l.bf16 %v3543_v25  ;;  %v3550_v10 = vunpack.i.h.bf16 %v3548_v21  ;;  %v3549_v23 = vunpack.i.l.bf16 %v3548_v21 }
 0x14f   : > { %3185 = vmatprep.mubr.msk.bf16.mxu0 %vm1382_vm7, %v1317_v37 }
 0x150   : > { %v1038_v45 = vsel %vm854_vm6, %v1022_v34, %v3544_v49  ;;  %v1039_v35 = vsel %vm854_vm6, %v1023_v30, %v3545_v41 }
 0x151   : > { %v1318_v28 = vpack.c.bf16 %v1039_v35, %v1038_v45  ;;  %v3558_v47 = vpop.permute.xlu1 %3557  ;;  %v3553_v48 = vpop.permute.xlu0 %3552 }
 0x152   : > { %v3555_v51 = vunpack.i.h.bf16 %v3553_v48  ;;  %v3554_v57 = vunpack.i.l.bf16 %v3553_v48  ;;  %v3560_v25 = vunpack.i.h.bf16 %v3558_v47  ;;  %v3559_v41 = vunpack.i.l.bf16 %v3558_v47 }
 0x153   : > { %3186 = vmatmul.mubr.msk.bf16.gmra.mrb[20].mxu0 %vm1382_vm7, %v1318_v28 }
 0x154   : > { %v1025_v18 = vsel %vm837_vm5, %v3550_v10, %v3555_v51  ;;  %v1024_v50 = vsel %vm837_vm5, %v3549_v23, %v3554_v57 }
 0x155   : > { %v3568_v5 = vpop.permute.xlu1 %3567  ;;  %v3563_v59 = vpop.permute.xlu0 %3562 }
 0x156   : > { %v3570_v4 = vunpack.i.h.bf16 %v3568_v5  ;;  %v3569_v60 = vunpack.i.l.bf16 %v3568_v5  ;;  %v3565_v38 = vunpack.i.h.bf16 %v3563_v59  ;;  %v3564_v13 = vunpack.i.l.bf16 %v3563_v59 }
 0x158   : > { %v1040_v24 = vsel %vm854_vm6, %v1024_v50, %v3569_v60  ;;  %v1041_v37 = vsel %vm854_vm6, %v1025_v18, %v3570_v4  ;;  %v1027_v35 = vsel %vm837_vm5, %v3560_v25, %v3565_v38  ;;  %v1026_v28 = vsel %vm837_vm5, %v3559_v41, %v3564_v13 }
 0x159   : > { %v1319_v49 = vpack.c.bf16 %v1041_v37, %v1040_v24  ;;  %v3578_v30 = vpop.permute.xlu1 %3577  ;;  %v3573_v34 = vpop.permute.xlu0 %3572 }
 0x15a   : > { %v3575_v21 = vunpack.i.h.bf16 %v3573_v34  ;;  %v3574_v45 = vunpack.i.l.bf16 %v3573_v34  ;;  %v3580_v59 = vunpack.i.h.bf16 %v3578_v30  ;;  %v3579_v4 = vunpack.i.l.bf16 %v3578_v30 }
 0x15b   : > { %3189 = vmatprep.mubr.msk.bf16.mxu0 %vm1382_vm7, %v1319_v49 }
 0x15c   : > { %v1042_v48 = vsel %vm854_vm6, %v1026_v28, %v3574_v45  ;;  %v1043_v51 = vsel %vm854_vm6, %v1027_v35, %v3575_v21 }
 0x15d   : > { %v1320_v57 = vpack.c.bf16 %v1043_v51, %v1042_v48  ;;  %v3588_v10 = vpop.permute.xlu1 %3587  ;;  %v3583_v23 = vpop.permute.xlu0 %3582 }
 0x15e   : > { %v3585_v5 = vunpack.i.h.bf16 %v3583_v23  ;;  %v3584_v47 = vunpack.i.l.bf16 %v3583_v23  ;;  %v3590_v34 = vunpack.i.h.bf16 %v3588_v10  ;;  %v3589_v21 = vunpack.i.l.bf16 %v3588_v10 }
 0x15f   : > { %3190 = vmatmul.mubr.msk.bf16.gmra.mrb[24].mxu0 %vm1382_vm7, %v1320_v57 }
 0x160   : > { %v1029_v13 = vsel %vm837_vm5, %v3580_v59, %v3585_v5  ;;  %v1028_v24 = vsel %vm837_vm5, %v3579_v4, %v3584_v47 }
 0x161   : > { %v3598_v60 = vpop.permute.xlu1 %3597  ;;  %v3593_v18 = vpop.permute.xlu0 %3592 }
 0x162   : > { %v3600_v50 = vunpack.i.h.bf16 %v3598_v60  ;;  %v3599_v38 = vunpack.i.l.bf16 %v3598_v60  ;;  %v3595_v37 = vunpack.i.h.bf16 %v3593_v18  ;;  %v3594_v25 = vunpack.i.l.bf16 %v3593_v18 }
 0x164   : > { %v1044_v41 = vsel %vm854_vm6, %v1028_v24, %v3599_v38  ;;  %v1045_v49 = vsel %vm854_vm6, %v1029_v13, %v3600_v50  ;;  %v1031_v51 = vsel %vm837_vm5, %v3590_v34, %v3595_v37  ;;  %v1030_v57 = vsel %vm837_vm5, %v3589_v21, %v3594_v25 }
 0x165   : > { %v1321_v45 = vpack.c.bf16 %v1045_v49, %v1044_v41  ;;  %v3608_v35 = vpop.permute.xlu1 %3607  ;;  %v3603_v28 = vpop.permute.xlu0 %3602 }
 0x166   : > { %v3605_v30 = vunpack.i.h.bf16 %v3603_v28  ;;  %v3604_v48 = vunpack.i.l.bf16 %v3603_v28  ;;  %v3610_v18 = vunpack.i.h.bf16 %v3608_v35  ;;  %v3609_v50 = vunpack.i.l.bf16 %v3608_v35 }
 0x167   : > { %3193 = vmatprep.mubr.msk.bf16.mxu0 %vm1382_vm7, %v1321_v45 }
 0x168   : > { %v1046_v23 = vsel %vm854_vm6, %v1030_v57, %v3604_v48  ;;  %v1047_v5 = vsel %vm854_vm6, %v1031_v51, %v3605_v30 }
 0x169   : > { %v1322_v47 = vpack.c.bf16 %v1047_v5, %v1046_v23  ;;  %v3618_v59 = vpop.permute.xlu1 %3617  ;;  %v3613_v4 = vpop.permute.xlu0 %3612 }
 0x16a   : > { %v3615_v60 = vunpack.i.h.bf16 %v3613_v4  ;;  %v3614_v10 = vunpack.i.l.bf16 %v3613_v4  ;;  %v3620_v28 = vunpack.i.h.bf16 %v3618_v59  ;;  %v3619_v30 = vunpack.i.l.bf16 %v3618_v59 }
 0x16b   : > { %3194 = vmatmul.mubr.msk.bf16.gmra.mrb[28].mxu0 %vm1382_vm7, %v1322_v47 }
 0x16c   : > { %v1193_v25 = vsel %vm837_vm5, %v3610_v18, %v3615_v60  ;;  %v1192_v41 = vsel %vm837_vm5, %v3609_v50, %v3614_v10 }
 0x16d   : > { %v3628_v38 = vpop.permute.xlu1 %3627  ;;  %v3623_v13 = vpop.permute.xlu0 %3622 }
 0x16e   : > { %v3630_v24 = vunpack.i.h.bf16 %v3628_v38  ;;  %v3629_v37 = vunpack.i.l.bf16 %v3628_v38  ;;  %v3625_v49 = vunpack.i.h.bf16 %v3623_v13  ;;  %v3624_v34 = vunpack.i.l.bf16 %v3623_v13 }
 0x170   : > { %v1208_v21 = vsel %vm854_vm6, %v1192_v41, %v3629_v37  ;;  %v1209_v45 = vsel %vm854_vm6, %v1193_v25, %v3630_v24  ;;  %v1195_v5 = vsel %vm837_vm5, %v3620_v28, %v3625_v49  ;;  %v1194_v47 = vsel %vm837_vm5, %v3619_v30, %v3624_v34 }
 0x171   : > { %v1323_v48 = vpack.c.bf16 %v1209_v45, %v1208_v21  ;;  %v3638_v51 = vpop.permute.xlu1 %3637  ;;  %v3633_v57 = vpop.permute.xlu0 %3632 }
 0x172   : > { %v3635_v35 = vunpack.i.h.bf16 %v3633_v57  ;;  %v3634_v23 = vunpack.i.l.bf16 %v3633_v57  ;;  %v3640_v13 = vunpack.i.h.bf16 %v3638_v51  ;;  %v3639_v24 = vunpack.i.l.bf16 %v3638_v51 }
 0x173   : > { %3197 = vmatprep.mubr.msk.bf16.mxu0 %vm1382_vm7, %v1323_v48 }
 0x174   : > { %v1210_v4 = vsel %vm854_vm6, %v1194_v47, %v3634_v23  ;;  %v1211_v60 = vsel %vm854_vm6, %v1195_v5, %v3635_v35 }
 0x175   : > { %v1324_v10 = vpack.c.bf16 %v1211_v60, %v1210_v4  ;;  %v3648_v18 = vpop.permute.xlu1 %3647  ;;  %v3643_v50 = vpop.permute.xlu0 %3642 }
 0x176   : > { %v3645_v38 = vunpack.i.h.bf16 %v3643_v50  ;;  %v3644_v59 = vunpack.i.l.bf16 %v3643_v50  ;;  %v3650_v57 = vunpack.i.h.bf16 %v3648_v18  ;;  %v3649_v35 = vunpack.i.l.bf16 %v3648_v18 }
 0x177   : > { %3198 = vmatmul.mubr.msk.bf16.gmra.mrb[32].mxu0 %vm1382_vm7, %v1324_v10 }
 0x178   : > { %v1197_v34 = vsel %vm837_vm5, %v3640_v13, %v3645_v38  ;;  %v1196_v21 = vsel %vm837_vm5, %v3639_v24, %v3644_v59 }
 0x179   : > { %v3658_v37 = vpop.permute.xlu1 %3657  ;;  %v3653_v25 = vpop.permute.xlu0 %3652 }
 0x17a   : > { %v3660_v41 = vunpack.i.h.bf16 %v3658_v37  ;;  %v3659_v49 = vunpack.i.l.bf16 %v3658_v37  ;;  %v3655_v45 = vunpack.i.h.bf16 %v3653_v25  ;;  %v3654_v28 = vunpack.i.l.bf16 %v3653_v25 }
 0x17c   : > { %v1212_v30 = vsel %vm854_vm6, %v1196_v21, %v3659_v49  ;;  %v1213_v48 = vsel %vm854_vm6, %v1197_v34, %v3660_v41  ;;  %v1199_v60 = vsel %vm837_vm5, %v3650_v57, %v3655_v45  ;;  %v1198_v10 = vsel %vm837_vm5, %v3649_v35, %v3654_v28 }
 0x17d   : > { %v1325_v23 = vpack.c.bf16 %v1213_v48, %v1212_v30  ;;  %v3668_v5 = vpop.permute.xlu1 %3667  ;;  %v3663_v47 = vpop.permute.xlu0 %3662 }
 0x17e   : > { %v3665_v51 = vunpack.i.h.bf16 %v3663_v47  ;;  %v3664_v4 = vunpack.i.l.bf16 %v3663_v47  ;;  %v3670_v25 = vunpack.i.h.bf16 %v3668_v5  ;;  %v3669_v41 = vunpack.i.l.bf16 %v3668_v5 }
 0x17f   : > { %3201 = vmatprep.mubr.msk.bf16.mxu0 %vm1382_vm7, %v1325_v23 }
 0x180   : > { %v1214_v50 = vsel %vm854_vm6, %v1198_v10, %v3664_v4  ;;  %v1215_v38 = vsel %vm854_vm6, %v1199_v60, %v3665_v51 }
 0x181   : > { %v1326_v59 = vpack.c.bf16 %v1215_v38, %v1214_v50  ;;  %v3678_v13 = vpop.permute.xlu1 %3677  ;;  %v3673_v24 = vpop.permute.xlu0 %3672 }
 0x182   : > { %v3675_v37 = vunpack.i.h.bf16 %v3673_v24  ;;  %v3674_v18 = vunpack.i.l.bf16 %v3673_v24  ;;  %v3680_v4 = vunpack.i.h.bf16 %v3678_v13  ;;  %v3679_v60 = vunpack.i.l.bf16 %v3678_v13 }
 0x183   : > { %3202 = vmatmul.mubr.msk.bf16.gmra.mrb[36].mxu0 %vm1382_vm7, %v1326_v59 }
 0x184   : > { %v1201_v28 = vsel %vm837_vm5, %v3670_v25, %v3675_v37  ;;  %v1200_v30 = vsel %vm837_vm5, %v3669_v41, %v3674_v18 }
 0x185   : > { %v3688_v49 = vpop.permute.xlu1 %3687  ;;  %v3683_v45 = vpop.permute.xlu0 %3682 }
 0x186   : > { %v3690_v34 = vunpack.i.h.bf16 %v3688_v49  ;;  %v3689_v21 = vunpack.i.l.bf16 %v3688_v49  ;;  %v3685_v35 = vunpack.i.h.bf16 %v3683_v45  ;;  %v3684_v23 = vunpack.i.l.bf16 %v3683_v45 }
 0x188   : > { %v1216_v48 = vsel %vm854_vm6, %v1200_v30, %v3689_v21  ;;  %v1217_v57 = vsel %vm854_vm6, %v1201_v28, %v3690_v34  ;;  %v1203_v38 = vsel %vm837_vm5, %v3680_v4, %v3685_v35  ;;  %v1202_v59 = vsel %vm837_vm5, %v3679_v60, %v3684_v23 }
 0x189   : > { %v1327_v47 = vpack.c.bf16 %v1217_v57, %v1216_v48  ;;  %v3698_v51 = vpop.permute.xlu1 %3697 }
 0x18a   : > { %v3693_v10 = vpop.permute.xlu0 %3692  ;;  %v3700_v13 = vunpack.i.h.bf16 %v3698_v51  ;;  %v3699_v21 = vunpack.i.l.bf16 %v3698_v51 }
 0x18b   : > { %v3695_v5 = vunpack.i.h.bf16 %v3693_v10  ;;  %v3694_v50 = vunpack.i.l.bf16 %v3693_v10  ;;  %3205 = vmatprep.mubr.msk.bf16.mxu0 %vm1382_vm7, %v1327_v47 }
 0x18d   : > { %v1218_v24 = vsel %vm854_vm6, %v1202_v59, %v3694_v50  ;;  %v1219_v37 = vsel %vm854_vm6, %v1203_v38, %v3695_v5  ;;  %v3708_v18 = vpop.permute.xlu1 %3707 }
 0x18e   : > { %v1328_v25 = vpack.c.bf16 %v1219_v37, %v1218_v24  ;;  %v3703_v41 = vpop.permute.xlu0 %3702  ;;  %v3710_v50 = vunpack.i.h.bf16 %v3708_v18  ;;  %v3709_v38 = vunpack.i.l.bf16 %v3708_v18 }
 0x18f   : > { %v3705_v49 = vunpack.i.h.bf16 %v3703_v41  ;;  %v3704_v34 = vunpack.i.l.bf16 %v3703_v41 }
 0x190   : > { %3206 = vmatmul.mubr.msk.bf16.gmra.mrb[40].mxu0 %vm1382_vm7, %v1328_v25 }
 0x191   : > { %v3718_v45 = vpop.permute.xlu1 %3717  ;;  %v1205_v57 = vsel %vm837_vm5, %v3700_v13, %v3705_v49  ;;  %v1204_v35 = vsel %vm837_vm5, %v3699_v21, %v3704_v34 }
 0x192   : > { %v3720_v28 = vunpack.i.h.bf16 %v3718_v45  ;;  %v3719_v30 = vunpack.i.l.bf16 %v3718_v45  ;;  %v3713_v48 = vpop.permute.xlu0 %3712 }
 0x193   : > { %v3715_v4 = vunpack.i.h.bf16 %v3713_v48  ;;  %v3714_v60 = vunpack.i.l.bf16 %v3713_v48 }
 0x194   : > { %v1220_v23 = vsel %vm854_vm6, %v1204_v35, %v3719_v30  ;;  %v1221_v47 = vsel %vm854_vm6, %v1205_v57, %v3720_v28 }
 0x195   : > { %v1329_v10 = vpack.c.bf16 %v1221_v47, %v1220_v23  ;;  %v3728_v5 = vpop.permute.xlu1 %3727  ;;  %v1207_v41 = vsel %vm837_vm5, %v3710_v50, %v3715_v4  ;;  %v1206_v49 = vsel %vm837_vm5, %v3709_v38, %v3714_v60 }
 0x196   : > { %v3730_v59 = vunpack.i.h.bf16 %v3728_v5  ;;  %v3729_v51 = vunpack.i.l.bf16 %v3728_v5  ;;  %v3723_v24 = vpop.permute.xlu0 %3722 }
 0x197   : > { %v3725_v37 = vunpack.i.h.bf16 %v3723_v24  ;;  %v3724_v25 = vunpack.i.l.bf16 %v3723_v24  ;;  %3209 = vmatprep.mubr.msk.bf16.mxu0 %vm1382_vm7, %v1329_v10 }
 0x198   : > { %v1276_v34 = vsel %vm837_vm5, %v3730_v59, %v4134_v27  ;;  %v1275_v13 = vsel %vm837_vm5, %v3729_v51, %v4131_v26 }
 0x199   : > { %v1222_v21 = vsel %vm854_vm6, %v1206_v49, %v3724_v25  ;;  %v1223_v18 = vsel %vm854_vm6, %v1207_v41, %v3725_v37  ;;  %v3738_v45 = vpop.permute.xlu1 %3737  ;;  %v1291_v28 = vsel %vm854_vm6, %v1275_v13, %v3410_v46  ;;  %v1292_v30 = vsel %vm854_vm6, %v1276_v34, %v3414_v55 }
 0x19a   : > { %v1330_v48 = vpack.c.bf16 %v1223_v18, %v1222_v21  ;;  %v3740_v57 = vunpack.i.h.bf16 %v3738_v45  ;;  %v3739_v35 = vunpack.i.l.bf16 %v3738_v45  ;;  %v3733_v27 = vpop.permute.xlu0 %3732  ;;  %v1331_v23 = vpack.c.bf16 %v1292_v30, %v1291_v28 }
 0x19b   : > { %v3735_v47 = vunpack.i.h.bf16 %v3733_v27  ;;  %v3734_v26 = vunpack.i.l.bf16 %v3733_v27 }
 0x19c   : > { %3210 = vmatmul.mubr.msk.bf16.gmra.mrb[44].mxu0 %vm1382_vm7, %v1330_v48  ;;  %v1280_v4 = vsel %vm837_vm5, %v3740_v57, %v4171_v54  ;;  %v1279_v31 = vsel %vm837_vm5, %v3739_v35, %v4168_v53 }
 0x19d   : > { %v1278_v46 = vsel %vm837_vm5, %v3735_v47, %v4151_v40  ;;  %v1277_v55 = vsel %vm837_vm5, %v3734_v26, %v4148_v39  ;;  %3213 = vmatprep.mubr.msk.bf16.mxu0 %vm1382_vm7, %v1331_v23  ;;  %v3748_v60 = vpop.permute.xlu1 %3747  ;;  %v1295_v40 = vsel %vm854_vm6, %v1279_v31, %v3430_v11  ;;  %v1296_v39 = vsel %vm854_vm6, %v1280_v4, %v3434_v33 }
 0x19e   : > { %v3743_v10 = vpop.permute.xlu0 %3742  ;;  %v1293_v5 = vsel %vm854_vm6, %v1277_v55, %v3415_v52  ;;  %v1294_v54 = vsel %vm854_vm6, %v1278_v46, %v3429_v17  ;;  %v3750_v38 = vunpack.i.h.bf16 %v3748_v60  ;;  %v3749_v59 = vunpack.i.l.bf16 %v3748_v60  ;;  %v4700_v55 = vld [vmem:[%s5227_s2] ss:$0 sm:$0xff] }
 0x19f   : > { %v3745_v50 = vunpack.i.h.bf16 %v3743_v10  ;;  %v3744_v53 = vunpack.i.l.bf16 %v3743_v10  ;;  %v1332_v51 = vpack.c.bf16 %v1294_v54, %v1293_v5  ;;  %v1333_v58 = vpack.c.bf16 %v1296_v39, %v1295_v40 }
 0x1a0   : > { %v1284_v6 = vsel %vm837_vm5, %v3750_v38, %v4211_v20  ;;  %v1283_v11 = vsel %vm837_vm5, %v3749_v59, %v4208_v19 }
 0x1a1   : > { %v1282_v52 = vsel %vm837_vm5, %v3745_v50, %v4191_v8  ;;  %v1281_v17 = vsel %vm837_vm5, %v3744_v53, %v4188_v7  ;;  %v3758_v33 = vpop.permute.xlu1 %3757  ;;  %v1299_v20 = vsel %vm854_vm6, %v1283_v11, %v3450_v61  ;;  %v1300_v19 = vsel %vm854_vm6, %v1284_v6, %v3454_v12 }
 0x1a2   : > { %v3753_v24 = vpop.permute.xlu0 %3752  ;;  %v1297_v37 = vsel %vm854_vm6, %v1281_v17, %v3435_v32  ;;  %v1298_v7 = vsel %vm854_vm6, %v1282_v52, %v3449_v0  ;;  %v3760_v41 = vunpack.i.h.bf16 %v3758_v33  ;;  %v3759_v49 = vunpack.i.l.bf16 %v3758_v33 }
 0x1a3   : > { %v3755_v8 = vunpack.i.h.bf16 %v3753_v24  ;;  %v3754_v25 = vunpack.i.l.bf16 %v3753_v24  ;;  %v1334_v34 = vpack.c.bf16 %v1298_v7, %v1297_v37  ;;  %v1335_v22 = vpack.c.bf16 %v1300_v19, %v1299_v20 }
 0x1a4   : > { %3214 = vmatmul.mubr.msk.bf16.gmra.mrb[48].mxu0 %vm1382_vm7, %v1332_v51  ;;  %v1288_v56 = vsel %vm837_vm5, %v3760_v41, %v4251_v63  ;;  %v1287_v61 = vsel %vm837_vm5, %v3759_v49, %v4248_v62 }
 0x1a5   : > { %3217 = vmatprep.mubr.msk.bf16.mxu0 %vm1382_vm7, %v1333_v58  ;;  %v1286_v32 = vsel %vm837_vm5, %v3755_v8, %v4231_v43  ;;  %v1285_v0 = vsel %vm837_vm5, %v3754_v25, %v4228_v42  ;;  %v1303_v63 = vsel %vm854_vm6, %v1287_v61, %v3470_v36  ;;  %v1304_v62 = vsel %vm854_vm6, %v1288_v56, %v3474_v3 }
 0x1a6   : > { %v3763_v13 = vpop.permute.xlu0 %3762  ;;  %v1301_v12 = vsel %vm854_vm6, %v1285_v0, %v3455_v9  ;;  %v1302_v43 = vsel %vm854_vm6, %v1286_v32, %v3469_v44  ;;  %v1337_v45 = vpack.c.bf16 %v1304_v62, %v1303_v63  ;;  %v1273_v44 = vpop.permute.xlu1 %1272 }
 0x1a7   : > { %v3765_v42 = vunpack.i.h.bf16 %v3763_v13  ;;  %v3764_v21 = vunpack.i.l.bf16 %v3763_v13  ;;  %v1336_v18 = vpack.c.bf16 %v1302_v43, %v1301_v12 }
 0x1a9   : > { %v1290_v1 = vsel %vm837_vm5, %v3765_v42, %v4268_v15  ;;  %v1289_v9 = vsel %vm837_vm5, %v3764_v21, %v4271_v16 }
 0x1aa   : > { %v1305_v29 = vsel %vm854_vm6, %v1289_v9, %v3475_v2  ;;  %v1306_v36 = vsel %vm854_vm6, %v1290_v1, %v1273_v44 }
 0x1ab   : > { %v1338_v3 = vpack.c.bf16 %v1306_v36, %v1305_v29 }
 0x1ac   : > { %3218 = vmatmul.mubr.msk.bf16.gmra.mrb[52].mxu0 %vm1382_vm7, %v1334_v34 }
 0x1ad   : > { %3221 = vmatprep.mubr.msk.bf16.mxu0 %vm1382_vm7, %v1335_v22 }
 0x1b4   : > { %3222 = vmatmul.mubr.msk.bf16.gmra.mrb[56].mxu0 %vm1382_vm7, %v1336_v18 }
 0x1b5   : > { %3225 = vmatprep.mubr.msk.bf16.mxu0 %vm1382_vm7, %v1337_v45 }
 0x1bc   : > { %3226 = vmatmul.mubr.msk.bf16.gmra.mrb[60].mxu0 %vm1382_vm7, %v1338_v3 }
 0x1ea   : > { %v3167_v28 = vpop.f32.mrb[0].mxu0 }
 0x1eb   : > { %v1517_v30 = vpop.f32.mrb[1].mxu0  ;;  %v1526_v60 = vadd.f32 %v3167_v28, %v4700_v55 }
 0x1ec   : > { %v3168_v15 = vpop.f32.mrb[2].mxu0  ;;  %v1518_v10 = vadd.f32 %v4700_v55, %v1517_v30 }
 0x1ed   : > { %v1520_v48 = vpop.f32.mrb[3].mxu0  ;;  %v1529_v54 = vadd.f32 %v3168_v15, %v4700_v55  ;;  %v1774_v59 = vmax.f32 %v1526_v60, 0.0 }
 0x1ee   : > { %v1521_v40 = vadd.f32 %v4700_v55, %v1520_v48  ;;  %v1772_v17 = vmax.f32 %v1518_v10, 0.0 }
 0x1ef   : > { %v1775_v24 = vmax.f32 %v1529_v54, 0.0 }
 0x1f0   : > { %v1773_v7 = vmax.f32 %v1521_v40, 0.0 }
 0x1f6   : > { %v3171_v57 = vpop.f32.mrb[4].mxu0 }
 0x1f7   : > { %v1533_v16 = vpop.f32.mrb[5].mxu0  ;;  %v1542_v34 = vadd.f32 %v3171_v57, %v4700_v55 }
 0x1f8   : > { %v3172_v35 = vpop.f32.mrb[6].mxu0  ;;  %v1534_v22 = vadd.f32 %v4700_v55, %v1533_v16 }
 0x1f9   : > { %v1536_v27 = vpop.f32.mrb[7].mxu0  ;;  %v1545_v0 = vadd.f32 %v3172_v35, %v4700_v55  ;;  %v1778_v42 = vmax.f32 %v1542_v34, 0.0 }
 0x1fa   : > { %v1537_v13 = vadd.f32 %v4700_v55, %v1536_v27  ;;  %v1776_v18 = vmax.f32 %v1534_v22, 0.0 }
 0x1fb   : > { %v1779_v9 = vmax.f32 %v1545_v0, 0.0 }
 0x1fc   : > { %v1777_v36 = vmax.f32 %v1537_v13, 0.0 }
 0x202   : > { %v4681_v23 = vpop.f32.mrb[8].mxu0 }
 0x203   : > { %v4683_v47 = vpop.f32.mrb[9].mxu0  ;;  %v1558_v16 = vadd.f32 %v4681_v23, %v4700_v55 }
 0x204   : > { %v4685_v14 = vpop.f32.mrb[10].mxu0  ;;  %v1550_v35 = vadd.f32 %v4700_v55, %v4683_v47 }
 0x205   : > { %v4687_v2 = vpop.f32.mrb[11].mxu0  ;;  %v1561_v60 = vadd.f32 %v4685_v14, %v4700_v55 }
 0x206   : > { %v1553_v54 = vadd.f32 %v4700_v55, %v4687_v2 }
 0x20e   : > { %v4689_v26 = vpop.f32.mrb[12].mxu0 }
 0x20f   : > { %v4691_v4 = vpop.f32.mrb[13].mxu0 }
 0x210   : > { %v4693_v31 = vpop.f32.mrb[14].mxu0 }
 0x211   : > { %v4695_v46 = vpop.f32.mrb[15].mxu0 }
 0x21a   : > { %v3183_v5 = vpop.f32.mrb[16].mxu0 }
 0x21b   : > { %v1590_v50 = vadd.f32 %v3183_v5, %v4700_v55  ;;  %v1581_v53 = vpop.f32.mrb[17].mxu0 }
 0x21c   : > { %v1582_v39 = vadd.f32 %v4700_v55, %v1581_v53  ;;  %v3184_v38 = vpop.f32.mrb[18].mxu0  ;;  %v1782_v53 = vmax.f32 %v1558_v16, 0.0 }
 0x21d   : > { %v1790_v51 = vmax.f32 %v1590_v50, 0.0  ;;  %v1593_v58 = vadd.f32 %v3184_v38, %v4700_v55  ;;  %v1584_v52 = vpop.f32.mrb[19].mxu0  ;;  %v1780_v38 = vmax.f32 %v1550_v35, 0.0 }
 0x21e   : > { %v1788_v6 = vmax.f32 %v1582_v39, 0.0  ;;  %v1585_v11 = vadd.f32 %v4700_v55, %v1584_v52 }
 0x21f   : > { %v1838_v33 = vmax.f32 %v1774_v59, %v1790_v51  ;;  %v1791_v37 = vmax.f32 %v1593_v58, 0.0  ;;  %v1783_v58 = vmax.f32 %v1561_v60, 0.0 }
 0x220   : > { %v1836_v8 = vmax.f32 %v1772_v17, %v1788_v6  ;;  %v1789_v25 = vmax.f32 %v1585_v11, 0.0  ;;  %v1781_v17 = vmax.f32 %v1553_v54, 0.0 }
 0x221   : > { %v1839_v20 = vmax.f32 %v1775_v24, %v1791_v37 }
 0x222   : > { %v1837_v19 = vmax.f32 %v1773_v7, %v1789_v25  ;;  %v1574_v7 = vadd.f32 %v4689_v26, %v4700_v55 }
 0x223   : > { %v1853_v41 = vmax.f32 %v1838_v33, %v1839_v20  ;;  %v1577_v20 = vadd.f32 %v4693_v31, %v4700_v55 }
 0x224   : > { %v1852_v49 = vmax.f32 %v1836_v8, %v1837_v19  ;;  %v1566_v8 = vadd.f32 %v4700_v55, %v4691_v4  ;;  %v1786_v22 = vmax.f32 %v1574_v7, 0.0 }
 0x225   : > { %1863 = vst.msk [vmem:[#allocation2 + $0x21] sm:$0xff] %vm1861_vm8, %v1853_v41 }
 0x226   : > { %v3187_v32 = vpop.f32.mrb[20].mxu0  ;;  %1862 = vst.msk [vmem:[#allocation2 + $0x11] sm:$0xff] %vm1861_vm8, %v1852_v49  ;;  %v1569_v49 = vadd.f32 %v4700_v55, %v4695_v46 }
 0x227   : > { %v1606_v56 = vadd.f32 %v3187_v32, %v4700_v55  ;;  %v1597_v61 = vpop.f32.mrb[21].mxu0 }
 0x228   : > { %v1598_v12 = vadd.f32 %v4700_v55, %v1597_v61  ;;  %v3188_v43 = vpop.f32.mrb[22].mxu0 }
 0x229   : > { %v1794_v21 = vmax.f32 %v1606_v56, 0.0  ;;  %v1609_v63 = vadd.f32 %v3188_v43, %v4700_v55  ;;  %v1600_v62 = vpop.f32.mrb[23].mxu0  ;;  %v1784_v56 = vmax.f32 %v1566_v8, 0.0 }
 0x22a   : > { %v1792_v45 = vmax.f32 %v1598_v12, 0.0  ;;  %v1601_v1 = vadd.f32 %v4700_v55, %v1600_v62  ;;  %v1787_v12 = vmax.f32 %v1577_v20, 0.0 }
 0x22b   : > { %v1842_v44 = vmax.f32 %v1778_v42, %v1794_v21  ;;  %v1795_v29 = vmax.f32 %v1609_v63, 0.0  ;;  %v1785_v42 = vmax.f32 %v1569_v49, 0.0 }
 0x22c   : > { %v1840_v3 = vmax.f32 %v1776_v18, %v1792_v45  ;;  %v1793_v28 = vmax.f32 %v1601_v1, 0.0 }
 0x22d   : > { %v1843_v30 = vmax.f32 %v1779_v9, %v1795_v29 }
 0x22e   : > { %v1841_v15 = vmax.f32 %v1777_v36, %v1793_v28 }
 0x22f   : > { %v1855_v48 = vmax.f32 %v1842_v44, %v1843_v30 }
 0x230   : > { %v1854_v57 = vmax.f32 %v1840_v3, %v1841_v15 }
 0x231   : > { %1865 = vst.msk [vmem:[#allocation2 + $0x41] sm:$0xff] %vm1861_vm8, %v1855_v48 }
 0x232   : > { %v3191_v27 = vpop.f32.mrb[24].mxu0  ;;  %1864 = vst.msk [vmem:[#allocation2 + $0x31] sm:$0xff] %vm1861_vm8, %v1854_v57 }
 0x233   : > { %v1622_v10 = vadd.f32 %v3191_v27, %v4700_v55  ;;  %v1613_v5 = vpop.f32.mrb[25].mxu0 }
 0x234   : > { %v1614_v50 = vadd.f32 %v4700_v55, %v1613_v5  ;;  %v3192_v23 = vpop.f32.mrb[26].mxu0 }
 0x235   : > { %v1798_v40 = vmax.f32 %v1622_v10, 0.0  ;;  %v1625_v39 = vadd.f32 %v3192_v23, %v4700_v55  ;;  %v1616_v47 = vpop.f32.mrb[27].mxu0  ;;  %v3957_v23 = vmov 0.0  }
 0x236   : > { %v1796_v59 = vmax.f32 %v1614_v50, 0.0  ;;  %v1617_v51 = vadd.f32 %v4700_v55, %v1616_v47  ;;  %287 = vst.msk [vmem:[#allocation2 + $0x10] sm:$0x1] %vm285_vm9, %v3957_v23  ;;  %288 = vst.msk [vmem:[#allocation2 + $0x20] sm:$0x1] %vm285_vm9, %v3957_v23 }
 0x237   : > { %v1846_v14 = vmax.f32 %v1782_v53, %v1798_v40  ;;  %v1799_v52 = vmax.f32 %v1625_v39, 0.0  ;;  %289 = vst.msk [vmem:[#allocation2 + $0x30] sm:$0x1] %vm285_vm9, %v3957_v23  ;;  %290 = vst.msk [vmem:[#allocation2 + $0x40] sm:$0x1] %vm285_vm9, %v3957_v23 }
 0x238   : > { %v1844_v6 = vmax.f32 %v1780_v38, %v1796_v59  ;;  %v1797_v11 = vmax.f32 %v1617_v51, 0.0  ;;  %291 = vst.msk [vmem:[#allocation2 + $0x50] sm:$0x1] %vm285_vm9, %v3957_v23  ;;  %292 = vst.msk [vmem:[#allocation2 + $0x60] sm:$0x1] %vm285_vm9, %v3957_v23 }
 0x239   : > { %v1847_v24 = vmax.f32 %v1783_v58, %v1799_v52  ;;  %293 = vst.msk [vmem:[#allocation2 + $0x70] sm:$0x1] %vm285_vm9, %v3957_v23  ;;  %294 = vst.msk [vmem:[#allocation2 + $0x80] sm:$0x1] %vm285_vm9, %v3957_v23 }
 0x23a   : > { %v1845_v2 = vmax.f32 %v1781_v17, %v1797_v11  ;;  %297 = vst.msk [vmem:[#allocation2 + $0x19] sm:$0x1] %vm285_vm9, %v3957_v23  ;;  %298 = vst.msk [vmem:[#allocation2 + $0x29] sm:$0x1] %vm285_vm9, %v3957_v23 }
 0x23b   : > { %v1857_v33 = vmax.f32 %v1846_v14, %v1847_v24  ;;  %299 = vst.msk [vmem:[#allocation2 + $0x39] sm:$0x1] %vm285_vm9, %v3957_v23  ;;  %300 = vst.msk [vmem:[#allocation2 + $0x49] sm:$0x1] %vm285_vm9, %v3957_v23 }
 0x23c   : > { %v1856_v37 = vmax.f32 %v1844_v6, %v1845_v2  ;;  %301 = vst.msk [vmem:[#allocation2 + $0x59] sm:$0x1] %vm285_vm9, %v3957_v23  ;;  %302 = vst.msk [vmem:[#allocation2 + $0x69] sm:$0x1] %vm285_vm9, %v3957_v23 }
 0x23d   : > { %1867 = vst.msk [vmem:[#allocation2 + $0x61] sm:$0xff] %vm1861_vm8, %v1857_v33 }
 0x23e   : > { %v3195_v25 = vpop.f32.mrb[28].mxu0  ;;  %1866 = vst.msk [vmem:[#allocation2 + $0x51] sm:$0xff] %vm1861_vm8, %v1856_v37 }
 0x23f   : > { %v1638_v19 = vadd.f32 %v3195_v25, %v4700_v55  ;;  %v1629_v41 = vpop.f32.mrb[29].mxu0  ;;  %303 = vst.msk [vmem:[#allocation2 + $0x79] sm:$0x1] %vm285_vm9, %v3957_v23  ;;  %304 = vst.msk [vmem:[#allocation2 + $0x89] sm:$0x1] %vm285_vm9, %v3957_v23 }
 0x240   : > { %v1630_v34 = vadd.f32 %v4700_v55, %v1629_v41  ;;  %v3196_v26 = vpop.f32.mrb[30].mxu0  ;;  %283 = vst.msk [vmem:[#allocation2 + $0x90] sm:$0xff] %vm278_vm10, %v3957_v23  ;;  %279 = vst.msk [vmem:[#allocation2] sm:$0xff] %vm278_vm10, %v3957_v23 }
 0x241   : > { %v1802_v32 = vmax.f32 %v1638_v19, 0.0  ;;  %v1641_v0 = vadd.f32 %v3196_v26, %v4700_v55  ;;  %v1632_v4 = vpop.f32.mrb[31].mxu0  ;;  %281 = vst.msk [vmem:[#allocation2 + $0x8] sm:$0x3] %vm280_vm11, %v3957_v23  ;;  %284 = vst.msk [vmem:[#allocation2 + $0x98] sm:$0x3] %vm280_vm11, %v3957_v23 }
 0x242   : > { %v1800_v61 = vmax.f32 %v1630_v34, 0.0  ;;  %v1633_v13 = vadd.f32 %v4700_v55, %v1632_v4  ;;  %295 = vst.msk [vmem:[#allocation2 + $0x90] sm:$0x1] %vm285_vm9, %v3957_v23  ;;  %296 = vst.msk [vmem:[#allocation2 + $0x9] sm:$0x1] %vm285_vm9, %v3957_v23 }
 0x243   : > { %v1850_v31 = vmax.f32 %v1786_v22, %v1802_v32  ;;  %v1803_v43 = vmax.f32 %v1641_v0, 0.0  ;;  %305 = vst.msk [vmem:[#allocation2 + $0x99] sm:$0x1] %vm285_vm9, %v3957_v23  ;;  %286 = vst.msk [vmem:[#allocation2] sm:$0x1] %vm285_vm9, %v3957_v23 }
 0x244   : > { %v1848_v21 = vmax.f32 %v1784_v56, %v1800_v61  ;;  %v1801_v63 = vmax.f32 %v1633_v13, 0.0 }
 0x245   : > { %v1851_v62 = vmax.f32 %v1787_v12, %v1803_v43 }
 0x246   : > { %v1849_v46 = vmax.f32 %v1785_v42, %v1801_v63 }
 0x247   : > { %v1859_v18 = vmax.f32 %v1850_v31, %v1851_v62 }
 0x248   : > { %v1858_v45 = vmax.f32 %v1848_v21, %v1849_v46 }
 0x249   : > { %1869 = vst.msk [vmem:[#allocation2 + $0x81] sm:$0xff] %vm1861_vm8, %v1859_v18 }
 0x24a   : > { %v3199_v1 = vpop.f32.mrb[32].mxu0  ;;  %1868 = vst.msk [vmem:[#allocation2 + $0x71] sm:$0xff] %vm1861_vm8, %v1858_v45 }
 0x24b   : > { %v1645_v9 = vpop.f32.mrb[33].mxu0  ;;  %v1654_v5 = vadd.f32 %v3199_v1, %v4700_v55 }
 0x24c   : > { %v3200_v44 = vpop.f32.mrb[34].mxu0  ;;  %v1646_v54 = vadd.f32 %v4700_v55, %v1645_v9 }
 0x24d   : > { %v1648_v29 = vpop.f32.mrb[35].mxu0  ;;  %v1657_v53 = vadd.f32 %v3200_v44, %v4700_v55  ;;  %v1806_v51 = vmax.f32 %v1654_v5, 0.0 }
 0x24e   : > { %v1649_v47 = vadd.f32 %v4700_v55, %v1648_v29  ;;  %v1804_v17 = vmax.f32 %v1646_v54, 0.0 }
 0x24f   : > { %v1807_v24 = vmax.f32 %v1657_v53, 0.0 }
 0x250   : > { %v1805_v37 = vmax.f32 %v1649_v47, 0.0 }
 0x256   : > { %v3203_v36 = vpop.f32.mrb[36].mxu0 }
 0x257   : > { %v1661_v3 = vpop.f32.mrb[37].mxu0  ;;  %v1670_v25 = vadd.f32 %v3203_v36, %v4700_v55 }
 0x258   : > { %v3204_v28 = vpop.f32.mrb[38].mxu0  ;;  %v1662_v19 = vadd.f32 %v4700_v55, %v1661_v3 }
 0x259   : > { %v1664_v30 = vpop.f32.mrb[39].mxu0  ;;  %v1673_v34 = vadd.f32 %v3204_v28, %v4700_v55  ;;  %v1810_v13 = vmax.f32 %v1670_v25, 0.0 }
 0x25a   : > { %v1665_v0 = vadd.f32 %v4700_v55, %v1664_v30  ;;  %v1808_v42 = vmax.f32 %v1662_v19, 0.0 }
 0x25b   : > { %v1811_v62 = vmax.f32 %v1673_v34, 0.0 }
 0x25c   : > { %v1809_v45 = vmax.f32 %v1665_v0, 0.0 }
 0x263   : > { %v4750_v15 = vpop.f32.mrb[40].mxu0 }
 0x264   : > { %v4752_v48 = vpop.f32.mrb[41].mxu0  ;;  %v1686_v44 = vadd.f32 %v4750_v15, %v4700_v55 }
 0x265   : > { %v4754_v57 = vpop.f32.mrb[42].mxu0  ;;  %v1678_v36 = vadd.f32 %v4700_v55, %v4752_v48 }
 0x266   : > { %v4756_v16 = vpop.f32.mrb[43].mxu0  ;;  %v1689_v30 = vadd.f32 %v4754_v57, %v4700_v55  ;;  %v1814_v47 = vmax.f32 %v1686_v44, 0.0 }
 0x267   : > { %v1681_v5 = vadd.f32 %v4700_v55, %v4756_v16 }
 0x268   : > { %v1815_v16 = vmax.f32 %v1689_v30, 0.0 }
 0x26f   : > { %v4758_v35 = vpop.f32.mrb[44].mxu0 }
 0x270   : > { %v4760_v27 = vpop.f32.mrb[45].mxu0 }
 0x271   : > { %v4762_v60 = vpop.f32.mrb[46].mxu0 }
 0x272   : > { %v4764_v10 = vpop.f32.mrb[47].mxu0 }
 0x277   : > { %v3215_v50 = vpop.f32.mrb[48].mxu0 }
 0x278   : > { %v1718_v40 = vadd.f32 %v3215_v50, %v4700_v55  ;;  %v1709_v39 = vpop.f32.mrb[49].mxu0 }
 0x279   : > { %v1710_v38 = vadd.f32 %v4700_v55, %v1709_v39  ;;  %v3216_v59 = vpop.f32.mrb[50].mxu0 }
 0x27a   : > { %v1822_v58 = vmax.f32 %v1718_v40, 0.0  ;;  %v1721_v14 = vadd.f32 %v3216_v59, %v4700_v55  ;;  %v1712_v52 = vpop.f32.mrb[51].mxu0 }
 0x27b   : > { %v1820_v6 = vmax.f32 %v1710_v38, 0.0  ;;  %v1713_v11 = vadd.f32 %v4700_v55, %v1712_v52 }
 0x27c   : > { %v1872_v2 = vmax.f32 %v1806_v51, %v1822_v58  ;;  %v1823_v33 = vmax.f32 %v1721_v14, 0.0  ;;  %v1812_v51 = vmax.f32 %v1678_v36, 0.0  ;;  %v1813_v14 = vmax.f32 %v1681_v5, 0.0 }
 0x27d   : > { %v1870_v7 = vmax.f32 %v1804_v17, %v1820_v6  ;;  %v1821_v8 = vmax.f32 %v1713_v11, 0.0 }
 0x27e   : > { %v1873_v20 = vmax.f32 %v1807_v24, %v1823_v33  ;;  %v1702_v24 = vadd.f32 %v4758_v35, %v4700_v55  ;;  %v1694_v33 = vadd.f32 %v4700_v55, %v4760_v27  ;;  %v1705_v35 = vadd.f32 %v4762_v60, %v4700_v55 }
 0x27f   : > { %v1871_v41 = vmax.f32 %v1805_v37, %v1821_v8  ;;  %v3219_v49 = vpop.f32.mrb[52].mxu0 }
 0x280   : > { %v1887_v26 = vmax.f32 %v1872_v2, %v1873_v20  ;;  %v1734_v22 = vadd.f32 %v3219_v49, %v4700_v55  ;;  %v1725_v32 = vpop.f32.mrb[53].mxu0  ;;  %v1697_v20 = vadd.f32 %v4700_v55, %v4764_v10  ;;  %v1818_v34 = vmax.f32 %v1702_v24, 0.0 }
 0x281   : > { %v1886_v4 = vmax.f32 %v1870_v7, %v1871_v41  ;;  %v1726_v56 = vadd.f32 %v4700_v55, %v1725_v32  ;;  %v3220_v61 = vpop.f32.mrb[54].mxu0  ;;  %v1816_v32 = vmax.f32 %v1694_v33, 0.0 }
 0x282   : > { %v1826_v12 = vmax.f32 %v1734_v22, 0.0  ;;  %v1737_v31 = vadd.f32 %v3220_v61, %v4700_v55  ;;  %1904 = vrot.lane.b32.xlu1 %v1887_v26, %s3956_s27  ;;  %v1728_v43 = vpop.f32.mrb[55].mxu0  ;;  %v1817_v61 = vmax.f32 %v1697_v20, 0.0 }
 0x283   : > { %v1824_v21 = vmax.f32 %v1726_v56, 0.0  ;;  %v1729_v63 = vadd.f32 %v4700_v55, %v1728_v43  ;;  %1902 = vrot.lane.b32.xlu0 %v1886_v4, %s3956_s27  ;;  %v1819_v4 = vmax.f32 %v1705_v35, 0.0 }
 0x284   : > { %v1876_v46 = vmax.f32 %v1810_v13, %v1826_v12  ;;  %v1827_v18 = vmax.f32 %v1737_v31, 0.0 }
 0x285   : > { %v1874_v1 = vmax.f32 %v1808_v42, %v1824_v21  ;;  %v1825_v9 = vmax.f32 %v1729_v63, 0.0 }
 0x286   : > { %v1877_v29 = vmax.f32 %v1811_v62, %v1827_v18 }
 0x287   : > { %v1875_v3 = vmax.f32 %v1809_v45, %v1825_v9  ;;  %v3223_v28 = vpop.f32.mrb[56].mxu0 }
 0x288   : > { %v1889_v54 = vmax.f32 %v1876_v46, %v1877_v29  ;;  %v1750_v50 = vadd.f32 %v3223_v28, %v4700_v55  ;;  %v1741_v53 = vpop.f32.mrb[57].mxu0 }
 0x289   : > { %v1888_v40 = vmax.f32 %v1874_v1, %v1875_v3  ;;  %v1742_v39 = vadd.f32 %v4700_v55, %v1741_v53  ;;  %v3224_v15 = vpop.f32.mrb[58].mxu0 }
 0x28a   : > { %v1830_v38 = vmax.f32 %v1750_v50, 0.0  ;;  %v1753_v48 = vadd.f32 %v3224_v15, %v4700_v55  ;;  %1908 = vrot.lane.b32.xlu1 %v1889_v54, %s3956_s27  ;;  %v1744_v59 = vpop.f32.mrb[59].mxu0 }
 0x28b   : > { %v1828_v57 = vmax.f32 %v1742_v39, 0.0  ;;  %v1745_v58 = vadd.f32 %v4700_v55, %v1744_v59  ;;  %1906 = vrot.lane.b32.xlu0 %v1888_v40, %s3956_s27 }
 0x28c   : > { %v1880_v52 = vmax.f32 %v1814_v47, %v1830_v38  ;;  %v1831_v17 = vmax.f32 %v1753_v48, 0.0 }
 0x28d   : > { %v1878_v6 = vmax.f32 %v1812_v51, %v1828_v57  ;;  %v1829_v11 = vmax.f32 %v1745_v58, 0.0 }
 0x28e   : > { %v1881_v2 = vmax.f32 %v1815_v16, %v1831_v17 }
 0x28f   : > { %v1879_v37 = vmax.f32 %v1813_v14, %v1829_v11  ;;  %v3227_v7 = vpop.f32.mrb[60].mxu0 }
 0x290   : > { %v1891_v8 = vmax.f32 %v1880_v52, %v1881_v2  ;;  %v1766_v27 = vadd.f32 %v3227_v7, %v4700_v55  ;;  %v1757_v25 = vpop.f32.mrb[61].mxu0 }
 0x291   : > { %v1890_v19 = vmax.f32 %v1878_v6, %v1879_v37  ;;  %v1758_v41 = vadd.f32 %v4700_v55, %v1757_v25  ;;  %v3228_v49 = vpop.f32.mrb[62].mxu0 }
 0x292   : > { %v1834_v26 = vmax.f32 %v1766_v27, 0.0  ;;  %v1769_v22 = vadd.f32 %v3228_v49, %v4700_v55  ;;  %1912 = vrot.lane.b32.xlu1 %v1891_v8, %s3956_s27  ;;  %v1760_v23 = vpop.f32.mrb[63].mxu0 }
 0x293   : > { %v1832_v60 = vmax.f32 %v1758_v41, 0.0  ;;  %v1761_v0 = vadd.f32 %v4700_v55, %v1760_v23  ;;  %1910 = vrot.lane.b32.xlu0 %v1890_v19, %s3956_s27 }
 0x294   : > { %v1884_v56 = vmax.f32 %v1818_v34, %v1834_v26  ;;  %v1835_v10 = vmax.f32 %v1769_v22, 0.0 }
 0x295   : > { %v1882_v13 = vmax.f32 %v1816_v32, %v1832_v60  ;;  %v1833_v12 = vmax.f32 %v1761_v0, 0.0 }
 0x296   : > { %v1885_v31 = vmax.f32 %v1819_v4, %v1835_v10 }
 0x297   : > { %v1883_v43 = vmax.f32 %v1817_v61, %v1833_v12 }
 0x298   : > { %v1893_v42 = vmax.f32 %v1884_v56, %v1885_v31 }
 0x299   : > { %v1892_v21 = vmax.f32 %v1882_v13, %v1883_v43  ;;  %v1953_v43 = vld [vmem:[#allocation2 + $0x90] sm:$0xff] }
 0x29a   : > { %1916 = vrot.lane.b32.xlu1 %v1893_v42, %s3956_s27 }
 0x29b   : > { %1914 = vrot.lane.b32.xlu0 %v1892_v21, %s3956_s27 }
 0x2f4   : > { %v1905_v63 = vpop.permute.xlu1 %1904 }
 0x2f5   : > { %1928 = vst.msk [vmem:[#allocation2 + $0x21] sm:$0xff] %vm1926_vm12, %v1905_v63  ;;  %v1903_v55 = vpop.permute.xlu0 %1902 }
 0x2f6   : > { %1927 = vst.msk [vmem:[#allocation2 + $0x11] sm:$0xff] %vm1926_vm12, %v1903_v55  ;;  %v1935_v55 = vld [vmem:[#allocation2] sm:$0xff] }
 0x2fc   : > { %v1909_v62 = vpop.permute.xlu1 %1908  ;;  %v1939_v46 = vld [vmem:[#allocation2 + $0x20] sm:$0xff]  ;;  %v1940_v18 = vld [vmem:[#allocation2 + $0x28] sm:$0x3] }
 0x2fd   : > { %1930 = vst.msk [vmem:[#allocation2 + $0x41] sm:$0xff] %vm1926_vm12, %v1909_v62  ;;  %v1907_v45 = vpop.permute.xlu0 %1906  ;;  %v1937_v1 = vld [vmem:[#allocation2 + $0x10] sm:$0xff]  ;;  %v2001_v9 = vrot.slane %v1939_v46, 1  ;;  %v1938_v44 = vld [vmem:[#allocation2 + $0x18] sm:$0x3]  ;;  %v2002_v29 = vrot.slane %v1940_v18, 1 }
 0x2fe   : > { %1929 = vst.msk [vmem:[#allocation2 + $0x31] sm:$0xff] %vm1926_vm12, %v1907_v45  ;;  %v3766_v36 = vpack.i.bf16 %v1939_v46, %v1937_v1  ;;  %v1998_v3 = vrot.slane %v1937_v1, 1  ;;  %v1999_v28 = vrot.slane %v1938_v44, 1  ;;  %v2046_v54 = vrot.slane %v1937_v1, 2 }
 0x2ff   : > { %v2003_v30 = vsel %vm458_vm0, %v2001_v9, %v2002_v29  ;;  %v2047_v53 = vrot.slane %v1938_v44, 2  ;;  %v2049_v40 = vrot.slane %v1939_v46, 2  ;;  %v2050_v15 = vrot.slane %v1940_v18, 2 }
 0x300   : > { %3767 = vrot.lane.b32.xlu0 %v3766_v36, %s3958_s30  ;;  %v2000_v5 = vsel %vm458_vm0, %v1998_v3, %v1999_v28  ;;  %v1936_v3 = vld [vmem:[#allocation2 + $0x8] sm:$0x3] }
 0x301   : > { %v3771_v50 = vpack.i.bf16 %v2003_v30, %v2000_v5  ;;  %v2048_v51 = vsel %vm555_vm1, %v2046_v54, %v2047_v53  ;;  %v2051_v2 = vsel %vm555_vm1, %v2049_v40, %v2050_v15  ;;  %v2138_v5 = vrot.slane %v1953_v43, 2  ;;  %v1954_v54 = vld [vmem:[#allocation2 + $0x98] sm:$0x3] }
 0x302   : > { %v2132_v53 = vrot.slane %v1953_v43, 1  ;;  %v2133_v40 = vrot.slane %v1954_v54, 1 }
 0x304   : > { %v1913_v39 = vpop.permute.xlu1 %1912  ;;  %3772 = vrot.lane.b32.xlu0 %v3771_v50, %s3956_s27  ;;  %v1943_v47 = vld [vmem:[#allocation2 + $0x40] sm:$0xff]  ;;  %v1944_v38 = vld [vmem:[#allocation2 + $0x48] sm:$0x3] }
 0x305   : > { %1932 = vst.msk [vmem:[#allocation2 + $0x61] sm:$0xff] %vm1926_vm12, %v1913_v39  ;;  %v1911_v48 = vpop.permute.xlu0 %1910  ;;  %v1941_v59 = vld [vmem:[#allocation2 + $0x30] sm:$0xff]  ;;  %v1942_v57 = vld [vmem:[#allocation2 + $0x38] sm:$0x3]  ;;  %v2007_v58 = vrot.slane %v1943_v47, 1  ;;  %v2008_v16 = vrot.slane %v1944_v38, 1 }
 0x306   : > { %1931 = vst.msk [vmem:[#allocation2 + $0x51] sm:$0xff] %vm1926_vm12, %v1911_v48  ;;  %v2004_v14 = vrot.slane %v1941_v59, 1  ;;  %v2052_v52 = vrot.slane %v1941_v59, 2  ;;  %v3776_v17 = vpack.i.bf16 %v2048_v51, %v1941_v59  ;;  %v2053_v6 = vrot.slane %v1942_v57, 2 }
 0x307   : > { %v2005_v11 = vrot.slane %v1942_v57, 1  ;;  %v2009_v24 = vsel %vm458_vm0, %v2007_v58, %v2008_v16  ;;  %v2055_v20 = vrot.slane %v1943_v47, 2  ;;  %v2056_v22 = vrot.slane %v1944_v38, 2 }
 0x308   : > { %3777 = vrot.lane.b32.xlu1 %v3776_v17, %s3958_s30  ;;  %v2054_v33 = vsel %vm555_vm1, %v2052_v52, %v2053_v6  ;;  %v2043_v39 = vrot.slane %v1935_v55, 2  ;;  %v2044_v48 = vrot.slane %v1936_v3, 2  ;;  %v2139_v51 = vrot.slane %v1954_v54, 2 }
 0x309   : > { %v3786_v37 = vpack.i.bf16 %v2054_v33, %v2051_v2  ;;  %v2006_v7 = vsel %vm458_vm0, %v2004_v14, %v2005_v11  ;;  %v2057_v13 = vsel %vm555_vm1, %v2055_v20, %v2056_v22  ;;  %v2134_v14 = vsel %vm458_vm0, %v2132_v53, %v2133_v40  ;;  %v3911_v20 = vld [vmem:[%s5228_s3 + $0x10] sm:$0xff]   ;;  %v3917_v22 = vld [vmem:[%s5228_s3 + $0x28] sm:$0xff]  }
 0x30a   : > { %v3781_v35 = vpack.i.bf16 %v2009_v24, %v2006_v7  ;;  %v2045_v52 = vsel %vm555_vm1, %v2043_v39, %v2044_v48  ;;  %v2140_v6 = vsel %vm555_vm1, %v2138_v5, %v2139_v51  ;;  %v1995_v24 = vrot.slane %v1935_v55, 1  ;;  %v3906_v7 = vld [vmem:[%s5228_s3 + $0x40] sm:$0xff]  }
 0x30b   : > { %3787 = vrot.lane.b32.xlu0 %v3786_v37, %s3958_s30  ;;  %v3831_v11 = vpack.i.bf16 %v2045_v52, %v1935_v55  ;;  %v1996_v2 = vrot.slane %v1936_v3, 1  ;;  %3059 = vmatprep.subr.bf16.mxu1 %v3906_v7 }
 0x30c   : > { %v1917_v8 = vpop.permute.xlu1 %1916  ;;  %3782 = vrot.lane.b32.xlu1 %v3781_v35, %s3956_s27  ;;  %v1947_v27 = vld [vmem:[#allocation2 + $0x60] sm:$0xff]  ;;  %v1948_v25 = vld [vmem:[#allocation2 + $0x68] sm:$0x3] }
 0x30d   : > { %1934 = vst.msk [vmem:[#allocation2 + $0x81] sm:$0xff] %vm1926_vm12, %v1917_v8  ;;  %v1915_v19 = vpop.permute.xlu0 %1914  ;;  %v1945_v41 = vld [vmem:[#allocation2 + $0x50] sm:$0xff]  ;;  %v1946_v49 = vld [vmem:[#allocation2 + $0x58] sm:$0x3]  ;;  %v2013_v34 = vrot.slane %v1947_v27, 1  ;;  %v2014_v26 = vrot.slane %v1948_v25, 1  ;;  %v1997_v37 = vsel %vm458_vm0, %v1995_v24, %v1996_v2 }
 0x30e   : > { %1933 = vst.msk [vmem:[#allocation2 + $0x71] sm:$0xff] %vm1926_vm12, %v1915_v19  ;;  %v3791_v23 = vpack.i.bf16 %v1945_v41, %v1943_v47  ;;  %v2010_v32 = vrot.slane %v1945_v41, 1  ;;  %v2058_v60 = vrot.slane %v1945_v41, 2  ;;  %v2011_v0 = vrot.slane %v1946_v49, 1  ;;  %v3907_v35 = vld [vmem:[%s5228_s3] sm:$0xff]   ;;  %v3908_v8 = vld [vmem:[%s5228_s3 + $0x48] sm:$0xff]  }
 0x30f   : > { %v2015_v4 = vsel %vm458_vm0, %v2013_v34, %v2014_v26  ;;  %v2059_v56 = vrot.slane %v1946_v49, 2  ;;  %v2061_v63 = vrot.slane %v1947_v27, 2  ;;  %v2062_v1 = vrot.slane %v1948_v25, 2  ;;  %3060 = vmatpush3.bf16.msra.mxu1 %v3907_v35  ;;  %v3910_v25 = vld [vmem:[%s5228_s3 + $0x50] sm:$0xff]   ;;  %v3912_v19 = vld [vmem:[%s5228_s3 + $0x58] sm:$0xff]   ;;  %v3914_v49 = vld [vmem:[%s5228_s3 + $0x60] sm:$0xff]  }
 0x310   : > { %3792 = vrot.lane.b32.xlu1 %v3791_v23, %s3958_s30  ;;  %v2012_v10 = vsel %vm458_vm0, %v2010_v32, %v2011_v0  ;;  %3061 = vmatprep.subr.bf16.mxu1 %v3908_v8  ;;  %v3913_v41 = vld [vmem:[%s5228_s3 + $0x18] sm:$0xff]   ;;  %v3915_v34 = vld [vmem:[%s5228_s3 + $0x20] sm:$0xff]   ;;  %v3916_v26 = vld [vmem:[%s5228_s3 + $0x68] sm:$0xff]  }
 0x311   : > { %v3796_v61 = vpack.i.bf16 %v2015_v4, %v2012_v10  ;;  %v2060_v12 = vsel %vm555_vm1, %v2058_v60, %v2059_v56  ;;  %v2063_v47 = vsel %vm555_vm1, %v2061_v63, %v2062_v1  ;;  %v3918_v23 = vld [vmem:[%s5228_s3 + $0x70] sm:$0xff]   ;;  %v3920_v4 = vld [vmem:[%s5228_s3 + $0x78] sm:$0xff]  }
 0x312   : > { %v3801_v31 = vpack.i.bf16 %v2060_v12, %v2057_v13  ;;  %v3919_v60 = vld [vmem:[%s5228_s3 + $0x30] sm:$0xff]   ;;  %v3921_v56 = vld [vmem:[%s5228_s3 + $0x38] sm:$0xff]  }
 0x313   : > { %3797 = vrot.lane.b32.xlu0 %v3796_v61, %s3956_s27 }
 0x314   : > { %3802 = vrot.lane.b32.xlu1 %v3801_v31, %s3958_s30  ;;  %v1951_v42 = vld [vmem:[#allocation2 + $0x80] sm:$0xff]  ;;  %v1952_v21 = vld [vmem:[#allocation2 + $0x88] sm:$0x3] }
 0x315   : > { %v1949_v62 = vld [vmem:[#allocation2 + $0x70] sm:$0xff]  ;;  %v1950_v46 = vld [vmem:[#allocation2 + $0x78] sm:$0x3]  ;;  %v2113_v18 = vrot.slane %v1951_v42, 1  ;;  %v2114_v45 = vrot.slane %v1952_v21, 1  ;;  %v2119_v57 = vrot.slane %v1951_v42, 2  ;;  %v3821_v16 = vpack.i.bf16 %v1953_v43, %v1951_v42 }
 0x316   : > { %v3806_v9 = vpack.i.bf16 %v1949_v62, %v1947_v27  ;;  %v2016_v44 = vrot.slane %v1949_v62, 1  ;;  %v2064_v29 = vrot.slane %v1949_v62, 2  ;;  %v2017_v36 = vrot.slane %v1950_v46, 1  ;;  %v3909_v27 = vld [vmem:[%s5228_s3 + $0x8] sm:$0xff]  }
 0x317   : > { %v2115_v28 = vsel %vm458_vm0, %v2113_v18, %v2114_v45  ;;  %v2065_v30 = vrot.slane %v1950_v46, 2  ;;  %v2120_v58 = vrot.slane %v1952_v21, 2  ;;  %3062 = vmatpush3.bf16.msra.mxu1 %v3909_v27  ;;  %v4955_v21 = vld [vmem:[%s5228_s3 + $0x80] sm:$0xff]  }
 0x318   : > { %3807 = vrot.lane.b32.xlu0 %v3806_v9, %s3958_s30  ;;  %v2018_v50 = vsel %vm458_vm0, %v2016_v44, %v2017_v36  ;;  %3063 = vmatprep.subr.bf16.mxu1 %v3910_v25 }
 0x319   : > { %v3811_v15 = vpack.i.bf16 %v2115_v28, %v2018_v50  ;;  %v2066_v38 = vsel %vm555_vm1, %v2064_v29, %v2065_v30  ;;  %v2121_v17 = vsel %vm555_vm1, %v2119_v57, %v2120_v58 }
 0x31a   : > { %v3816_v59 = vpack.i.bf16 %v2066_v38, %v2063_v47  ;;  %v3826_v33 = vpack.i.bf16 %v2140_v6, %v2121_v17 }
 0x31b   : > { %3812 = vrot.lane.b32.xlu1 %v3811_v15, %s3956_s27  ;;  %3064 = vmatpush3.bf16.msra.mxu1 %v3911_v20 }
 0x31c   : > { %3817 = vrot.lane.b32.xlu0 %v3816_v59, %s3958_s30  ;;  %3065 = vmatprep.subr.bf16.mxu1 %v3912_v19 }
 0x31f   : > { %3822 = vrot.lane.b32.xlu1 %v3821_v16, %s3958_s30  ;;  %3066 = vmatpush3.bf16.msra.mxu1 %v3913_v41 }
 0x320   : > { %2135 = vrot.lane.b32.xlu0 %v2134_v14, %s3956_s27  ;;  %3067 = vmatprep.subr.bf16.mxu1 %v3914_v49 }
 0x323   : > { %3827 = vrot.lane.b32.xlu1 %v3826_v33, %s3958_s30  ;;  %3068 = vmatpush3.bf16.msra.mxu1 %v3915_v34 }
 0x324   : > { %3832 = vrot.lane.b32.xlu0 %v3831_v11, %s3958_s30  ;;  %3069 = vmatprep.subr.bf16.mxu1 %v3916_v26 }
 0x327   : > { %2019 = vrot.lane.b32.xlu1 %v1997_v37, %s3956_s27  ;;  %3070 = vmatpush3.bf16.msra.mxu1 %v3917_v22 }
 0x328   : > { %3071 = vmatprep.subr.bf16.mxu1 %v3918_v23 }
 0x32b   : > { %3072 = vmatpush3.bf16.msra.mxu1 %v3919_v60 }
 0x32c   : > { %3073 = vmatprep.subr.bf16.mxu1 %v3920_v4 }
 0x32f   : > { %3074 = vmatpush3.bf16.msra.mxu1 %v3921_v56 }
 0x330   : > { %3229 = vmatprep.subr.bf16.mxu1 %v4955_v21 }
 0x372   : > { %v3768_v32 = vpop.permute.xlu0 %3767 }
 0x373   : > { %v3770_v31 = vunpack.i.h.bf16 %v3768_v32  ;;  %v3769_v43 = vunpack.i.l.bf16 %v3768_v32 }
 0x376   : > { %v3773_v0 = vpop.permute.xlu0 %3772 }
 0x377   : > { %v3775_v61 = vunpack.i.h.bf16 %v3773_v0  ;;  %v3774_v13 = vunpack.i.l.bf16 %v3773_v0 }
 0x379   : > { %v2093_v62 = vsel %vm1861_vm8, %v3770_v31, %v3775_v61  ;;  %v2092_v46 = vsel %vm1861_vm8, %v3769_v43, %v3774_v13 }
 0x37a   : > { %v3778_v10 = vpop.permute.xlu1 %3777 }
 0x37b   : > { %v3780_v12 = vunpack.i.h.bf16 %v3778_v10  ;;  %v3779_v18 = vunpack.i.l.bf16 %v3778_v10 }
 0x37d   : > { %v3788_v42 = vpop.permute.xlu0 %3787  ;;  %v4961_v1 = vsel %vm2099_vm13, %v2092_v46, %v3780_v12 }
 0x37e   : > { %v3789_v63 = vunpack.i.l.bf16 %v3788_v42  ;;  %v3783_v55 = vpop.permute.xlu1 %3782  ;;  %v3790_v9 = vunpack.i.h.bf16 %v3788_v42 }
 0x37f   : > { %v3784_v45 = vunpack.i.l.bf16 %v3783_v55  ;;  %v3785_v50 = vunpack.i.h.bf16 %v3783_v55 }
 0x380   : > { %v4964_v44 = vsel %vm2099_vm13, %v2093_v62, %v3789_v63 }
 0x381   : > { %v2094_v29 = vsel %vm1861_vm8, %v3779_v18, %v3784_v45  ;;  %v3836_v36 = vpack.i.bf16 %v4964_v44, %v4961_v1 }
 0x382   : > { %v4970_v3 = vsel %vm2099_vm13, %v2094_v29, %v3790_v9  ;;  %v3793_v28 = vpop.permute.xlu1 %3792 }
 0x383   : > { %3837 = vrot.lane.b32.xlu0 %v3836_v36, %s3958_s30  ;;  %v3841_v30 = vpack.i.bf16 %v4970_v3, %v4964_v44  ;;  %v3794_v5 = vunpack.i.l.bf16 %v3793_v28  ;;  %v3795_v53 = vunpack.i.h.bf16 %v3793_v28 }
 0x385   : > { %v3798_v54 = vpop.permute.xlu0 %3797  ;;  %3842 = vrot.lane.b32.xlu1 %v3841_v30, %s3959_s23  ;;  %v2095_v38 = vsel %vm1861_vm8, %v3794_v5, %v3785_v50 }
 0x386   : > { %v3799_v40 = vunpack.i.l.bf16 %v3798_v54  ;;  %v3803_v39 = vpop.permute.xlu1 %3802  ;;  %v3800_v17 = vunpack.i.h.bf16 %v3798_v54  ;;  %v3923_v54 = vld [vmem:[%s5228_s3 + $0x88] sm:$0xff]  }
 0x387   : > { %v3805_v15 = vunpack.i.h.bf16 %v3803_v39  ;;  %v3804_v47 = vunpack.i.l.bf16 %v3803_v39 }
 0x388   : > { %v2096_v48 = vsel %vm1861_vm8, %v3795_v53, %v3799_v40 }
 0x389   : > { %v4979_v59 = vsel %vm2099_vm13, %v2095_v38, %v3804_v47  ;;  %v4982_v51 = vsel %vm2099_vm13, %v2096_v48, %v3805_v15 }
 0x38a   : > { %v3808_v57 = vpop.permute.xlu0 %3807  ;;  %v3846_v58 = vpack.i.bf16 %v4979_v59, %v4970_v3  ;;  %v3851_v16 = vpack.i.bf16 %v4982_v51, %v4979_v59 }
 0x38b   : > { %v3809_v14 = vunpack.i.l.bf16 %v3808_v57  ;;  %v3810_v6 = vunpack.i.h.bf16 %v3808_v57 }
 0x38c   : > { %3847 = vrot.lane.b32.xlu0 %v3846_v58, %s3958_s30  ;;  %3852 = vrot.lane.b32.xlu1 %v3851_v16, %s3959_s23 }
 0x38d   : > { %v3813_v52 = vpop.permute.xlu1 %3812  ;;  %v2097_v37 = vsel %vm1861_vm8, %v3809_v14, %v3800_v17 }
 0x38e   : > { %v3814_v11 = vunpack.i.l.bf16 %v3813_v52  ;;  %v3818_v24 = vpop.permute.xlu0 %3817  ;;  %v3815_v34 = vunpack.i.h.bf16 %v3813_v52 }
 0x38f   : > { %v3820_v2 = vunpack.i.h.bf16 %v3818_v24  ;;  %v3819_v33 = vunpack.i.l.bf16 %v3818_v24 }
 0x390   : > { %v2098_v7 = vsel %vm1861_vm8, %v3810_v6, %v3814_v11 }
 0x391   : > { %v4993_v35 = vsel %vm2099_vm13, %v2097_v37, %v3819_v33  ;;  %v4996_v8 = vsel %vm2099_vm13, %v2098_v7, %v3820_v2  ;;  %v3823_v27 = vpop.permute.xlu1 %3822 }
 0x392   : > { %v2136_v25 = vpop.permute.xlu0 %2135  ;;  %v3856_v20 = vpack.i.bf16 %v4993_v35, %v4982_v51  ;;  %v3861_v19 = vpack.i.bf16 %v4996_v8, %v4993_v35  ;;  %v3825_v41 = vunpack.i.h.bf16 %v3823_v27  ;;  %v3824_v49 = vunpack.i.l.bf16 %v3823_v27 }
 0x394   : > { %3857 = vrot.lane.b32.xlu0 %v3856_v20, %s3958_s30  ;;  %3862 = vrot.lane.b32.xlu1 %v3861_v19, %s3959_s23  ;;  %v2125_v60 = vsel %vm1861_vm8, %v3824_v49, %v3815_v34  ;;  %v2144_v0 = vsel %vm1861_vm8, %v3825_v41, %v2136_v25 }
 0x395   : > { %v3828_v26 = vpop.permute.xlu1 %3827 }
 0x396   : > { %v3830_v22 = vunpack.i.h.bf16 %v3828_v26  ;;  %v3829_v23 = vunpack.i.l.bf16 %v3828_v26  ;;  %v3833_v32 = vpop.permute.xlu0 %3832 }
 0x397   : > { %v3834_v13 = vunpack.i.l.bf16 %v3833_v32  ;;  %v3835_v31 = vunpack.i.h.bf16 %v3833_v32 }
 0x398   : > { %v2126_v4 = vsel %vm2099_vm13, %v2125_v60, %v3829_v23  ;;  %v2145_v56 = vsel %vm2099_vm13, %v2144_v0, %v3830_v22 }
 0x399   : > { %v3871_v10 = vpack.i.bf16 %v2145_v56, %v2126_v4  ;;  %v3866_v61 = vpack.i.bf16 %v2126_v4, %v4996_v8  ;;  %v2020_v12 = vpop.permute.xlu1 %2019 }
 0x39a   : > { %v2091_v43 = vsel %vm1861_vm8, %v3834_v13, %v2020_v12 }
 0x39b   : > { %3867 = vrot.lane.b32.xlu0 %v3866_v61, %s3958_s30  ;;  %3872 = vrot.lane.b32.xlu1 %v3871_v10, %s3959_s23  ;;  %v2100_v42 = vsel %vm2099_vm13, %v2091_v43, %v3835_v31 }
 0x39f   : > { %2223 = vrot.lane.b32.xlu0 %v4961_v1, %s3959_s23  ;;  %3877 = vrot.lane.b32.xlu1 %v3841_v30, %s3956_s27 }
 0x3a3   : > { %2220 = vrot.lane.b32.xlu0 %v2100_v42, %s3958_s30  ;;  %3882 = vrot.lane.b32.xlu1 %v3851_v16, %s3956_s27 }
 0x3a7   : > { %3887 = vrot.lane.b32.xlu0 %v3861_v19, %s3956_s27  ;;  %3892 = vrot.lane.b32.xlu1 %v3871_v10, %s3956_s27 }
 0x3f5   : > { %v3838_v63 = vpop.permute.xlu0 %3837 }
 0x3f6   : > { %v5020_v55 = vunpack.i.h.bf16 %v3838_v63  ;;  %v5022_v62 = vunpack.i.l.bf16 %v3838_v63 }
 0x3f7   : > { %v3843_v46 = vpop.permute.xlu1 %3842 }
 0x3f8   : > { %v5024_v18 = vunpack.i.h.bf16 %v3843_v46  ;;  %v5026_v45 = vunpack.i.l.bf16 %v3843_v46  ;;  %v2203_v9 = vsel %vm2099_vm13, %v2100_v42, %v5022_v62  ;;  %v2204_v29 = vsel %vm2099_vm13, %v4961_v1, %v5020_v55 }
 0x3f9   : > { %v2266_v5 = vpack.c.bf16 %v2204_v29, %v2203_v9 }
 0x3fa   : > { %v2211_v36 = vsel %vm278_vm10, %v5022_v62, %v5026_v45  ;;  %v2212_v28 = vsel %vm278_vm10, %v5020_v55, %v5024_v18  ;;  %v2251_v42 = vsel %vm2099_vm13, %v5022_v62, %v5026_v45  ;;  %v2252_v62 = vsel %vm2099_vm13, %v5020_v55, %v5024_v18 }
 0x3fb   : > { %v2267_v30 = vpack.c.bf16 %v2212_v28, %v2211_v36 }
 0x3fd   : > { %2497 = vmatprep.mubr.bf16.mxu1 %v2267_v30 }
 0x3fe   : > { %v3848_v50 = vpop.permute.xlu0 %3847  ;;  %v3853_v53 = vpop.permute.xlu1 %3852  ;;  %2498 = vmatmul.mubr.bf16.vlgmr.msra.gmra.mrb[0].mxu1 %v2266_v5 }
 0x3ff   : > { %v5042_v40 = vunpack.i.h.bf16 %v3848_v50  ;;  %v5044_v1 = vunpack.i.l.bf16 %v3848_v50  ;;  %v5046_v39 = vunpack.i.h.bf16 %v3853_v53  ;;  %v5048_v15 = vunpack.i.l.bf16 %v3853_v53  ;;  %3230 = vmatpush3.bf16.msra.mxu1 %v4955_v21 }
 0x400   : > { %3231 = vmatprep.subr.bf16.mxu1 %v3923_v54 }
 0x401   : > { %v2213_v47 = vsel %vm278_vm10, %v5044_v1, %v5048_v15  ;;  %v2214_v38 = vsel %vm278_vm10, %v5042_v40, %v5046_v39  ;;  %v2205_v48 = vsel %vm2099_vm13, %v4964_v44, %v5044_v1  ;;  %v2206_v58 = vsel %vm2099_vm13, %v4970_v3, %v5042_v40 }
 0x402   : > { %v2270_v57 = vpack.c.bf16 %v2214_v38, %v2213_v47  ;;  %v2269_v21 = vpack.c.bf16 %v2206_v58, %v2205_v48  ;;  %v2253_v28 = vsel %vm2099_vm13, %v5044_v1, %v5048_v15  ;;  %v2254_v58 = vsel %vm2099_vm13, %v5042_v40, %v5046_v39 }
 0x403   : > { %3232 = vmatpush3.bf16.msra.mxu1 %v3923_v54  ;;  %v2281_v50 = vpack.c.bf16 %v2253_v28, %v2252_v62  ;;  %v2271_v40 = vpack.c.bf16 %v5046_v39, %v5048_v15 }
 0x404   : > { %2505 = vmatprep.mubr.bf16.mxu1 %v2270_v57 }
 0x406   : > { %v3858_v16 = vpop.permute.xlu0 %3857  ;;  %2506 = vmatmul.mubr.bf16.gmra.mrb[4].mxu1 %v2269_v21  ;;  %v3863_v14 = vpop.permute.xlu1 %3862 }
 0x407   : > { %v5063_v52 = vunpack.i.h.bf16 %v3858_v16  ;;  %v3859_v17 = vunpack.i.l.bf16 %v3858_v16  ;;  %v5065_v6 = vunpack.i.h.bf16 %v3863_v14  ;;  %v5067_v11 = vunpack.i.l.bf16 %v3863_v14 }
 0x409   : > { %v2215_v44 = vsel %vm278_vm10, %v3859_v17, %v5067_v11  ;;  %v2216_v3 = vsel %vm278_vm10, %v5063_v52, %v5065_v6  ;;  %v2207_v24 = vsel %vm2099_vm13, %v4979_v59, %v3859_v17  ;;  %v2208_v2 = vsel %vm2099_vm13, %v4982_v51, %v5063_v52 }
 0x40a   : > { %v2273_v33 = vpack.c.bf16 %v2216_v3, %v2215_v44  ;;  %v2272_v37 = vpack.c.bf16 %v2208_v2, %v2207_v24  ;;  %v2255_v1 = vsel %vm2099_vm13, %v3859_v17, %v5067_v11  ;;  %v2256_v14 = vsel %vm2099_vm13, %v5063_v52, %v5065_v6  ;;  %v3927_v2 = vld [vmem:[%s5230_s5 + $0x8] sm:$0xff]  }
 0x40b   : > { %v2284_v21 = vpack.c.bf16 %v2255_v1, %v2254_v58  ;;  %v2268_v44 = vpack.c.bf16 %v5024_v18, %v5026_v45  ;;  %v2274_v3 = vpack.c.bf16 %v5065_v6, %v5067_v11 }
 0x40c   : > { %2513 = vmatprep.mubr.bf16.mxu1 %v2273_v33  ;;  %v3928_v33 = vld [vmem:[%s5230_s5 + $0x50] sm:$0xff]  }
 0x40d   : > { %v3868_v7 = vpop.permute.xlu0 %3867  ;;  %v5079_v27 = vpop.permute.xlu1 %3872 }
 0x40e   : > { %v3870_v25 = vunpack.i.h.bf16 %v3868_v7  ;;  %v3869_v20 = vunpack.i.l.bf16 %v3868_v7  ;;  %v3875_v19 = vunpack.i.h.bf16 %v5079_v27  ;;  %v3874_v41 = vunpack.i.l.bf16 %v5079_v27  ;;  %2514 = vmatmul.mubr.bf16.gmra.mrb[8].mxu1 %v2272_v37  ;;  %v3929_v37 = vld [vmem:[%s5230_s5 + $0x10] sm:$0xff]   ;;  %v3930_v7 = vld [vmem:[%s5230_s5 + $0x58] sm:$0xff]  }
 0x40f   : > { %v3931_v27 = vld [vmem:[%s5230_s5 + $0x18] sm:$0xff]  }
 0x410   : > { %v2217_v49 = vsel %vm278_vm10, %v3869_v20, %v3874_v41  ;;  %v2218_v59 = vsel %vm278_vm10, %v3870_v25, %v3875_v19  ;;  %v2209_v22 = vsel %vm2099_vm13, %v4993_v35, %v3869_v20  ;;  %v2210_v23 = vsel %vm2099_vm13, %v4996_v8, %v3870_v25  ;;  %v3932_v25 = vld [vmem:[%s5230_s5 + $0x60] sm:$0xff]  }
 0x411   : > { %v2224_v51 = vpop.permute.xlu0 %2223  ;;  %v3878_v34 = vpop.permute.xlu1 %3877  ;;  %v2276_v26 = vpack.c.bf16 %v2218_v59, %v2217_v49  ;;  %v2275_v0 = vpack.c.bf16 %v2210_v23, %v2209_v22  ;;  %v2257_v16 = vsel %vm2099_vm13, %v3869_v20, %v3874_v41  ;;  %v2277_v52 = vpack.c.bf16 %v3875_v19, %v3874_v41  ;;  %v3933_v20 = vld [vmem:[%s5230_s5 + $0x20] sm:$0xff]   ;;  %v3934_v19 = vld [vmem:[%s5230_s5 + $0x68] sm:$0xff]   ;;  %v3936_v49 = vld [vmem:[%s5230_s5 + $0x70] sm:$0xff]  }
 0x412   : > { %v3880_v32 = vunpack.i.h.bf16 %v3878_v34  ;;  %v3879_v60 = vunpack.i.l.bf16 %v3878_v34  ;;  %v2287_v17 = vpack.c.bf16 %v2257_v16, %v2256_v14  ;;  %v3937_v59 = vld [vmem:[%s5230_s5 + $0x30] sm:$0xff]  }
 0x413   : > { %2521 = vmatprep.mubr.bf16.mxu1 %v2276_v26  ;;  %v5185_v26 = vld [vmem:[%s5229_s4] ss:$0 sm:$0xff] }
 0x414   : > { %v2258_v4 = vsel %vm278_vm10, %v2224_v51, %v3879_v60  ;;  %v2259_v56 = vsel %vm278_vm10, %v5026_v45, %v3880_v32  ;;  %v2280_v24 = vpack.c.bf16 %v3880_v32, %v3879_v60 }
 0x415   : > { %v2221_v10 = vpop.permute.xlu0 %2220  ;;  %v3883_v61 = vpop.permute.xlu1 %3882  ;;  %v2279_v13 = vpack.c.bf16 %v2259_v56, %v2258_v4 }
 0x416   : > { %v3885_v12 = vunpack.i.h.bf16 %v3883_v61  ;;  %v3884_v31 = vunpack.i.l.bf16 %v3883_v61  ;;  %2522 = vmatmul.mubr.bf16.gmra.mrb[12].mxu1 %v2275_v0  ;;  %v2250_v35 = vsel %vm2099_vm13, %v2221_v10, %v2224_v51 }
 0x417   : > { %2529 = vmatprep.mubr.bf16.mxu1 %v2279_v13  ;;  %v2278_v46 = vpack.c.bf16 %v2251_v42, %v2250_v35 }
 0x418   : > { %v2260_v8 = vsel %vm278_vm10, %v5024_v18, %v3884_v31  ;;  %v2261_v43 = vsel %vm278_vm10, %v5048_v15, %v3885_v12  ;;  %v2283_v18 = vpack.c.bf16 %v3885_v12, %v3884_v31  ;;  %v3924_v15 = vld [vmem:[%s5230_s5 + $0x40] sm:$0xff]  }
 0x419   : > { %v3888_v63 = vpop.permute.xlu0 %3887  ;;  %v2282_v9 = vpack.c.bf16 %v2261_v43, %v2260_v8  ;;  %v3893_v54 = vpop.permute.xlu1 %3892  ;;  %3133 = vmatprep.subr.bf16.mxu1 %v3924_v15 }
 0x41a   : > { %v3890_v29 = vunpack.i.h.bf16 %v3888_v63  ;;  %v3889_v36 = vunpack.i.l.bf16 %v3888_v63  ;;  %v3895_v47 = vunpack.i.h.bf16 %v3893_v54  ;;  %v3894_v38 = vunpack.i.l.bf16 %v3893_v54 }
 0x41c   : > { %v2262_v30 = vsel %vm278_vm10, %v5046_v39, %v3889_v36  ;;  %v2263_v5 = vsel %vm278_vm10, %v5067_v11, %v3890_v29  ;;  %v2264_v48 = vsel %vm278_vm10, %v5065_v6, %v3894_v38  ;;  %v2265_v57 = vsel %vm278_vm10, %v3874_v41, %v3895_v47  ;;  %v3925_v6 = vld [vmem:[%s5230_s5] sm:$0xff]   ;;  %v3926_v11 = vld [vmem:[%s5230_s5 + $0x48] sm:$0xff]  }
 0x41d   : > { %v2285_v53 = vpack.c.bf16 %v2263_v5, %v2262_v30  ;;  %v2288_v55 = vpack.c.bf16 %v2265_v57, %v2264_v48  ;;  %v2286_v45 = vpack.c.bf16 %v3890_v29, %v3889_v36  ;;  %v2289_v39 = vpack.c.bf16 %v3895_v47, %v3894_v38  ;;  %v3935_v41 = vld [vmem:[%s5230_s5 + $0x28] sm:$0xff]  }
 0x41e   : > { %2530 = vmatmul.mubr.bf16.gmra.mrb[16].mxu1 %v2278_v46 }
 0x41f   : > { %2537 = vmatprep.mubr.bf16.mxu1 %v2282_v9 }
 0x426   : > { %2538 = vmatmul.mubr.bf16.gmra.mrb[20].mxu1 %v2281_v50 }
 0x427   : > { %2545 = vmatprep.mubr.bf16.mxu1 %v2285_v53 }
 0x42e   : > { %2546 = vmatmul.mubr.bf16.gmra.mrb[24].mxu1 %v2284_v21 }
 0x42f   : > { %2553 = vmatprep.mubr.bf16.mxu1 %v2288_v55 }
 0x436   : > { %2554 = vmatmul.mubr.bf16.gmra.mrb[28].mxu1 %v2287_v17 }
 0x437   : > { %3233 = vmatprep.mubr.msk.bf16.mxu1 %vm1861_vm8, %v2268_v44 }
 0x43e   : > { %3234 = vmatmul.mubr.msk.bf16.vlgmr.msra.gmra.mrb[32].mxu1 %vm1861_vm8, %v2271_v40 }
 0x43f   : > { %3237 = vmatprep.mubr.msk.bf16.mxu1 %vm1861_vm8, %v2274_v3  ;;  %3134 = vmatpush3.bf16.msra.mxu1 %v3925_v6 }
 0x440   : > { %3135 = vmatprep.subr.bf16.mxu1 %v3926_v11 }
 0x443   : > { %3136 = vmatpush3.bf16.msra.mxu1 %v3927_v2 }
 0x444   : > { %3137 = vmatprep.subr.bf16.mxu1 %v3928_v33 }
 0x446   : > { %3238 = vmatmul.mubr.msk.bf16.gmra.mrb[36].mxu1 %vm1861_vm8, %v2277_v52 }
 0x447   : > { %3241 = vmatprep.mubr.msk.bf16.mxu1 %vm1861_vm8, %v2280_v24  ;;  %3138 = vmatpush3.bf16.msra.mxu1 %v3929_v37 }
 0x448   : > { %3139 = vmatprep.subr.bf16.mxu1 %v3930_v7 }
 0x44b   : > { %3140 = vmatpush3.bf16.msra.mxu1 %v3931_v27 }
 0x44c   : > { %3141 = vmatprep.subr.bf16.mxu1 %v3932_v25 }
 0x44e   : > { %3242 = vmatmul.mubr.msk.bf16.gmra.mrb[40].mxu1 %vm1861_vm8, %v2283_v18 }
 0x44f   : > { %3245 = vmatprep.mubr.msk.bf16.mxu1 %vm1861_vm8, %v2286_v45  ;;  %3142 = vmatpush3.bf16.msra.mxu1 %v3933_v20 }
 0x450   : > { %3143 = vmatprep.subr.bf16.mxu1 %v3934_v19 }
 0x453   : > { %3144 = vmatpush3.bf16.msra.mxu1 %v3935_v41 }
 0x454   : > { %3145 = vmatprep.subr.bf16.mxu1 %v3936_v49 }
 0x456   : > { %3246 = vmatmul.mubr.msk.bf16.gmra.mrb[44].mxu1 %vm1861_vm8, %v2289_v39 }
 0x457   : > { %3146 = vmatpush3.bf16.msra.mxu1 %v3937_v59 }
 0x4d1   : > { %v3075_v51 = vpop.f32.mrb[0].mxu1 }
 0x4d2   : > { %v3076_v34 = vpop.f32.mrb[1].mxu1 }
 0x4d3   : > { %v3077_v22 = vadd.f32 %v3076_v34, %v3075_v51  ;;  %v3078_v23 = vpop.f32.mrb[2].mxu1 }
 0x4d4   : > { %v3079_v32 = vpop.f32.mrb[3].mxu1 }
 0x4d5   : > { %v3080_v60 = vadd.f32 %v3079_v32, %v3078_v23  ;;  %v2500_v0 = vadd.f32 %v3077_v22, %v5185_v26 }
 0x4d7   : > { %v2503_v4 = vadd.f32 %v3080_v60, %v5185_v26 }
 0x4d9   : > { %v3081_v56 = vpop.f32.mrb[4].mxu1 }
 0x4da   : > { %v3082_v10 = vpop.f32.mrb[5].mxu1 }
 0x4db   : > { %v3083_v61 = vadd.f32 %v3082_v10, %v3081_v56  ;;  %v3084_v13 = vpop.f32.mrb[6].mxu1 }
 0x4dc   : > { %v3085_v12 = vpop.f32.mrb[7].mxu1 }
 0x4dd   : > { %v3086_v31 = vadd.f32 %v3085_v12, %v3084_v13  ;;  %v2508_v27 = vadd.f32 %v3083_v61, %v5185_v26 }
 0x4df   : > { %v2511_v41 = vadd.f32 %v3086_v31, %v5185_v26 }
 0x4e1   : > { %v3087_v35 = vpop.f32.mrb[8].mxu1 }
 0x4e2   : > { %v3088_v8 = vpop.f32.mrb[9].mxu1 }
 0x4e3   : > { %v3089_v43 = vadd.f32 %v3088_v8, %v3087_v35  ;;  %v3090_v42 = vpop.f32.mrb[10].mxu1 }
 0x4e4   : > { %v3091_v63 = vpop.f32.mrb[11].mxu1 }
 0x4e5   : > { %v3092_v46 = vadd.f32 %v3091_v63, %v3090_v42  ;;  %v2516_v9 = vadd.f32 %v3089_v43, %v5185_v26 }
 0x4e7   : > { %v2519_v29 = vadd.f32 %v3092_v46, %v5185_v26 }
 0x4e9   : > { %v3093_v36 = vpop.f32.mrb[12].mxu1 }
 0x4ea   : > { %v3094_v28 = vpop.f32.mrb[13].mxu1 }
 0x4eb   : > { %v3095_v30 = vadd.f32 %v3094_v28, %v3093_v36  ;;  %v3096_v5 = vpop.f32.mrb[14].mxu1 }
 0x4ec   : > { %v3097_v54 = vpop.f32.mrb[15].mxu1 }
 0x4ed   : > { %v3098_v62 = vadd.f32 %v3097_v54, %v3096_v5  ;;  %v2524_v23 = vadd.f32 %v3095_v30, %v5185_v26 }
 0x4ef   : > { %v2527_v10 = vadd.f32 %v3098_v62, %v5185_v26 }
 0x4f1   : > { %v3099_v50 = vpop.f32.mrb[16].mxu1 }
 0x4f2   : > { %v3100_v53 = vpop.f32.mrb[17].mxu1 }
 0x4f3   : > { %v3101_v47 = vadd.f32 %v3100_v53, %v3099_v50  ;;  %v3102_v38 = vpop.f32.mrb[18].mxu1 }
 0x4f4   : > { %v3103_v1 = vpop.f32.mrb[19].mxu1 }
 0x4f5   : > { %v3104_v48 = vadd.f32 %v3103_v1, %v3102_v38  ;;  %v2532_v57 = vadd.f32 %v3101_v47, %v5185_v26 }
 0x4f7   : > { %v2535_v58 = vadd.f32 %v3104_v48, %v5185_v26 }
 0x4f9   : > { %v3105_v21 = vpop.f32.mrb[20].mxu1 }
 0x4fa   : > { %v3106_v55 = vpop.f32.mrb[21].mxu1 }
 0x4fb   : > { %v3107_v16 = vadd.f32 %v3106_v55, %v3105_v21  ;;  %v3108_v14 = vpop.f32.mrb[22].mxu1 }
 0x4fc   : > { %v3109_v17 = vpop.f32.mrb[23].mxu1 }
 0x4fd   : > { %v3110_v44 = vadd.f32 %v3109_v17, %v3108_v14  ;;  %v2540_v43 = vadd.f32 %v3107_v16, %v5185_v26 }
 0x4ff   : > { %v2543_v63 = vadd.f32 %v3110_v44, %v5185_v26 }
 0x501   : > { %v3111_v40 = vpop.f32.mrb[24].mxu1 }
 0x502   : > { %v3112_v3 = vpop.f32.mrb[25].mxu1 }
 0x503   : > { %v3113_v52 = vadd.f32 %v3112_v3, %v3111_v40  ;;  %v3114_v24 = vpop.f32.mrb[26].mxu1 }
 0x504   : > { %v3115_v18 = vpop.f32.mrb[27].mxu1 }
 0x505   : > { %v3116_v45 = vadd.f32 %v3115_v18, %v3114_v24  ;;  %v2548_v39 = vadd.f32 %v3113_v52, %v5185_v26 }
 0x507   : > { %v5195_v15 = vadd.f32 %v3116_v45, %v5185_v26 }
 0x509   : > { %v3117_v6 = vpop.f32.mrb[28].mxu1 }
 0x50a   : > { %v3118_v11 = vpop.f32.mrb[29].mxu1 }
 0x50b   : > { %v3119_v2 = vadd.f32 %v3118_v11, %v3117_v6  ;;  %v3120_v33 = vpop.f32.mrb[30].mxu1  ;;  %v3939_v11 = vld [vmem:[%s5230_s5 + $0x38] sm:$0xff]  }
 0x50c   : > { %v3121_v37 = vpop.f32.mrb[31].mxu1 }
 0x50d   : > { %v3122_v7 = vadd.f32 %v3121_v37, %v3120_v33  ;;  %v2556_v21 = vadd.f32 %v3119_v2, %v5185_v26 }
 0x50f   : > { %v2559_v44 = vadd.f32 %v3122_v7, %v5185_v26 }
 0x511   : > { %v3235_v25 = vpop.f32.mrb[32].mxu1 }
 0x512   : > { %v2605_v20 = vadd.f32 %v3235_v25, %v2508_v27  ;;  %v2596_v19 = vpop.f32.mrb[33].mxu1 }
 0x513   : > { %v2597_v49 = vadd.f32 %v2596_v19, %v2500_v0  ;;  %v3236_v59 = vpop.f32.mrb[34].mxu1 }
 0x514   : > { %v2608_v51 = vadd.f32 %v3236_v59, %v2511_v41  ;;  %v2599_v34 = vpop.f32.mrb[35].mxu1  ;;  %v2661_v36 = vmax.f32 %v2605_v20, 0.0 }
 0x515   : > { %v2600_v22 = vadd.f32 %v2599_v34, %v2503_v4  ;;  %v2659_v54 = vmax.f32 %v2597_v49, 0.0 }
 0x516   : > { %v2662_v50 = vmax.f32 %v2608_v51, 0.0 }
 0x519   : > { %v3239_v32 = vpop.f32.mrb[36].mxu1 }
 0x51a   : > { %v2621_v60 = vadd.f32 %v3239_v32, %v2524_v23  ;;  %v2612_v56 = vpop.f32.mrb[37].mxu1 }
 0x51b   : > { %v2613_v13 = vadd.f32 %v2612_v56, %v2516_v9  ;;  %v3240_v12 = vpop.f32.mrb[38].mxu1 }
 0x51c   : > { %v2624_v61 = vadd.f32 %v3240_v12, %v2527_v10  ;;  %v2615_v35 = vpop.f32.mrb[39].mxu1  ;;  %v2665_v24 = vmax.f32 %v2621_v60, 0.0 }
 0x51d   : > { %v2616_v8 = vadd.f32 %v2615_v35, %v2519_v29  ;;  %v2660_v29 = vmax.f32 %v2600_v22, 0.0  ;;  %v2663_v2 = vmax.f32 %v2613_v13, 0.0  ;;  %v3003_v13 = vld [vmem:[%s5231_s6] ss:$0 sm:$0xff] }
 0x51e   : > { %v2666_v26 = vmax.f32 %v2624_v61, 0.0 }
 0x51f   : > { %v2664_v27 = vmax.f32 %v2616_v8, 0.0 }
 0x521   : > { %v3243_v31 = vpop.f32.mrb[40].mxu1 }
 0x522   : > { %v2637_v0 = vadd.f32 %v3243_v31, %v2540_v43  ;;  %v2628_v42 = vpop.f32.mrb[41].mxu1 }
 0x523   : > { %v2629_v4 = vadd.f32 %v2628_v42, %v2532_v57  ;;  %v3244_v46 = vpop.f32.mrb[42].mxu1 }
 0x524   : > { %v2669_v28 = vmax.f32 %v2637_v0, 0.0  ;;  %v2640_v30 = vadd.f32 %v3244_v46, %v2543_v63  ;;  %v2631_v5 = vpop.f32.mrb[43].mxu1 }
 0x525   : > { %v2667_v62 = vmax.f32 %v2629_v4, 0.0  ;;  %v2632_v9 = vadd.f32 %v2631_v5, %v2535_v58  ;;  %v3938_v58 = vld [vmem:[%s5230_s5 + $0x78] sm:$0xff]  }
 0x526   : > { %v2677_v53 = vmax.f32 %v2661_v36, %v2669_v28  ;;  %v2670_v47 = vmax.f32 %v2640_v30, 0.0  ;;  %3147 = vmatprep.subr.bf16.mxu1 %v3938_v58 }
 0x527   : > { %v2675_v38 = vmax.f32 %v2659_v54, %v2667_v62  ;;  %v2668_v1 = vmax.f32 %v2632_v9, 0.0  ;;  %3148 = vmatpush3.bf16.msra.mxu1 %v3939_v11 }
 0x528   : > { %v2678_v48 = vmax.f32 %v2662_v50, %v2670_v47 }
 0x529   : > { %v2676_v55 = vmax.f32 %v2660_v29, %v2668_v1  ;;  %v3247_v16 = vpop.f32.mrb[44].mxu1 }
 0x52a   : > { %v2684_v57 = vmax.f32 %v2677_v53, %v2678_v48  ;;  %v2653_v14 = vadd.f32 %v3247_v16, %v2556_v21  ;;  %v2644_v17 = vpop.f32.mrb[45].mxu1 }
 0x52b   : > { %v2683_v40 = vmax.f32 %v2675_v38, %v2676_v55  ;;  %v2645_v3 = vadd.f32 %v2644_v17, %v2548_v39  ;;  %v3248_v52 = vpop.f32.mrb[46].mxu1 }
 0x52c   : > { %v2673_v18 = vmax.f32 %v2653_v14, 0.0  ;;  %v2656_v45 = vadd.f32 %v3248_v52, %v2559_v44  ;;  %v2647_v6 = vpop.f32.mrb[47].mxu1 }
 0x52d   : > { %v2671_v33 = vmax.f32 %v2645_v3, 0.0  ;;  %v2648_v37 = vadd.f32 %v2647_v6, %v5195_v15 }
 0x52e   : > { %v2681_v39 = vmax.f32 %v2665_v24, %v2673_v18  ;;  %v2674_v7 = vmax.f32 %v2656_v45, 0.0 }
 0x52f   : > { %v2679_v25 = vmax.f32 %v2663_v2, %v2671_v33  ;;  %v2672_v20 = vmax.f32 %v2648_v37, 0.0 }
 0x530   : > { %v2682_v19 = vmax.f32 %v2666_v26, %v2674_v7 }
 0x531   : > { %v2680_v41 = vmax.f32 %v2664_v27, %v2672_v20 }
 0x532   : > { %v2686_v49 = vmax.f32 %v2681_v39, %v2682_v19 }
 0x533   : > { %v2685_v59 = vmax.f32 %v2679_v25, %v2680_v41 }
 0x534   : > { %v3896_v51 = vpack.i.bf16 %v2684_v57, %v2686_v49 }
 0x536   : > { %3897 = vrot.lane.b32.xlu0 %v3896_v51, %s3959_s23  ;;  %s2937_s23 = sshll.u32 %s5234_s25, 2 }
 0x537   : > { %s276_s27 = scalar_lea.vmem %s5232_s7, %s2937_s23 }
 0x5a8   : > { %v3898_v34 = vpop.permute.xlu0 %3897 }
 0x5a9   : > { %v3900_v22 = vunpack.i.h.bf16 %v3898_v34  ;;  %v3899_v23 = vunpack.i.l.bf16 %v3898_v34 }
 0x5ab   : > { %v2695_v15 = vsel %vm278_vm10, %v2683_v40, %v3900_v22  ;;  %v2696_v32 = vsel %vm278_vm10, %v2685_v59, %v3899_v23 }
 0x5ac   : > { %v2697_v60 = vpack.c.bf16 %v2695_v15, %v2695_v15  ;;  %v2698_v56 = vpack.c.bf16 %v2696_v32, %v2696_v32 }
 0x5ae   : > { %2866 = vmatprep.mubr.bf16.mxu1 %v2698_v56 }
 0x5af   : > { %2867 = vmatmul.mubr.bf16.vlgmr.msra.gmra.mrb[48].mxu1 %v2697_v60 }
 0x682   : > { %v3149_v10 = vpop.f32.mrb[48].mxu1 }
 0x683   : > { %v3150_v12 = vpop.f32.mrb[49].mxu1 }
 0x684   : > { %v3151_v61 = vadd.f32 %v3150_v12, %v3149_v10  ;;  %v3152_v35 = vpop.f32.mrb[50].mxu1 }
 0x685   : > { %v3153_v8 = vpop.f32.mrb[51].mxu1 }
 0x686   : > { %v2869_v43 = vadd.f32 %v3151_v61, %v3003_v13 }
 0x688   : > { %v2874_v31 = vmax.f32 %v2869_v43, 0.0 }
 0x68a   : > { %v2875_v0 = vpack.c.bf16 %v2874_v31, %v2874_v31 }
 0x68c   : > { %2877 = vst.msk [vmem:[%s276_s27] sm:$0xf] %vm2876_vm14, %v2875_v0 }
 0x68d PF: > { %s17_s24 = sadd.s32 1, %s3946_s24  }
 0x68e   : > { %p14_p4 = scmp.ge.s32.totalorder %s17_s24, 4  }
 0x690   :  { %16 = sbr.rel (!%p14_p4) target bundleno = 1 (0x1), region = 80 }

</bundles_post_ra>
